<compile_context>
chip_gen: v5e
topology: v5e:2x2
jax: 0.10.0
libtpu: 0.0.40
codegen_flags: <defaults>
</compile_context>

<pallas_src>
import functools

import jax
import jax.numpy as jnp
from jax.experimental import pallas as pl
from jax.experimental.pallas import tpu as pltpu

CMID = 256  # hidden channels of the FCN head


def _fcn_head_kernel(x_ref, w1_ref, shift_ref, w2_ref, b2_ref, o_ref, acc_ref, *, w_pad):
    # x_ref:     (1, 1, Cin, L)  bf16  halo'd row slab (flattened rows of width w_pad)
    # w1_ref:    (9, CMID, Cin)  bf16  per-tap 3x3 conv weights, BN scale folded in
    # shift_ref: (CMID, 1)       f32   folded BN shift = beta - mean * gamma / sqrt(var+eps)
    # w2_ref:    (1, CMID)       bf16  1x1 conv weights
    # b2_ref:    (1, 1)          f32   1x1 conv bias (SMEM scalar)
    # o_ref:     (1, 1, 1, TS)   f32   output tile, TS = TR * w_pad
    # acc_ref:   (CMID, TS)      f32   VMEM accumulator scratch
    ts = o_ref.shape[-1]
    # In-kernel im2col: tap (ky, kx) is a static lane-offset slice of the resident slab,
    # feeding 9 accumulating K=Cin MXU dots (f32 accumulation).
    for t in range(9):
        ky, kx = divmod(t, 3)
        tap = x_ref[0, 0, :, pl.ds(ky * w_pad + kx, ts)]                      # (Cin, TS) bf16
        d = jnp.dot(w1_ref[t], tap, preferred_element_type=jnp.float32)       # (CMID, TS) f32
        if t == 0:
            acc_ref[...] = d
        else:
            acc_ref[...] += d
    # BN shift + ReLU epilogue in f32 (v5e has no bf16 VPU).
    h = jnp.maximum(acc_ref[...] + shift_ref[...], 0.0)                       # (CMID, TS)
    # 1x1 conv (256 -> 1): spatial stays on lanes.
    out = jnp.dot(w2_ref[...], h.astype(jnp.bfloat16),
                  preferred_element_type=jnp.float32)                         # (1, TS)
    o_ref[0, 0] = out + b2_ref[0, 0]


def _vmem_capacity_bytes():
    try:
        return int(pltpu.get_tpu_info().vmem_capacity_bytes)
    except Exception:
        return 64 << 20  # conservative fallback: v7x has 64 MiB VMEM per TensorCore


def _pick_row_tile(h, w_pad, cin, n_batch, budget):
    """Largest TR (output rows per grid step) whose working set fits the VMEM budget."""
    w1_bytes = 9 * CMID * cin * 2                       # single-buffered (pl.Buffered(1))
    const_bytes = CMID * 4 + CMID * 2 + (64 << 10)      # BN shift + w2 + misc slack

    def fits(tr):
        slab_len = (tr + 2) * w_pad + 2
        ts = tr * w_pad
        slab = 2 * cin * slab_len * 2                   # double-buffered bf16 input slab
        acc = CMID * ts * 4                             # f32 accumulator scratch
        epi = CMID * ts * 6                             # ReLU result + bf16 cast temporaries
        outb = 2 * ts * 4                               # double-buffered f32 output tile
        return slab + acc + epi + outb + w1_bytes + const_bytes <= budget

    tr = h
    if n_batch == 1 and h >= 2:
        tr = -(-h // 2)     # >= 2 grid steps so v7x's second TensorCore gets work
    while tr > 1 and not fits(tr):
        tr -= 1
    return max(tr, 1)


def _const_spec(block_shape, index_map):
    """Grid-invariant operand: single-buffer it; fall back if pipeline_mode is unsupported."""
    try:
        return pl.BlockSpec(block_shape, index_map, pipeline_mode=pl.Buffered(1))
    except Exception:
        return pl.BlockSpec(block_shape, index_map)


def fcn_head_forward(x_nchw, w1, bn_gamma, bn_beta, bn_mean, bn_var, w2, b2,
                     eps=1e-5, row_tile=None):
    """x_nchw: (N, Cin, H, W); w1: (CMID, Cin, 3, 3); w2: (1, CMID, 1, 1); b2: (1,)."""
    N, Cin, H, W = x_nchw.shape
    H_p, W_p = H + 2, W + 2

    vmem_cap = _vmem_capacity_bytes()
    budget = min(int(vmem_cap * 0.65), 96 << 20)
    vmem_limit = min(int(vmem_cap * 0.80), 110 << 20)

    if row_tile is None:
        tr = _pick_row_tile(H, W_p, Cin, N, budget)
    else:
        tr = max(1, min(int(row_tile), H))
    n_rt = -(-H // tr)                 # ceil: nothing is silently dropped
    H_t = n_rt * tr                    # padded row count (tail rows are junk, sliced off)
    ts = tr * W_p                      # flattened spatial tile (lanes)
    slab_len = (tr + 2) * W_p + 2      # halo'd slab length (covers tap offsets up to 2*W_p+2)

    # ---------- glue: halo'd bf16 row slabs + parameter folding (plain JAX) ----------
    x_pad = jnp.pad(x_nchw.astype(jnp.bfloat16), ((0, 0), (0, 0), (1, 1), (1, 1)))
    x_flat = x_pad.reshape(N, Cin, H_p * W_p)
    tail = (H_t - H) * W_p + 2
    x_flat = jnp.pad(x_flat, ((0, 0), (0, 0), (0, tail)))
    # (N, n_rt, Cin, slab_len): each row tile carries its own 1-row halo so that conv taps
    # become static lane-offset slices in-kernel (duplication factor ~(tr+2)/tr, not 9x).
    slabs = jnp.stack(
        [x_flat[:, :, r * tr * W_p: r * tr * W_p + slab_len] for r in range(n_rt)], axis=1)

    inv_std = 1.0 / jnp.sqrt(bn_var.astype(jnp.float32) + eps)
    scale = bn_gamma.astype(jnp.float32) * inv_std                       # (CMID,)
    shift = bn_beta.astype(jnp.float32) - bn_mean.astype(jnp.float32) * scale
    # (CMID, Cin, 3, 3) -> (9, CMID, Cin) per-tap weights, BN scale folded in.
    w1_k = (jnp.transpose(w1.astype(jnp.float32), (2, 3, 0, 1)).reshape(9, CMID, Cin)
            * scale[None, :, None]).astype(jnp.bfloat16)
    shift_k = shift.reshape(CMID, 1)                                     # f32
    w2_k = w2.reshape(1, CMID).astype(jnp.bfloat16)                      # (1, CMID)
    b2_k = b2.reshape(1, 1).astype(jnp.float32)                          # SMEM scalar

    flops = 2 * N * n_rt * CMID * ts * (9 * Cin + 1)
    bytes_accessed = (slabs.size * 2 + w1_k.size * 2 + shift_k.size * 4
                      + w2_k.size * 2 + 4 + N * n_rt * ts * 4)

    kernel = functools.partial(_fcn_head_kernel, w_pad=W_p)

    out = pl.pallas_call(
        kernel,
        out_shape=jax.ShapeDtypeStruct((N, n_rt, 1, ts), jnp.float32),
        grid_spec=pltpu.PrefetchScalarGridSpec(
            num_scalar_prefetch=0,
            grid=(N, n_rt),
            in_specs=[
                pl.BlockSpec((1, 1, Cin, slab_len), lambda n, r: (n, r, 0, 0)),
                _const_spec((9, CMID, Cin), lambda n, r: (0, 0, 0)),
                _const_spec((CMID, 1), lambda n, r: (0, 0)),
                _const_spec((1, CMID), lambda n, r: (0, 0)),
                pl.BlockSpec(memory_space=pltpu.MemorySpace.SMEM),
            ],
            out_specs=pl.BlockSpec((1, 1, 1, ts), lambda n, r: (n, r, 0, 0)),
            scratch_shapes=[pltpu.VMEM((CMID, ts), jnp.float32)],
        ),
        compiler_params=pltpu.CompilerParams(
            dimension_semantics=("parallel", "parallel"),
            vmem_limit_bytes=vmem_limit,
        ),
        cost_estimate=pl.CostEstimate(
            flops=flops, transcendentals=0, bytes_accessed=bytes_accessed),
    )(slabs, w1_k, shift_k, w2_k, b2_k)

    # (N, n_rt, 1, tr*W_p) -> (N, H_t, W_p) -> drop halo columns / padded rows -> NCHW.
    out = out.reshape(N, H_t, W_p)[:, :H, :W]
    return out.reshape(N, 1, H, W)


def reference_forward(x, w1, gamma, beta, mean, var, w2, b2, eps=1e-5):
    """Plain-JAX reference mirroring the PyTorch module (eval-mode BN)."""
    y = jax.lax.conv_general_dilated(
        x, w1, window_strides=(1, 1), padding=((1, 1), (1, 1)),
        dimension_numbers=('NCHW', 'OIHW', 'NCHW'))
    y = gamma.reshape(1, -1, 1, 1) * (y - mean.reshape(1, -1, 1, 1)) \
        / jnp.sqrt(var.reshape(1, -1, 1, 1) + eps) + beta.reshape(1, -1, 1, 1)
    y = jnp.maximum(y, 0.0)
    y = jax.lax.conv_general_dilated(
        y, w2, window_strides=(1, 1), padding=((0, 0), (0, 0)),
        dimension_numbers=('NCHW', 'OIHW', 'NCHW')) + b2.reshape(1, -1, 1, 1)
    return y


if __name__ == "__main__":
    key = jax.random.PRNGKey(0)
    k_x, k_w1, k_w2, k_b2, k_x2, k_w1b = jax.random.split(key, 6)

    # BN params mirroring FCNHead._init_weight: gamma=1, beta=0 (running mean=0, var=1).
    bn_gamma = jnp.ones((CMID,), jnp.float32)
    bn_beta = jnp.zeros((CMID,), jnp.float32)
    bn_mean = jnp.zeros((CMID,), jnp.float32)
    bn_var = jnp.ones((CMID,), jnp.float32)

    # Case 1: batch=2, Cin=4, 16x16.  row_tile=4 exercises the multi-row-tile halo'd grid
    # (grid (2, 4)); the default path exercises the VMEM-aware tile picker.
    N, Cin, H, W = 2, 4, 16, 16
    x = jax.random.normal(k_x, (N, Cin, H, W), jnp.float32)
    w1 = jax.random.normal(k_w1, (CMID, Cin, 3, 3), jnp.float32) * jnp.sqrt(2.0 / (Cin * 9))
    w2 = jax.random.normal(k_w2, (1, CMID, 1, 1), jnp.float32) * jnp.sqrt(2.0 / CMID)
    b2 = jax.random.normal(k_b2, (1,), jnp.float32) * 0.01

    ref = jax.block_until_ready(
        reference_forward(x, w1, bn_gamma, bn_beta, bn_mean, bn_var, w2, b2))
    out_tiled = jax.block_until_ready(
        fcn_head_forward(x, w1, bn_gamma, bn_beta, bn_mean, bn_var, w2, b2, row_tile=4))
    out_auto = jax.block_until_ready(
        fcn_head_forward(x, w1, bn_gamma, bn_beta, bn_mean, bn_var, w2, b2))

    assert out_tiled.shape == (N, 1, H, W), out_tiled.shape
    assert out_auto.shape == (N, 1, H, W), out_auto.shape
    # bf16 operands with f32 accumulation -> loosen tolerance vs the f32 reference.
    assert jnp.allclose(out_tiled, ref, atol=1e-1, rtol=5e-2), \
        float(jnp.max(jnp.abs(out_tiled - ref)))
    assert jnp.allclose(out_auto, ref, atol=1e-1, rtol=5e-2), \
        float(jnp.max(jnp.abs(out_auto - ref)))

    # Case 2: batch=1, odd spatial size (7x5), auto tiling — exercises the N==1 work split
    # (ceil(H/2) rows per tile for v7x's 2 TensorCores) and padded-tail / halo-column slicing.
    N2, Cin2, H2, W2 = 1, 3, 7, 5
    x2 = jax.random.normal(k_x2, (N2, Cin2, H2, W2), jnp.float32)
    w1b = jax.random.normal(k_w1b, (CMID, Cin2, 3, 3), jnp.float32) * jnp.sqrt(2.0 / (Cin2 * 9))
    ref2 = jax.block_until_ready(
        reference_forward(x2, w1b, bn_gamma, bn_beta, bn_mean, bn_var, w2, b2))
    out2 = jax.block_until_ready(
        fcn_head_forward(x2, w1b, bn_gamma, bn_beta, bn_mean, bn_var, w2, b2))
    assert out2.shape == (N2, 1, H2, W2), out2.shape
    assert jnp.allclose(out2, ref2, atol=1e-1, rtol=5e-2), \
        float(jnp.max(jnp.abs(out2 - ref2)))

    print("KERNEL_OK")
</pallas_src>

<mosaic_0001>
module attributes {stable_mosaic.version = 11 : i64} {
  func.func @_fcn_head_kernel(%arg0: i32, %arg1: i32, %arg2: memref<1x1x4x110xbf16, #tpu.memory_space<vmem>>, %arg3: memref<9x256x4xbf16, #tpu.memory_space<vmem>>, %arg4: memref<256x1xf32, #tpu.memory_space<vmem>>, %arg5: memref<1x256xbf16, #tpu.memory_space<vmem>>, %arg6: memref<1x1xf32, #tpu.memory_space<smem>>, %arg7: memref<1x1x1x72xf32, #tpu.memory_space<vmem>>, %arg8: memref<256x72xf32, #tpu.memory_space<vmem>>) attributes {dimension_semantics = [#tpu.dimension_semantics<parallel>, #tpu.dimension_semantics<parallel>], iteration_bounds = array<i64: 2, 4>, scalar_prefetch = 0 : i64, scratch_operands = 1 : i64, tpu.core_type = #tpu.core_type<tc>, window_params = [{transform_indices = @transform_0, window_bounds = array<i64: 1, 1, 4, 110>}, {pipeline_mode = #tpu.pipeline_mode<synchronous>, transform_indices = @transform_1, window_bounds = array<i64: 9, 256, 4>}, {pipeline_mode = #tpu.pipeline_mode<synchronous>, transform_indices = @transform_2, window_bounds = array<i64: 256, 1>}, {pipeline_mode = #tpu.pipeline_mode<synchronous>, transform_indices = @transform_3, window_bounds = array<i64: 1, 256>}, {transform_indices = @transform_4, window_bounds = array<i64: 1, 1>}, {transform_indices = @transform_5, window_bounds = array<i64: 1, 1, 1, 72>}]} {
    %c0 = arith.constant 0 : index
    %c0_0 = arith.constant 0 : index
    %c0_1 = arith.constant 0 : index
    %c0_2 = arith.constant 0 : index
    %0 = vector.load %arg2[%c0, %c0_0, %c0_1, %c0_2] : memref<1x1x4x110xbf16, #tpu.memory_space<vmem>>, vector<1x1x4x72xbf16>
    %1 = vector.shape_cast %0 : vector<1x1x4x72xbf16> to vector<4x72xbf16>
    %c0_3 = arith.constant 0 : index
    %c0_4 = arith.constant 0 : index
    %c0_5 = arith.constant 0 : index
    %2 = vector.load %arg3[%c0_3, %c0_4, %c0_5] : memref<9x256x4xbf16, #tpu.memory_space<vmem>>, vector<1x256x4xbf16>
    %3 = vector.shape_cast %2 : vector<1x256x4xbf16> to vector<256x4xbf16>
    %cst = arith.constant dense<0.000000e+00> : vector<256x72xf32>
    %4 = tpu.matmul %3, %1, %cst {dimension_numbers = #tpu.dot_dimension_numbers<[1], [0], [0], [1], [0, 0, 1, 1], [], []>} : vector<256x4xbf16>, vector<4x72xbf16>, vector<256x72xf32> -> vector<256x72xf32>
    %c0_6 = arith.constant 0 : index
    %c0_7 = arith.constant 0 : index
    %5 = vector.load %arg8[%c0_6, %c0_7] : memref<256x72xf32, #tpu.memory_space<vmem>>, vector<256x72xf32>
    tpu.vector_store %arg8[%c0_6, %c0_7], %4 {strides = array<i32>} : memref<256x72xf32, #tpu.memory_space<vmem>>, vector<256x72xf32>,
    %c0_8 = arith.constant 0 : index
    %c0_9 = arith.constant 0 : index
    %c0_10 = arith.constant 0 : index
    %c1 = arith.constant 1 : index
    %6 = vector.load %arg2[%c0_8, %c0_9, %c0_10, %c1] : memref<1x1x4x110xbf16, #tpu.memory_space<vmem>>, vector<1x1x4x72xbf16>
    %7 = vector.shape_cast %6 : vector<1x1x4x72xbf16> to vector<4x72xbf16>
    %c1_11 = arith.constant 1 : index
    %c0_12 = arith.constant 0 : index
    %c0_13 = arith.constant 0 : index
    %8 = vector.load %arg3[%c1_11, %c0_12, %c0_13] : memref<9x256x4xbf16, #tpu.memory_space<vmem>>, vector<1x256x4xbf16>
    %9 = vector.shape_cast %8 : vector<1x256x4xbf16> to vector<256x4xbf16>
    %cst_14 = arith.constant dense<0.000000e+00> : vector<256x72xf32>
    %10 = tpu.matmul %9, %7, %cst_14 {dimension_numbers = #tpu.dot_dimension_numbers<[1], [0], [0], [1], [0, 0, 1, 1], [], []>} : vector<256x4xbf16>, vector<4x72xbf16>, vector<256x72xf32> -> vector<256x72xf32>
    %c0_15 = arith.constant 0 : index
    %c0_16 = arith.constant 0 : index
    %11 = vector.load %arg8[%c0_15, %c0_16] : memref<256x72xf32, #tpu.memory_space<vmem>>, vector<256x72xf32>
    %12 = arith.addf %11, %10 : vector<256x72xf32>
    %c0_17 = arith.constant 0 : index
    %c0_18 = arith.constant 0 : index
    %13 = vector.load %arg8[%c0_17, %c0_18] : memref<256x72xf32, #tpu.memory_space<vmem>>, vector<256x72xf32>
    tpu.vector_store %arg8[%c0_17, %c0_18], %12 {strides = array<i32>} : memref<256x72xf32, #tpu.memory_space<vmem>>, vector<256x72xf32>,
    %c0_19 = arith.constant 0 : index
    %c0_20 = arith.constant 0 : index
    %c0_21 = arith.constant 0 : index
    %c2 = arith.constant 2 : index
    %14 = vector.load %arg2[%c0_19, %c0_20, %c0_21, %c2] : memref<1x1x4x110xbf16, #tpu.memory_space<vmem>>, vector<1x1x4x72xbf16>
    %15 = vector.shape_cast %14 : vector<1x1x4x72xbf16> to vector<4x72xbf16>
    %c2_22 = arith.constant 2 : index
    %c0_23 = arith.constant 0 : index
    %c0_24 = arith.constant 0 : index
    %16 = vector.load %arg3[%c2_22, %c0_23, %c0_24] : memref<9x256x4xbf16, #tpu.memory_space<vmem>>, vector<1x256x4xbf16>
    %17 = vector.shape_cast %16 : vector<1x256x4xbf16> to vector<256x4xbf16>
    %cst_25 = arith.constant dense<0.000000e+00> : vector<256x72xf32>
    %18 = tpu.matmul %17, %15, %cst_25 {dimension_numbers = #tpu.dot_dimension_numbers<[1], [0], [0], [1], [0, 0, 1, 1], [], []>} : vector<256x4xbf16>, vector<4x72xbf16>, vector<256x72xf32> -> vector<256x72xf32>
    %c0_26 = arith.constant 0 : index
    %c0_27 = arith.constant 0 : index
    %19 = vector.load %arg8[%c0_26, %c0_27] : memref<256x72xf32, #tpu.memory_space<vmem>>, vector<256x72xf32>
    %20 = arith.addf %19, %18 : vector<256x72xf32>
    %c0_28 = arith.constant 0 : index
    %c0_29 = arith.constant 0 : index
    %21 = vector.load %arg8[%c0_28, %c0_29] : memref<256x72xf32, #tpu.memory_space<vmem>>, vector<256x72xf32>
    tpu.vector_store %arg8[%c0_28, %c0_29], %20 {strides = array<i32>} : memref<256x72xf32, #tpu.memory_space<vmem>>, vector<256x72xf32>,
    %c0_30 = arith.constant 0 : index
    %c0_31 = arith.constant 0 : index
    %c0_32 = arith.constant 0 : index
    %c18 = arith.constant 18 : index
    %22 = vector.load %arg2[%c0_30, %c0_31, %c0_32, %c18] : memref<1x1x4x110xbf16, #tpu.memory_space<vmem>>, vector<1x1x4x72xbf16>
    %23 = vector.shape_cast %22 : vector<1x1x4x72xbf16> to vector<4x72xbf16>
    %c3 = arith.constant 3 : index
    %c0_33 = arith.constant 0 : index
    %c0_34 = arith.constant 0 : index
    %24 = vector.load %arg3[%c3, %c0_33, %c0_34] : memref<9x256x4xbf16, #tpu.memory_space<vmem>>, vector<1x256x4xbf16>
    %25 = vector.shape_cast %24 : vector<1x256x4xbf16> to vector<256x4xbf16>
    %cst_35 = arith.constant dense<0.000000e+00> : vector<256x72xf32>
    %26 = tpu.matmul %25, %23, %cst_35 {dimension_numbers = #tpu.dot_dimension_numbers<[1], [0], [0], [1], [0, 0, 1, 1], [], []>} : vector<256x4xbf16>, vector<4x72xbf16>, vector<256x72xf32> -> vector<256x72xf32>
    %c0_36 = arith.constant 0 : index
    %c0_37 = arith.constant 0 : index
    %27 = vector.load %arg8[%c0_36, %c0_37] : memref<256x72xf32, #tpu.memory_space<vmem>>, vector<256x72xf32>
    %28 = arith.addf %27, %26 : vector<256x72xf32>
    %c0_38 = arith.constant 0 : index
    %c0_39 = arith.constant 0 : index
    %29 = vector.load %arg8[%c0_38, %c0_39] : memref<256x72xf32, #tpu.memory_space<vmem>>, vector<256x72xf32>
    tpu.vector_store %arg8[%c0_38, %c0_39], %28 {strides = array<i32>} : memref<256x72xf32, #tpu.memory_space<vmem>>, vector<256x72xf32>,
    %c0_40 = arith.constant 0 : index
    %c0_41 = arith.constant 0 : index
    %c0_42 = arith.constant 0 : index
    %c19 = arith.constant 19 : index
    %30 = vector.load %arg2[%c0_40, %c0_41, %c0_42, %c19] : memref<1x1x4x110xbf16, #tpu.memory_space<vmem>>, vector<1x1x4x72xbf16>
    %31 = vector.shape_cast %30 : vector<1x1x4x72xbf16> to vector<4x72xbf16>
    %c4 = arith.constant 4 : index
    %c0_43 = arith.constant 0 : index
    %c0_44 = arith.constant 0 : index
    %32 = vector.load %arg3[%c4, %c0_43, %c0_44] : memref<9x256x4xbf16, #tpu.memory_space<vmem>>, vector<1x256x4xbf16>
    %33 = vector.shape_cast %32 : vector<1x256x4xbf16> to vector<256x4xbf16>
    %cst_45 = arith.constant dense<0.000000e+00> : vector<256x72xf32>
    %34 = tpu.matmul %33, %31, %cst_45 {dimension_numbers = #tpu.dot_dimension_numbers<[1], [0], [0], [1], [0, 0, 1, 1], [], []>} : vector<256x4xbf16>, vector<4x72xbf16>, vector<256x72xf32> -> vector<256x72xf32>
    %c0_46 = arith.constant 0 : index
    %c0_47 = arith.constant 0 : index
    %35 = vector.load %arg8[%c0_46, %c0_47] : memref<256x72xf32, #tpu.memory_space<vmem>>, vector<256x72xf32>
    %36 = arith.addf %35, %34 : vector<256x72xf32>
    %c0_48 = arith.constant 0 : index
    %c0_49 = arith.constant 0 : index
    %37 = vector.load %arg8[%c0_48, %c0_49] : memref<256x72xf32, #tpu.memory_space<vmem>>, vector<256x72xf32>
    tpu.vector_store %arg8[%c0_48, %c0_49], %36 {strides = array<i32>} : memref<256x72xf32, #tpu.memory_space<vmem>>, vector<256x72xf32>,
    %c0_50 = arith.constant 0 : index
    %c0_51 = arith.constant 0 : index
    %c0_52 = arith.constant 0 : index
    %c20 = arith.constant 20 : index
    %38 = vector.load %arg2[%c0_50, %c0_51, %c0_52, %c20] : memref<1x1x4x110xbf16, #tpu.memory_space<vmem>>, vector<1x1x4x72xbf16>
    %39 = vector.shape_cast %38 : vector<1x1x4x72xbf16> to vector<4x72xbf16>
    %c5 = arith.constant 5 : index
    %c0_53 = arith.constant 0 : index
    %c0_54 = arith.constant 0 : index
    %40 = vector.load %arg3[%c5, %c0_53, %c0_54] : memref<9x256x4xbf16, #tpu.memory_space<vmem>>, vector<1x256x4xbf16>
    %41 = vector.shape_cast %40 : vector<1x256x4xbf16> to vector<256x4xbf16>
    %cst_55 = arith.constant dense<0.000000e+00> : vector<256x72xf32>
    %42 = tpu.matmul %41, %39, %cst_55 {dimension_numbers = #tpu.dot_dimension_numbers<[1], [0], [0], [1], [0, 0, 1, 1], [], []>} : vector<256x4xbf16>, vector<4x72xbf16>, vector<256x72xf32> -> vector<256x72xf32>
    %c0_56 = arith.constant 0 : index
    %c0_57 = arith.constant 0 : index
    %43 = vector.load %arg8[%c0_56, %c0_57] : memref<256x72xf32, #tpu.memory_space<vmem>>, vector<256x72xf32>
    %44 = arith.addf %43, %42 : vector<256x72xf32>
    %c0_58 = arith.constant 0 : index
    %c0_59 = arith.constant 0 : index
    %45 = vector.load %arg8[%c0_58, %c0_59] : memref<256x72xf32, #tpu.memory_space<vmem>>, vector<256x72xf32>
    tpu.vector_store %arg8[%c0_58, %c0_59], %44 {strides = array<i32>} : memref<256x72xf32, #tpu.memory_space<vmem>>, vector<256x72xf32>,
    %c0_60 = arith.constant 0 : index
    %c0_61 = arith.constant 0 : index
    %c0_62 = arith.constant 0 : index
    %c36 = arith.constant 36 : index
    %46 = vector.load %arg2[%c0_60, %c0_61, %c0_62, %c36] : memref<1x1x4x110xbf16, #tpu.memory_space<vmem>>, vector<1x1x4x72xbf16>
    %47 = vector.shape_cast %46 : vector<1x1x4x72xbf16> to vector<4x72xbf16>
    %c6 = arith.constant 6 : index
    %c0_63 = arith.constant 0 : index
    %c0_64 = arith.constant 0 : index
    %48 = vector.load %arg3[%c6, %c0_63, %c0_64] : memref<9x256x4xbf16, #tpu.memory_space<vmem>>, vector<1x256x4xbf16>
    %49 = vector.shape_cast %48 : vector<1x256x4xbf16> to vector<256x4xbf16>
    %cst_65 = arith.constant dense<0.000000e+00> : vector<256x72xf32>
    %50 = tpu.matmul %49, %47, %cst_65 {dimension_numbers = #tpu.dot_dimension_numbers<[1], [0], [0], [1], [0, 0, 1, 1], [], []>} : vector<256x4xbf16>, vector<4x72xbf16>, vector<256x72xf32> -> vector<256x72xf32>
    %c0_66 = arith.constant 0 : index
    %c0_67 = arith.constant 0 : index
    %51 = vector.load %arg8[%c0_66, %c0_67] : memref<256x72xf32, #tpu.memory_space<vmem>>, vector<256x72xf32>
    %52 = arith.addf %51, %50 : vector<256x72xf32>
    %c0_68 = arith.constant 0 : index
    %c0_69 = arith.constant 0 : index
    %53 = vector.load %arg8[%c0_68, %c0_69] : memref<256x72xf32, #tpu.memory_space<vmem>>, vector<256x72xf32>
    tpu.vector_store %arg8[%c0_68, %c0_69], %52 {strides = array<i32>} : memref<256x72xf32, #tpu.memory_space<vmem>>, vector<256x72xf32>,
    %c0_70 = arith.constant 0 : index
    %c0_71 = arith.constant 0 : index
    %c0_72 = arith.constant 0 : index
    %c37 = arith.constant 37 : index
    %54 = vector.load %arg2[%c0_70, %c0_71, %c0_72, %c37] : memref<1x1x4x110xbf16, #tpu.memory_space<vmem>>, vector<1x1x4x72xbf16>
    %55 = vector.shape_cast %54 : vector<1x1x4x72xbf16> to vector<4x72xbf16>
    %c7 = arith.constant 7 : index
    %c0_73 = arith.constant 0 : index
    %c0_74 = arith.constant 0 : index
    %56 = vector.load %arg3[%c7, %c0_73, %c0_74] : memref<9x256x4xbf16, #tpu.memory_space<vmem>>, vector<1x256x4xbf16>
    %57 = vector.shape_cast %56 : vector<1x256x4xbf16> to vector<256x4xbf16>
    %cst_75 = arith.constant dense<0.000000e+00> : vector<256x72xf32>
    %58 = tpu.matmul %57, %55, %cst_75 {dimension_numbers = #tpu.dot_dimension_numbers<[1], [0], [0], [1], [0, 0, 1, 1], [], []>} : vector<256x4xbf16>, vector<4x72xbf16>, vector<256x72xf32> -> vector<256x72xf32>
    %c0_76 = arith.constant 0 : index
    %c0_77 = arith.constant 0 : index
    %59 = vector.load %arg8[%c0_76, %c0_77] : memref<256x72xf32, #tpu.memory_space<vmem>>, vector<256x72xf32>
    %60 = arith.addf %59, %58 : vector<256x72xf32>
    %c0_78 = arith.constant 0 : index
    %c0_79 = arith.constant 0 : index
    %61 = vector.load %arg8[%c0_78, %c0_79] : memref<256x72xf32, #tpu.memory_space<vmem>>, vector<256x72xf32>
    tpu.vector_store %arg8[%c0_78, %c0_79], %60 {strides = array<i32>} : memref<256x72xf32, #tpu.memory_space<vmem>>, vector<256x72xf32>,
    %c0_80 = arith.constant 0 : index
    %c0_81 = arith.constant 0 : index
    %c0_82 = arith.constant 0 : index
    %c38 = arith.constant 38 : index
    %62 = vector.load %arg2[%c0_80, %c0_81, %c0_82, %c38] : memref<1x1x4x110xbf16, #tpu.memory_space<vmem>>, vector<1x1x4x72xbf16>
    %63 = vector.shape_cast %62 : vector<1x1x4x72xbf16> to vector<4x72xbf16>
    %c8 = arith.constant 8 : index
    %c0_83 = arith.constant 0 : index
    %c0_84 = arith.constant 0 : index
    %64 = vector.load %arg3[%c8, %c0_83, %c0_84] : memref<9x256x4xbf16, #tpu.memory_space<vmem>>, vector<1x256x4xbf16>
    %65 = vector.shape_cast %64 : vector<1x256x4xbf16> to vector<256x4xbf16>
    %cst_85 = arith.constant dense<0.000000e+00> : vector<256x72xf32>
    %66 = tpu.matmul %65, %63, %cst_85 {dimension_numbers = #tpu.dot_dimension_numbers<[1], [0], [0], [1], [0, 0, 1, 1], [], []>} : vector<256x4xbf16>, vector<4x72xbf16>, vector<256x72xf32> -> vector<256x72xf32>
    %c0_86 = arith.constant 0 : index
    %c0_87 = arith.constant 0 : index
    %67 = vector.load %arg8[%c0_86, %c0_87] : memref<256x72xf32, #tpu.memory_space<vmem>>, vector<256x72xf32>
    %68 = arith.addf %67, %66 : vector<256x72xf32>
    %c0_88 = arith.constant 0 : index
    %c0_89 = arith.constant 0 : index
    %69 = vector.load %arg8[%c0_88, %c0_89] : memref<256x72xf32, #tpu.memory_space<vmem>>, vector<256x72xf32>
    tpu.vector_store %arg8[%c0_88, %c0_89], %68 {strides = array<i32>} : memref<256x72xf32, #tpu.memory_space<vmem>>, vector<256x72xf32>,
    %c0_90 = arith.constant 0 : index
    %c0_91 = arith.constant 0 : index
    %70 = vector.load %arg8[%c0_90, %c0_91] : memref<256x72xf32, #tpu.memory_space<vmem>>, vector<256x72xf32>
    %c0_92 = arith.constant 0 : index
    %c0_93 = arith.constant 0 : index
    %71 = vector.load %arg4[%c0_92, %c0_93] : memref<256x1xf32, #tpu.memory_space<vmem>>, vector<256x1xf32>
    %72 = vector.broadcast %71 : vector<256x1xf32> to vector<256x72xf32>
    %73 = arith.addf %70, %72 : vector<256x72xf32>
    %cst_94 = arith.constant 0.000000e+00 : f32
    %74 = vector.broadcast %cst_94 : f32 to vector<256x72xf32>
    %75 = arith.maximumf %73, %74 : vector<256x72xf32>
    %c0_95 = arith.constant 0 : index
    %c0_96 = arith.constant 0 : index
    %76 = vector.load %arg5[%c0_95, %c0_96] : memref<1x256xbf16, #tpu.memory_space<vmem>>, vector<1x256xbf16>
    %77 = arith.truncf %75 : vector<256x72xf32> to vector<256x72xbf16>
    %cst_97 = arith.constant dense<0.000000e+00> : vector<1x72xf32>
    %78 = tpu.matmul %76, %77, %cst_97 {dimension_numbers = #tpu.dot_dimension_numbers<[1], [0], [0], [1], [0, 0, 1, 1], [], []>} : vector<1x256xbf16>, vector<256x72xbf16>, vector<1x72xf32> -> vector<1x72xf32>
    %c0_98 = arith.constant 0 : index
    %c0_99 = arith.constant 0 : index
    %79 = memref.load %arg6[%c0_98, %c0_99] : memref<1x1xf32, #tpu.memory_space<smem>>
    %80 = vector.broadcast %79 : f32 to vector<1x72xf32>
    %81 = arith.addf %78, %80 : vector<1x72xf32>
    %c0_100 = arith.constant 0 : index
    %c0_101 = arith.constant 0 : index
    %c0_102 = arith.constant 0 : index
    %c0_103 = arith.constant 0 : index
    %82 = vector.load %arg7[%c0_100, %c0_101, %c0_102, %c0_103] : memref<1x1x1x72xf32, #tpu.memory_space<vmem>>, vector<1x1x1x72xf32>
    %83 = vector.shape_cast %82 : vector<1x1x1x72xf32> to vector<1x72xf32>
    %84 = vector.shape_cast %81 : vector<1x72xf32> to vector<1x1x1x72xf32>
    tpu.vector_store %arg7[%c0_100, %c0_101, %c0_102, %c0_103], %84 {strides = array<i32>} : memref<1x1x1x72xf32, #tpu.memory_space<vmem>>, vector<1x1x1x72xf32>,
    return
  }
  func.func @transform_0(%arg0: i32, %arg1: i32) -> (i32, i32, i32, i32) {
    %c0_i32 = arith.constant 0 : i32
    %c0_i32_0 = arith.constant 0 : i32
    %c0_i32_1 = arith.constant 0 : i32
    return %arg0, %arg1, %c0_i32, %c0_i32_0 : i32, i32, i32, i32
  }
  func.func @transform_1(%arg0: i32, %arg1: i32) -> (i32, i32, i32) {
    %c0_i32 = arith.constant 0 : i32
    %c0_i32_0 = arith.constant 0 : i32
    %c0_i32_1 = arith.constant 0 : i32
    %c0_i32_2 = arith.constant 0 : i32
    return %c0_i32, %c0_i32_0, %c0_i32_1 : i32, i32, i32
  }
  func.func @transform_2(%arg0: i32, %arg1: i32) -> (i32, i32) {
    %c0_i32 = arith.constant 0 : i32
    %c0_i32_0 = arith.constant 0 : i32
    %c0_i32_1 = arith.constant 0 : i32
    return %c0_i32, %c0_i32_0 : i32, i32
  }
  func.func @transform_3(%arg0: i32, %arg1: i32) -> (i32, i32) {
    %c0_i32 = arith.constant 0 : i32
    %c0_i32_0 = arith.constant 0 : i32
    %c0_i32_1 = arith.constant 0 : i32
    return %c0_i32, %c0_i32_0 : i32, i32
  }
  func.func @transform_4(%arg0: i32, %arg1: i32) -> (i32, i32) {
    %c0_i32 = arith.constant 0 : i32
    %c0_i32_0 = arith.constant 0 : i32
    %c0_i32_1 = arith.constant 0 : i32
    return %c0_i32, %c0_i32_0 : i32, i32
  }
  func.func @transform_5(%arg0: i32, %arg1: i32) -> (i32, i32, i32, i32) {
    %c0_i32 = arith.constant 0 : i32
    %c0_i32_0 = arith.constant 0 : i32
    %c0_i32_1 = arith.constant 0 : i32
    return %arg0, %arg1, %c0_i32, %c0_i32_0 : i32, i32, i32, i32
  }
}

</mosaic_0001>

<bundles_post_ra>
// kernel: tpu_custom_call.1
= control target key start
LH: loop header
LB: loop body
LE: loop exit
PB: predicated region body
PF: predicated region fallthrough
CT: control target
= control target key end

     0   :  { %s6358_s0 = inlined_call_operand.vmem [shape: bf16[2,4,4,110], index: 0, kind: input, shape index: {}]   ;;  %s6359_s1 = inlined_call_operand.vmem [shape: bf16[9,256,4], index: 1, kind: input, shape index: {}]   ;;  %s6360_s2 = inlined_call_operand.vmem [shape: f32[256,1], index: 2, kind: input, shape index: {}]   ;;  %s6361_s3 = inlined_call_operand.vmem [shape: bf16[1,256], index: 3, kind: input, shape index: {}]   ;;  %s6362_s4 = inlined_call_operand.<no memory space> [shape: f32[1,1], index: 4, kind: input, shape index: {}]   ;;  %s6363_s5 = inlined_call_operand.hbm [shape: f32[2,4,1,72], index: 5, kind: output, shape index: {}]  }
   0x1   :  { %10 = sst [smem:[#allocation3]] %s6362_s4 }
   0x2   :  { %11 = vsyncpa [#allocation5], 0 }
   0x3   :  { %13 = vsyncpa [#allocation5 + $0x1], 0  ;;  %s5169_s20 = smov 0   ;;  %s5171_s21 = smov 0  }
   0x4   :  { %s5173_s22 = smov 0   ;;  %s5175_s23 = smov 0  }
   0x5   :  { %s5177_s24 = smov 0   ;;  %s5179_s25 = smov 0  }
   0x6   :  { %s5181_s26 = smov 0   ;;  %s5183_s27 = smov 0  }
   0x7 LB: > { %s3815_s4 = sadd.s32 4294967295, %s5125_s27   ;;  %s3816_s28 = sadd.s32 4294967294, %s5125_s27   ;;  %s5125_s27 = sphi %s5183_s27, %s19_s27   ;;  %s5121_s26 = sphi %s5181_s26, %s6372_s26   ;;  %s5117_s25 = sphi %s5179_s25, %s6371_s25   ;;  %s5113_s24 = sphi %s5177_s24, %s6370_s24   ;;  %s5109_s23 = sphi %s5175_s23, %s6369_s23   ;;  %s5105_s22 = sphi %s5173_s22, %s6368_s22   ;;  %s5101_s21 = sphi %s5171_s21, %s6367_s21   ;;  %s5097_s20 = sphi %s5169_s20, %s6366_s20  }
   0x8   : > { %s28_s29 = sadd.s32 1, %s5117_s25  ;;  %s31_s30 = sadd.s32 1, %s5121_s26 }
   0x9   : > { %p29_p0 = scmp.ge.s32.totalorder %s28_s29, 4  ;;  %p162_p1 = scmp.ne.s32.totalorder %s5105_s22, %s5101_s21 }
   0xa   : > { %p163_p2 = scmp.eq.s32.totalorder %s3815_s4, 7  ;;  %p168_p5 = scmp.ne.s32.totalorder %s5101_s21, %s5097_s20 }
   0xb   : > { %s6374_s29 = smov (%p29_p0, %s28_s29), 0  ;;  %s6376_s30 = smov (!%p29_p0, %s31_s30), %s5121_s26 }
   0xc   : > { %s148_s6 = ssub.s32 %s5117_s25, %s6374_s29  ;;  %p5220_p3 = por %p163_p2, %p162_p1 }
   0xd   : > { %p33_p4 = scmp.ge.s32.totalorder %s6376_s30, 2  ;;  %p169_p6 = scmp.eq.s32.totalorder %s3816_s28, 7 }
   0xe   : > { %p3819_p7 = scmp.ge.s32.totalorder %s5125_s27, 1  ;;  %p210_p9 = scmp.lt.s32.totalorder %s5125_s27, 9 }
   0xf   : > { %s6378_s30 = smov (%p33_p4, %s6376_s30), 0  ;;  %p5229_p8 = por %p169_p6, %p168_p5 }
  0x10   : > { %s147_s9 = ssub.s32 %s5121_s26, %s6378_s30  ;;  %s152_s10 = sadd.s32 1, %s5105_s22 }
  0x11   : > { %s149_s11 = sor.u32 %s148_s6, %s147_s9  ;;  %p211_p10 = pnand %p3819_p7, %p210_p9 }
  0x12   : > { %p150_p11 = scmp.eq.s32.totalorder %s149_s11, 0  ;;  %p240_p12 = scmp.lt.s32.totalorder (!%p211_p10), %s5113_s24, 1 }
  0x13   : > { %214 = sbr.rel (%p211_p10) target bundleno = 1009 (0x3f1), region = 40  ;;  %p242_p13 = scmp.lt.s32.totalorder (!%p211_p10), %s5109_s23, 3 }
  0x14   : > { %s5238_s12 = scalar_select %p150_p11, %s5105_s22, %s152_s10  }
  0x15   : > { %s5127_s28 = smov (!%p211_p10), 127   ;;  %s5128_s6 = smov (!%p211_p10), 126  }
  0x16   : > { %s5129_s18 = smov (!%p211_p10), 110   ;;  %s5130_s19 = smov (!%p211_p10), 109  }
  0x17   : > { %s5131_s9 = smov (!%p211_p10), 108  }
  0x18   : > { %s241_s13 = scalar_select %p240_p12, %s5113_s24, 1  ;;  %vm411_vm0 = vcmask 1041408   ;;  %v4812_v7 = vld [vmem:[%s6359_s1 + $0x58] sm:$0xff]  ;;  %v4806_v8 = vld [vmem:[%s6359_s1 + $0x28] sm:$0xff]  ;;  %vm362_vm1 = vcmask 31744   ;;  %v4801_v9 = vld [vmem:[%s6359_s1] sm:$0xff] }
  0x19   : > { %s243_s14 = scalar_select %p242_p13, %s5109_s23, 3  ;;  %v4810_v11 = vld [vmem:[%s6359_s1 + $0x48] sm:$0xff]  ;;  %v4813_v15 = vld [vmem:[%s6359_s1 + $0x60] sm:$0xff]  ;;  %v4807_v16 = vld [vmem:[%s6359_s1 + $0x30] sm:$0xff]  ;;  %vm504_vm2 = vcmask 588800   ;;  %vm3724_vm3 = vcmask 581632  }
  0x1a   : > { %s3820_s15 = sshll.u32 %s241_s13, 2  ;;  %v4802_v17 = vld [vmem:[%s6359_s1 + $0x8] sm:$0xff]  ;;  %v4811_v19 = vld [vmem:[%s6359_s1 + $0x50] sm:$0xff]  ;;  %v4808_v24 = vld [vmem:[%s6359_s1 + $0x38] sm:$0xff]  ;;  %s3690_s13 = sld [smem:[#allocation3]] }
  0x1b   : > { %s245_s16 = sadd.s32 %s3820_s15, %s243_s14  ;;  %v4814_v23 = vld [vmem:[%s6359_s1 + $0x68] sm:$0xff]  ;;  %v4803_v25 = vld [vmem:[%s6359_s1 + $0x10] sm:$0xff]  ;;  %v4809_v27 = vld [vmem:[%s6359_s1 + $0x40] sm:$0xff]  ;;  %s4798_s14 = sshll.u32 %s5113_s24, 2 }
  0x1c   : > { %s3821_s17 = sshll.u32 %s245_s16, 1  ;;  %v4815_v26 = vld [vmem:[%s6359_s1 + $0x70] sm:$0xff]  ;;  %v4804_v28 = vld [vmem:[%s6359_s1 + $0x18] sm:$0xff]  ;;  %v4805_v30 = vld [vmem:[%s6359_s1 + $0x20] sm:$0xff]  ;;  %s238_s15 = sand.u32 1, %s5101_s21  }
  0x1d   : > { %s5247_s4 = scalar_lea.vmem %s6358_s0, %s3821_s17  ;;  %v4816_v29 = vld [vmem:[%s6359_s1 + $0x78] sm:$0xff]  ;;  %v4817_v33 = vld [vmem:[%s6359_s1 + $0x80] sm:$0xff]  ;;  %v4818_v39 = vld [vmem:[%s6359_s1 + $0x88] sm:$0xff]  ;;  %s5132_s17 = smov 92  }
  0x1e   : > { %v537_v0 = vld [vmem:[%s5247_s4] sm:$0x3]  ;;  %v4834_v43 = vld [vmem:[%s6359_s1 + $0x108] sm:$0xff]  ;;  %v4819_v47 = vld [vmem:[%s6359_s1 + $0x90] sm:$0xff] }
  0x1f   : > { %652 = vst [vmem:[#allocation1] ss:$4 sm:$0xff] %v537_v0  ;;  %v893_v1 = vld [vmem:[%s5247_s4] sm:$0x3]  ;;  %v4850_v48 = vld [vmem:[%s6359_s1 + $0x188] sm:$0xff]  ;;  %v4835_v52 = vld [vmem:[%s6359_s1 + $0x110] sm:$0xff] }
  0x20   : > { %v1249_v3 = vld [vmem:[%s5247_s4] sm:$0x3]  ;;  %v4866_v53 = vld [vmem:[%s6359_s1 + $0x208] sm:$0xff]  ;;  %v4820_v57 = vld [vmem:[%s6359_s1 + $0x98] sm:$0xff] }
  0x21   : > { %v249_v5 = vld [vmem:[%s5247_s4] sm:$0x3]  ;;  %v4851_v58 = vld [vmem:[%s6359_s1 + $0x190] sm:$0xff]  ;;  %v4836_v62 = vld [vmem:[%s6359_s1 + $0x118] sm:$0xff] }
  0x22   : > { %v413_v6 = vsel %vm411_vm0, %v249_v5, 0  ;;  %v1605_v10 = vld [vmem:[%s5247_s4] sm:$0x3]  ;;  %v4867_v63 = vld [vmem:[%s6359_s1 + $0x210] sm:$0xff] }
  0x23   : > { %4947 = vmatpush.bf16.msra.mxu3 %v413_v6  ;;  %4945 = vmatpush.bf16.msra.mxu1 %v413_v6  ;;  %v1961_v13 = vld [vmem:[%s5247_s4] sm:$0x3] }
  0x24   : > { %422 = vmatpush.bf16.msra.mxu0 %v413_v6  ;;  %4946 = vmatpush.bf16.msra.mxu2 %v413_v6  ;;  %v2317_v18 = vld [vmem:[%s5247_s4] sm:$0x3] }
  0x25   : > { %v2673_v21 = vld [vmem:[%s5247_s4] sm:$0x3] }
  0x26   : > { %v653_v2 = vld.sshfl [vmem:[#allocation1] sm:$0xff pattern:$0x73625140]  ;;  %3897 = vmatmul.msk.bf16.vlgmr.msra.gmra.mxu3 %vm362_vm1, %v4812_v7  ;;  %3891 = vmatmul.msk.bf16.vlgmr.msra.gmra.mxu1 %vm362_vm1, %v4806_v8 }
  0x27   : > { %655 = vrot.lane.b32.xlu0 %v653_v2, %s5127_s28  ;;  %1008 = vst [vmem:[#allocation1] ss:$4 sm:$0xff] %v893_v1  ;;  %3886 = vmatmul.msk.bf16.vlgmr.msra.gmra.mxu0 %vm362_vm1, %v4801_v9  ;;  %v4833_v36 = vld [vmem:[%s6359_s1 + $0x100] sm:$0xff]  ;;  %s5134_s28 = smov 90  }
  0x28   : > { %3895 = vmatmul.msk.bf16.vlgmr.msra.gmra.mxu2 %vm362_vm1, %v4810_v11  ;;  %v4849_v40 = vld [vmem:[%s6359_s1 + $0x180] sm:$0xff] }
  0x29   : > { %v4865_v44 = vld [vmem:[%s6359_s1 + $0x200] sm:$0xff] }
  0x2a   : > { %v4837_v9 = vld [vmem:[%s6359_s1 + $0x120] sm:$0xff] }
  0x2e   : > { %v1009_v4 = vld.sshfl [vmem:[#allocation1] sm:$0xff pattern:$0x73625140] }
  0x2f   : > { %1011 = vrot.lane.b32.xlu0 %v1009_v4, %s5128_s6  ;;  %1364 = vst [vmem:[#allocation1] ss:$4 sm:$0xff] %v1249_v3  ;;  %v4821_v3 = vld [vmem:[%s6359_s1 + $0xa0] sm:$0xff]  ;;  %v4852_v4 = vld [vmem:[%s6359_s1 + $0x198] sm:$0xff] }
  0x36   : > { %v1365_v12 = vld.sshfl [vmem:[#allocation1] sm:$0xff pattern:$0x73625140]  ;;  %3898 = vmatmul.msk.bf16.gmra.mxu3 %vm362_vm1, %v4813_v15  ;;  %3892 = vmatmul.msk.bf16.gmra.mxu1 %vm362_vm1, %v4807_v16  ;;  %v4822_v15 = vld [vmem:[%s6359_s1 + $0xa8] sm:$0xff] }
  0x37   : > { %1367 = vrot.lane.b32.xlu1 %v1365_v12, %s5129_s18  ;;  %1720 = vst [vmem:[#allocation1] ss:$4 sm:$0xff] %v1605_v10  ;;  %3887 = vmatmul.msk.bf16.gmra.mxu0 %vm362_vm1, %v4802_v17  ;;  %v4868_v10 = vld [vmem:[%s6359_s1 + $0x218] sm:$0xff]  ;;  %v4853_v16 = vld [vmem:[%s6359_s1 + $0x1a0] sm:$0xff] }
  0x38   : > { %3896 = vmatmul.msk.bf16.gmra.mxu2 %vm362_vm1, %v4811_v19 }
  0x3e   : > { %v1721_v14 = vld.sshfl [vmem:[#allocation1] sm:$0xff pattern:$0x73625140] }
  0x3f   : > { %1723 = vrot.lane.b32.xlu1 %v1721_v14, %s5130_s19  ;;  %2076 = vst [vmem:[#allocation1] ss:$4 sm:$0xff] %v1961_v13  ;;  %s239_s19 = scalar_lea.vmem [#allocation4], %s238_s15 }
  0x46   : > { %v2077_v20 = vld.sshfl [vmem:[#allocation1] sm:$0xff pattern:$0x73625140]  ;;  %3899 = vmatmul.msk.bf16.gmra.mxu3 %vm362_vm1, %v4814_v23  ;;  %3893 = vmatmul.msk.bf16.gmra.mxu1 %vm362_vm1, %v4808_v24 }
  0x47   : > { %2432 = vst [vmem:[#allocation1] ss:$4 sm:$0xff] %v2317_v18  ;;  %3888 = vmatmul.msk.bf16.gmra.mxu0 %vm362_vm1, %v4803_v25  ;;  %2079 = vrot.lane.b32.xlu2 %v2077_v20, %s5131_s9  ;;  %v4823_v25 = vld [vmem:[%s6359_s1 + $0xb0] sm:$0xff]  ;;  %s5133_s9 = smov 91  }
  0x4e   : > { %v2433_v22 = vld.sshfl [vmem:[#allocation1] sm:$0xff pattern:$0x73625140] }
  0x4f   : > { %2788 = vst [vmem:[#allocation1] ss:$4 sm:$0xff] %v2673_v21  ;;  %2435 = vrot.lane.b32.xlu2 %v2433_v22, %s5132_s17  ;;  %v4838_v21 = vld [vmem:[%s6359_s1 + $0x128] sm:$0xff]  ;;  %v4869_v22 = vld [vmem:[%s6359_s1 + $0x220] sm:$0xff] }
  0x56   : > { %3900 = vmatmul.msk.bf16.gmra.mxu3 %vm362_vm1, %v4815_v26  ;;  %3894 = vmatmul.msk.bf16.gmra.mxu1 %vm362_vm1, %v4809_v27  ;;  %v4854_v26 = vld [vmem:[%s6359_s1 + $0x1a8] sm:$0xff] }
  0x57   : > { %3889 = vmatmul.msk.bf16.gmra.mxu0 %vm362_vm1, %v4804_v28  ;;  %v2789_v28 = vld.sshfl [vmem:[#allocation1] sm:$0xff pattern:$0x73625140] }
  0x58   : > { %2791 = vrot.lane.b32.xlu0 %v2789_v28, %s5133_s9  ;;  %s3727_s9 = scalar_lea.sflag [#allocation5], %s238_s15 }
  0x66   : > { %3901 = vmatmul.msk.bf16.gmra.mxu3 %vm362_vm1, %v4816_v29  ;;  %v3029_v29 = vld [vmem:[%s5247_s4] sm:$0x3]  ;;  %s3736_s4 = sadd.s32 %s5109_s23, %s4798_s14 }
  0x67   : > { %3890 = vmatmul.msk.bf16.gmra.mxu0 %vm362_vm1, %v4805_v30  ;;  %3144 = vst [vmem:[#allocation1] ss:$4 sm:$0xff] %v3029_v29  ;;  %s3737_s18 = scalar_lea.hbm %s6363_s5, %s3736_s4 }
  0x68   : > { %s3741_s6 = sshll.u32 %s3737_s18, 4  ;;  %s3742_s6 = int_to_ptr.hbm [resolvable:$true] %s3741_s6 }
  0x69   : > { %s5045_s24 = sshra.s32 %s3742_s6, 4  ;;  %s5046_s24 = int_to_ptr.hbm [resolvable:$true] %s5045_s24 }
  0x6a   : > { %s5047_s23 = scalar_lea.hbm %s5046_s24, 1  ;;  %p5052_p4 = scmp.lt.s32.totalorder %s5046_s24, %s6363_s5 }
  0x6b   : > { %p5048_p0 = scmp.ne.s32.totalorder %s5046_s24, %s5047_s23 }
  0x6d   : > { %p5049_p1 = pnand %p5048_p0, %p5220_p3 }
  0x6f   : > { %p5050_p2 = pneg %p5049_p1 }
  0x99   : > { %v656_v31 = vpop.permute.xlu0 %655 }
  0x9a   : > { %v706_v32 = vsel %vm411_vm0, %v656_v31, 0  ;;  %v4839_v31 = vld [vmem:[%s6359_s1 + $0x130] sm:$0xff] }
  0x9b   : > { %715 = vmatpush.bf16.msrb.mxu1 %v706_v32  ;;  %v4870_v32 = vld [vmem:[%s6359_s1 + $0x228] sm:$0xff] }
  0x9e   : > { %3998 = vmatmul.msk.bf16.vlgmr.msrb.gmra.mxu1 %vm362_vm1, %v4817_v33 }
  0xa1   : > { %v1012_v34 = vpop.permute.xlu0 %1011 }
  0xa2   : > { %v1062_v35 = vsel %vm411_vm0, %v1012_v34, 0  ;;  %v4824_v34 = vld [vmem:[%s6359_s1 + $0xb8] sm:$0xff] }
  0xa3   : > { %1071 = vmatpush.bf16.msrb.mxu2 %v1062_v35  ;;  %v449_v45 = vpop.f32.mrf.mxu1  ;;  %v4855_v35 = vld [vmem:[%s6359_s1 + $0x1b0] sm:$0xff] }
  0xa4   : > { %515 = vst.msk [vmem:[#allocation2 + $0x50] sm:$0xff] %vm504_vm2, %v449_v45  ;;  %v424_v50 = vpop.f32.mrf.mxu0 }
  0xa5   : > { %505 = vst.msk [vmem:[#allocation2] sm:$0xff] %vm504_vm2, %v424_v50 }
  0xa6   : > { %4110 = vmatmul.msk.bf16.vlgmr.msrb.gmra.mxu2 %vm362_vm1, %v4833_v36 }
  0xa9   : > { %v1368_v37 = vpop.permute.xlu1 %1367  ;;  %v479_v46 = vpop.f32.mrf.mxu3 }
  0xaa   : > { %v1418_v38 = vsel %vm411_vm0, %v1368_v37, 0  ;;  %527 = vst.msk [vmem:[#allocation2 + $0xb0] sm:$0xff] %vm504_vm2, %v479_v46  ;;  %v3145_v37 = vld.sshfl [vmem:[#allocation1] sm:$0xff pattern:$0x73625140] }
  0xab   : > { %1427 = vmatpush.bf16.msrb.mxu3 %v1418_v38  ;;  %v451_v49 = vpop.f32.mrf.mxu1  ;;  %v469_v6 = vpop.f32.mrf.mxu2  ;;  %v3673_v38 = vld [vmem:[%s6361_s3] sm:$0x3]  ;;  %3147 = vrot.lane.b32.xlu1 %v3145_v37, %s5134_s28  ;;  %s3739_s28 = sshll.u32 %s239_s19, 4  ;;  %s3740_s28 = int_to_ptr.vmem [resolvable:$true] %s3739_s28 }
  0xac   : > { %516 = vst.msk [vmem:[#allocation2 + $0x58] sm:$0xff] %vm504_vm2, %v451_v49  ;;  %v426_v55 = vpop.f32.mrf.mxu0  ;;  %v4841_v46 = vld [vmem:[%s6359_s1 + $0x140] sm:$0xff] }
  0xad   : > { %506 = vst.msk [vmem:[#allocation2 + $0x8] sm:$0xff] %vm504_vm2, %v426_v55  ;;  %v4857_v55 = vld [vmem:[%s6359_s1 + $0x1c0] sm:$0xff] }
  0xae   : > { %3999 = vmatmul.msk.bf16.gmra.mxu1 %vm362_vm1, %v4818_v39  ;;  %4222 = vmatmul.msk.bf16.vlgmr.msrb.gmra.mxu3 %vm362_vm1, %v4849_v40  ;;  %523 = vst.msk [vmem:[#allocation2 + $0x90] sm:$0xff] %vm504_vm2, %v469_v6  ;;  %v4840_v39 = vld [vmem:[%s6359_s1 + $0x138] sm:$0xff]  ;;  %v4871_v40 = vld [vmem:[%s6359_s1 + $0x230] sm:$0xff] }
  0xaf   : > { %3693 = vst [vmem:[#allocation1] ss:$9 sm:$0xff] %v3673_v38 }
  0xb1   : > { %v1724_v41 = vpop.permute.xlu1 %1723  ;;  %v481_v51 = vpop.f32.mrf.mxu3 }
  0xb2   : > { %v1774_v42 = vsel %vm411_vm0, %v1724_v41, 0  ;;  %528 = vst.msk [vmem:[#allocation2 + $0xb8] sm:$0xff] %vm504_vm2, %v481_v51  ;;  %v4825_v41 = vld [vmem:[%s6359_s1 + $0xc0] sm:$0xff] }
  0xb3   : > { %1783 = vmatpush.bf16.msrb.mxu0 %v1774_v42  ;;  %v454_v54 = vpop.f32.mrf.mxu1  ;;  %v471_v12 = vpop.f32.mrf.mxu2  ;;  %v4856_v42 = vld [vmem:[%s6359_s1 + $0x1b8] sm:$0xff] }
  0xb4   : > { %517 = vst.msk [vmem:[#allocation2 + $0x60] sm:$0xff] %vm504_vm2, %v454_v54  ;;  %v429_v60 = vpop.f32.mrf.mxu0  ;;  %v798_v49 = vld [vmem:[#allocation2 + $0x8] sm:$0xff]  ;;  %v4826_v54 = vld [vmem:[%s6359_s1 + $0xc8] sm:$0xff] }
  0xb5   : > { %507 = vst.msk [vmem:[#allocation2 + $0x10] sm:$0xff] %vm504_vm2, %v429_v60 }
  0xb6   : > { %4111 = vmatmul.msk.bf16.gmra.mxu2 %vm362_vm1, %v4834_v43  ;;  %4334 = vmatmul.msk.bf16.vlgmr.msrb.gmra.mxu0 %vm362_vm1, %v4865_v44  ;;  %524 = vst.msk [vmem:[#allocation2 + $0x98] sm:$0xff] %vm504_vm2, %v471_v12  ;;  %v797_v44 = vld [vmem:[#allocation2] sm:$0xff] }
  0xb7   : > { %v4858_v12 = vld [vmem:[%s6359_s1 + $0x1c8] sm:$0xff] }
  0xb9   : > { %v484_v56 = vpop.f32.mrf.mxu3 }
  0xba   : > { %529 = vst.msk [vmem:[#allocation2 + $0xc0] sm:$0xff] %vm504_vm2, %v484_v56 }
  0xbb   : > { %v456_v59 = vpop.f32.mrf.mxu1  ;;  %v474_v18 = vpop.f32.mrf.mxu2 }
  0xbc   : > { %518 = vst.msk [vmem:[#allocation2 + $0x68] sm:$0xff] %vm504_vm2, %v456_v59  ;;  %v431_v1 = vpop.f32.mrf.mxu0 }
  0xbd   : > { %508 = vst.msk [vmem:[#allocation2 + $0x18] sm:$0xff] %vm504_vm2, %v431_v1 }
  0xbe   : > { %4000 = vmatmul.msk.bf16.gmra.mxu1 %vm362_vm1, %v4819_v47  ;;  %4223 = vmatmul.msk.bf16.gmra.mxu3 %vm362_vm1, %v4850_v48  ;;  %525 = vst.msk [vmem:[#allocation2 + $0xa0] sm:$0xff] %vm504_vm2, %v474_v18  ;;  %v4872_v47 = vld [vmem:[%s6359_s1 + $0x238] sm:$0xff] }
  0xc1   : > { %v486_v61 = vpop.f32.mrf.mxu3 }
  0xc2   : > { %530 = vst.msk [vmem:[#allocation2 + $0xc8] sm:$0xff] %vm504_vm2, %v486_v61 }
  0xc3   : > { %v459_v0 = vpop.f32.mrf.mxu1  ;;  %v476_v23 = vpop.f32.mrf.mxu2 }
  0xc4   : > { %519 = vst.msk [vmem:[#allocation2 + $0x70] sm:$0xff] %vm504_vm2, %v459_v0  ;;  %v434_v8 = vpop.f32.mrf.mxu0  ;;  %v4873_v0 = vld [vmem:[%s6359_s1 + $0x240] sm:$0xff] }
  0xc5   : > { %509 = vst.msk [vmem:[#allocation2 + $0x20] sm:$0xff] %vm504_vm2, %v434_v8 }
  0xc6   : > { %4112 = vmatmul.msk.bf16.gmra.mxu2 %vm362_vm1, %v4835_v52  ;;  %4335 = vmatmul.msk.bf16.gmra.mxu0 %vm362_vm1, %v4866_v53  ;;  %526 = vst.msk [vmem:[#allocation2 + $0xa8] sm:$0xff] %vm504_vm2, %v476_v23 }
  0xc9   : > { %v489_v2 = vpop.f32.mrf.mxu3 }
  0xca   : > { %531 = vst.msk [vmem:[#allocation2 + $0xd0] sm:$0xff] %vm504_vm2, %v489_v2 }
  0xcb   : > { %v461_v5 = vpop.f32.mrf.mxu1 }
  0xcc   : > { %520 = vst.msk [vmem:[#allocation2 + $0x78] sm:$0xff] %vm504_vm2, %v461_v5  ;;  %v436_v14 = vpop.f32.mrf.mxu0 }
  0xcd   : > { %510 = vst.msk [vmem:[#allocation2 + $0x28] sm:$0xff] %vm504_vm2, %v436_v14 }
  0xce   : > { %4001 = vmatmul.msk.bf16.gmra.mxu1 %vm362_vm1, %v4820_v57  ;;  %4224 = vmatmul.msk.bf16.gmra.mxu3 %vm362_vm1, %v4851_v58  ;;  %v799_v57 = vld [vmem:[#allocation2 + $0x10] sm:$0xff] }
  0xd1   : > { %v491_v7 = vpop.f32.mrf.mxu3 }
  0xd2   : > { %532 = vst.msk [vmem:[#allocation2 + $0xd8] sm:$0xff] %vm504_vm2, %v491_v7 }
  0xd3   : > { %v464_v11 = vpop.f32.mrf.mxu1 }
  0xd4   : > { %521 = vst.msk [vmem:[#allocation2 + $0x80] sm:$0xff] %vm504_vm2, %v464_v11  ;;  %v439_v20 = vpop.f32.mrf.mxu0  ;;  %v4827_v11 = vld [vmem:[%s6359_s1 + $0xd0] sm:$0xff] }
  0xd5   : > { %511 = vst.msk [vmem:[#allocation2 + $0x30] sm:$0xff] %vm504_vm2, %v439_v20  ;;  %v802_v29 = vld [vmem:[#allocation2 + $0x28] sm:$0xff] }
  0xd6   : > { %4113 = vmatmul.msk.bf16.gmra.mxu2 %vm362_vm1, %v4836_v62  ;;  %4336 = vmatmul.msk.bf16.gmra.mxu0 %vm362_vm1, %v4867_v63  ;;  %v4842_v63 = vld [vmem:[%s6359_s1 + $0x148] sm:$0xff] }
  0xd9   : > { %v494_v13 = vpop.f32.mrf.mxu3 }
  0xda   : > { %533 = vst.msk [vmem:[#allocation2 + $0xe0] sm:$0xff] %vm504_vm2, %v494_v13 }
  0xdb   : > { %v466_v17 = vpop.f32.mrf.mxu1 }
  0xdc   : > { %522 = vst.msk [vmem:[#allocation2 + $0x88] sm:$0xff] %vm504_vm2, %v466_v17  ;;  %v441_v27 = vpop.f32.mrf.mxu0 }
  0xdd   : > { %512 = vst.msk [vmem:[#allocation2 + $0x38] sm:$0xff] %vm504_vm2, %v441_v27 }
  0xde   : > { %4002 = vmatmul.msk.bf16.gmra.mxu1 %vm362_vm1, %v4821_v3  ;;  %4225 = vmatmul.msk.bf16.gmra.mxu3 %vm362_vm1, %v4852_v4  ;;  %v800_v3 = vld [vmem:[#allocation2 + $0x18] sm:$0xff] }
  0xe1   : > { %v496_v19 = vpop.f32.mrf.mxu3 }
  0xe2   : > { %534 = vst.msk [vmem:[#allocation2 + $0xe8] sm:$0xff] %vm504_vm2, %v496_v19 }
  0xe4   : > { %v444_v33 = vpop.f32.mrf.mxu0 }
  0xe5   : > { %513 = vst.msk [vmem:[#allocation2 + $0x40] sm:$0xff] %vm504_vm2, %v444_v33 }
  0xe6   : > { %4114 = vmatmul.msk.bf16.gmra.mxu2 %vm362_vm1, %v4837_v9  ;;  %4337 = vmatmul.msk.bf16.gmra.mxu0 %vm362_vm1, %v4868_v10 }
  0xe9   : > { %v499_v24 = vpop.f32.mrf.mxu3 }
  0xea   : > { %535 = vst.msk [vmem:[#allocation2 + $0xf0] sm:$0xff] %vm504_vm2, %v499_v24 }
  0xec   : > { %v446_v36 = vpop.f32.mrf.mxu0 }
  0xed   : > { %514 = vst.msk [vmem:[#allocation2 + $0x48] sm:$0xff] %vm504_vm2, %v446_v36 }
  0xee   : > { %4003 = vmatmul.msk.bf16.gmra.mxu1 %vm362_vm1, %v4822_v15  ;;  %4226 = vmatmul.msk.bf16.gmra.mxu3 %vm362_vm1, %v4853_v16  ;;  %v801_v15 = vld [vmem:[#allocation2 + $0x20] sm:$0xff] }
  0xf1   : > { %v501_v30 = vpop.f32.mrf.mxu3 }
  0xf2   : > { %536 = vst.msk [vmem:[#allocation2 + $0xf8] sm:$0xff] %vm504_vm2, %v501_v30 }
  0xf6   : > { %4115 = vmatmul.msk.bf16.gmra.mxu2 %vm362_vm1, %v4838_v21  ;;  %4338 = vmatmul.msk.bf16.gmra.mxu0 %vm362_vm1, %v4869_v22 }
  0xfe   : > { %4004 = vmatmul.msk.bf16.gmra.mxu1 %vm362_vm1, %v4823_v25  ;;  %4227 = vmatmul.msk.bf16.gmra.mxu3 %vm362_vm1, %v4854_v26  ;;  %v4843_v25 = vld [vmem:[%s6359_s1 + $0x150] sm:$0xff]  ;;  %v4874_v26 = vld [vmem:[%s6359_s1 + $0x248] sm:$0xff] }
 0x106   : > { %4116 = vmatmul.msk.bf16.gmra.mxu2 %vm362_vm1, %v4839_v31  ;;  %4339 = vmatmul.msk.bf16.gmra.mxu0 %vm362_vm1, %v4870_v32 }
 0x10e   : > { %4005 = vmatmul.msk.bf16.gmra.mxu1 %vm362_vm1, %v4824_v34  ;;  %4228 = vmatmul.msk.bf16.gmra.mxu3 %vm362_vm1, %v4855_v35 }
 0x116   : > { %4117 = vmatmul.msk.bf16.gmra.mxu2 %vm362_vm1, %v4840_v39  ;;  %4340 = vmatmul.msk.bf16.gmra.mxu0 %vm362_vm1, %v4871_v40  ;;  %v4828_v39 = vld [vmem:[%s6359_s1 + $0xd8] sm:$0xff]  ;;  %v4859_v40 = vld [vmem:[%s6359_s1 + $0x1d0] sm:$0xff] }
 0x11b   : > { %v717_v43 = vpop.f32.mrf.mxu1 }
 0x11c   : > { %v829_v45 = vadd.f32 %v797_v44, %v717_v43  ;;  %v803_v43 = vld [vmem:[#allocation2 + $0x30] sm:$0xff] }
 0x11e   : > { %861 = vst.msk [vmem:[#allocation2] sm:$0xff] %vm504_vm2, %v829_v45  ;;  %4006 = vmatmul.msk.bf16.gmra.mxu1 %vm362_vm1, %v4825_v41  ;;  %4229 = vmatmul.msk.bf16.gmra.mxu3 %vm362_vm1, %v4856_v42 }
 0x123   : > { %v719_v48 = vpop.f32.mrf.mxu1 }
 0x124   : > { %v830_v50 = vadd.f32 %v798_v49, %v719_v48 }
 0x125   : > { %v1153_v52 = vld [vmem:[#allocation2] sm:$0xff] }
 0x126   : > { %862 = vst.msk [vmem:[#allocation2 + $0x8] sm:$0xff] %vm504_vm2, %v830_v50  ;;  %4118 = vmatmul.msk.bf16.gmra.mxu2 %vm362_vm1, %v4841_v46  ;;  %4341 = vmatmul.msk.bf16.gmra.mxu0 %vm362_vm1, %v4872_v47 }
 0x129   : > { %v1073_v51 = vpop.f32.mrf.mxu2 }
 0x12a   : > { %v1185_v53 = vadd.f32 %v1153_v52, %v1073_v51 }
 0x12b   : > { %v722_v56 = vpop.f32.mrf.mxu1 }
 0x12c   : > { %1217 = vst.msk [vmem:[#allocation2] sm:$0xff] %vm504_vm2, %v1185_v53  ;;  %v831_v58 = vadd.f32 %v799_v57, %v722_v56  ;;  %v4844_v53 = vld [vmem:[%s6359_s1 + $0x158] sm:$0xff]  ;;  %v804_v57 = vld [vmem:[#allocation2 + $0x38] sm:$0xff] }
 0x12d   : > { %v1154_v60 = vld [vmem:[#allocation2 + $0x8] sm:$0xff] }
 0x12e   : > { %863 = vst.msk [vmem:[#allocation2 + $0x10] sm:$0xff] %vm504_vm2, %v831_v58  ;;  %4007 = vmatmul.msk.bf16.gmra.mxu1 %vm362_vm1, %v4826_v54  ;;  %4230 = vmatmul.msk.bf16.gmra.mxu3 %vm362_vm1, %v4857_v55  ;;  %v4875_v54 = vld [vmem:[%s6359_s1 + $0x250] sm:$0xff] }
 0x131   : > { %v1075_v59 = vpop.f32.mrf.mxu2  ;;  %v1429_v61 = vpop.f32.mrf.mxu3 }
 0x132   : > { %v1186_v62 = vadd.f32 %v1154_v60, %v1075_v59 }
 0x133   : > { %v1509_v1 = vld [vmem:[#allocation2] sm:$0xff]  ;;  %v724_v2 = vpop.f32.mrf.mxu1  ;;  %v1785_v4 = vpop.f32.mrf.mxu0 }
 0x134   : > { %1218 = vst.msk [vmem:[#allocation2 + $0x8] sm:$0xff] %vm504_vm2, %v1186_v62  ;;  %v1541_v5 = vadd.f32 %v1509_v1, %v1429_v61  ;;  %v832_v6 = vadd.f32 %v800_v3, %v724_v2  ;;  %v4829_v3 = vld [vmem:[%s6359_s1 + $0xe0] sm:$0xff] }
 0x135   : > { %v1155_v8 = vld [vmem:[#allocation2 + $0x10] sm:$0xff] }
 0x136   : > { %1573 = vst.msk [vmem:[#allocation2] sm:$0xff] %vm504_vm2, %v1541_v5  ;;  %4119 = vmatmul.msk.bf16.gmra.mxu2 %vm362_vm1, %v4842_v63  ;;  %4342 = vmatmul.msk.bf16.gmra.mxu0 %vm362_vm1, %v4873_v0 }
 0x137   : > { %864 = vst.msk [vmem:[#allocation2 + $0x18] sm:$0xff] %vm504_vm2, %v832_v6 }
 0x139   : > { %v1078_v7 = vpop.f32.mrf.mxu2  ;;  %v1431_v9 = vpop.f32.mrf.mxu3 }
 0x13a   : > { %v1187_v10 = vadd.f32 %v1155_v8, %v1078_v7  ;;  %v805_v7 = vld [vmem:[#allocation2 + $0x40] sm:$0xff] }
 0x13b   : > { %v1510_v13 = vld [vmem:[#allocation2 + $0x8] sm:$0xff]  ;;  %v727_v14 = vpop.f32.mrf.mxu1  ;;  %v1787_v16 = vpop.f32.mrf.mxu0 }
 0x13c   : > { %1219 = vst.msk [vmem:[#allocation2 + $0x10] sm:$0xff] %vm504_vm2, %v1187_v10  ;;  %v1542_v17 = vadd.f32 %v1510_v13, %v1431_v9  ;;  %v833_v18 = vadd.f32 %v801_v15, %v727_v14  ;;  %v2080_v13 = vpop.permute.xlu2 %2079 }
 0x13d   : > { %v1865_v19 = vld [vmem:[#allocation2] sm:$0xff] }
 0x13e   : > { %v1897_v20 = vadd.f32 %v1865_v19, %v1785_v4  ;;  %1574 = vst.msk [vmem:[#allocation2 + $0x8] sm:$0xff] %vm504_vm2, %v1542_v17  ;;  %4008 = vmatmul.msk.bf16.gmra.mxu1 %vm362_vm1, %v4827_v11  ;;  %4231 = vmatmul.msk.bf16.gmra.mxu3 %vm362_vm1, %v4858_v12  ;;  %v1156_v22 = vld [vmem:[#allocation2 + $0x18] sm:$0xff]  ;;  %v4860_v4 = vld [vmem:[%s6359_s1 + $0x1d8] sm:$0xff]  ;;  %v2130_v17 = vsel %vm411_vm0, %v2080_v13, 0 }
 0x13f   : > { %865 = vst.msk [vmem:[#allocation2 + $0x20] sm:$0xff] %vm504_vm2, %v833_v18  ;;  %v4845_v19 = vld [vmem:[%s6359_s1 + $0x160] sm:$0xff]  ;;  %2139 = vmatpush.bf16.msra.mxu1 %v2130_v17 }
 0x140   : > { %1929 = vst.msk [vmem:[#allocation2] sm:$0xff] %vm504_vm2, %v1897_v20  ;;  %v4876_v20 = vld [vmem:[%s6359_s1 + $0x258] sm:$0xff] }
 0x141   : > { %v1080_v21 = vpop.f32.mrf.mxu2  ;;  %v1434_v23 = vpop.f32.mrf.mxu3 }
 0x142   : > { %v1188_v24 = vadd.f32 %v1156_v22, %v1080_v21 }
 0x143   : > { %v1511_v27 = vld [vmem:[#allocation2 + $0x10] sm:$0xff]  ;;  %v729_v28 = vpop.f32.mrf.mxu1  ;;  %v1790_v30 = vpop.f32.mrf.mxu0 }
 0x144   : > { %1220 = vst.msk [vmem:[#allocation2 + $0x18] sm:$0xff] %vm504_vm2, %v1188_v24  ;;  %v1543_v31 = vadd.f32 %v1511_v27, %v1434_v23  ;;  %v834_v32 = vadd.f32 %v802_v29, %v729_v28  ;;  %v806_v23 = vld [vmem:[#allocation2 + $0x48] sm:$0xff]  ;;  %v2436_v29 = vpop.permute.xlu2 %2435 }
 0x145   : > { %v1866_v33 = vld [vmem:[#allocation2 + $0x8] sm:$0xff] }
 0x146   : > { %v1898_v34 = vadd.f32 %v1866_v33, %v1787_v16  ;;  %1575 = vst.msk [vmem:[#allocation2 + $0x10] sm:$0xff] %vm504_vm2, %v1543_v31  ;;  %4120 = vmatmul.msk.bf16.gmra.mxu2 %vm362_vm1, %v4843_v25  ;;  %4343 = vmatmul.msk.bf16.gmra.mxu0 %vm362_vm1, %v4874_v26  ;;  %v1157_v36 = vld [vmem:[#allocation2 + $0x20] sm:$0xff]  ;;  %v2486_v33 = vsel %vm411_vm0, %v2436_v29, 0 }
 0x147   : > { %866 = vst.msk [vmem:[#allocation2 + $0x28] sm:$0xff] %vm504_vm2, %v834_v32  ;;  %2495 = vmatpush.bf16.msra.mxu2 %v2486_v33 }
 0x148   : > { %1930 = vst.msk [vmem:[#allocation2 + $0x8] sm:$0xff] %vm504_vm2, %v1898_v34 }
 0x149   : > { %v1083_v35 = vpop.f32.mrf.mxu2  ;;  %v1436_v37 = vpop.f32.mrf.mxu3 }
 0x14a   : > { %v1189_v38 = vadd.f32 %v1157_v36, %v1083_v35  ;;  %v4830_v35 = vld [vmem:[%s6359_s1 + $0xe8] sm:$0xff]  ;;  %v4861_v36 = vld [vmem:[%s6359_s1 + $0x1e0] sm:$0xff] }
 0x14b   : > { %v1512_v41 = vld [vmem:[#allocation2 + $0x18] sm:$0xff]  ;;  %v732_v42 = vpop.f32.mrf.mxu1  ;;  %v1792_v44 = vpop.f32.mrf.mxu0 }
 0x14c   : > { %1221 = vst.msk [vmem:[#allocation2 + $0x20] sm:$0xff] %vm504_vm2, %v1189_v38  ;;  %v1544_v45 = vadd.f32 %v1512_v41, %v1436_v37  ;;  %v835_v46 = vadd.f32 %v803_v43, %v732_v42 }
 0x14d   : > { %v1867_v47 = vld [vmem:[#allocation2 + $0x10] sm:$0xff] }
 0x14e   : > { %v1899_v48 = vadd.f32 %v1867_v47, %v1790_v30  ;;  %1576 = vst.msk [vmem:[#allocation2 + $0x18] sm:$0xff] %vm504_vm2, %v1544_v45  ;;  %4009 = vmatmul.msk.bf16.gmra.mxu1 %vm362_vm1, %v4828_v39  ;;  %4232 = vmatmul.msk.bf16.gmra.mxu3 %vm362_vm1, %v4859_v40  ;;  %v1158_v50 = vld [vmem:[#allocation2 + $0x28] sm:$0xff]  ;;  %v807_v39 = vld [vmem:[#allocation2 + $0x50] sm:$0xff] }
 0x14f   : > { %867 = vst.msk [vmem:[#allocation2 + $0x30] sm:$0xff] %vm504_vm2, %v835_v46  ;;  %v3448_v45 = vld [vmem:[%s6360_s2 + $0xf8] sm:$0xff]  ;;  %v3445_v46 = vld [vmem:[%s6360_s2 + $0xe0] sm:$0xff] }
 0x150   : > { %1931 = vst.msk [vmem:[#allocation2 + $0x10] sm:$0xff] %vm504_vm2, %v1899_v48 }
 0x151   : > { %v1085_v49 = vpop.f32.mrf.mxu2  ;;  %v1439_v51 = vpop.f32.mrf.mxu3 }
 0x152   : > { %v1190_v52 = vadd.f32 %v1158_v50, %v1085_v49 }
 0x153   : > { %v1513_v55 = vld [vmem:[#allocation2 + $0x20] sm:$0xff]  ;;  %v734_v56 = vpop.f32.mrf.mxu1  ;;  %v1795_v58 = vpop.f32.mrf.mxu0 }
 0x154   : > { %1222 = vst.msk [vmem:[#allocation2 + $0x28] sm:$0xff] %vm504_vm2, %v1190_v52  ;;  %v1545_v59 = vadd.f32 %v1513_v55, %v1439_v51  ;;  %v836_v60 = vadd.f32 %v804_v57, %v734_v56  ;;  %v4846_v52 = vld [vmem:[%s6359_s1 + $0x168] sm:$0xff]  ;;  %v808_v56 = vld [vmem:[#allocation2 + $0x58] sm:$0xff] }
 0x155   : > { %v1868_v61 = vld [vmem:[#allocation2 + $0x18] sm:$0xff] }
 0x156   : > { %v1900_v62 = vadd.f32 %v1868_v61, %v1792_v44  ;;  %1577 = vst.msk [vmem:[#allocation2 + $0x20] sm:$0xff] %vm504_vm2, %v1545_v59  ;;  %4121 = vmatmul.msk.bf16.gmra.mxu2 %vm362_vm1, %v4844_v53  ;;  %4344 = vmatmul.msk.bf16.gmra.mxu0 %vm362_vm1, %v4875_v54  ;;  %v1159_v0 = vld [vmem:[#allocation2 + $0x30] sm:$0xff]  ;;  %v5135_v44 = vmov 0   ;;  %v4877_v53 = vld [vmem:[%s6359_s1 + $0x260] sm:$0xff]  ;;  %v3443_v61 = vld [vmem:[%s6360_s2 + $0xd0] sm:$0xff] }
 0x157   : > { %868 = vst.msk [vmem:[#allocation2 + $0x38] sm:$0xff] %vm504_vm2, %v836_v60  ;;  %5030 = vset.pattern.permute.xlu1 %v5135_v44  ;;  %5029 = vset.pattern.permute.xlu0 %v5135_v44 }
 0x158   : > { %1932 = vst.msk [vmem:[#allocation2 + $0x18] sm:$0xff] %vm504_vm2, %v1900_v62  ;;  %3606 = vperm.xlu0 %5029, %v3448_v45   ;;  %3591 = vperm.xlu1 %5030, %v3445_v46   ;;  %v3431_v62 = vld [vmem:[%s6360_s2 + $0x70] sm:$0xff] }
 0x159   : > { %v1088_v63 = vpop.f32.mrf.mxu2  ;;  %v1441_v1 = vpop.f32.mrf.mxu3  ;;  %5028 = vset.pattern.permute.xlu2 %v5135_v44  ;;  %v811_v44 = vld [vmem:[#allocation2 + $0x70] sm:$0xff] }
 0x15a   : > { %v1191_v2 = vadd.f32 %v1159_v0, %v1088_v63  ;;  %v2792_v0 = vpop.permute.xlu0 %2791 }
 0x15b   : > { %v1514_v5 = vld [vmem:[#allocation2 + $0x28] sm:$0xff]  ;;  %v737_v6 = vpop.f32.mrf.mxu1  ;;  %v1797_v8 = vpop.f32.mrf.mxu0 }
 0x15c   : > { %1223 = vst.msk [vmem:[#allocation2 + $0x30] sm:$0xff] %vm504_vm2, %v1191_v2  ;;  %v1546_v9 = vadd.f32 %v1514_v5, %v1441_v1  ;;  %v837_v10 = vadd.f32 %v805_v7, %v737_v6  ;;  %v4831_v6 = vld [vmem:[%s6359_s1 + $0xf0] sm:$0xff]  ;;  %v4862_v7 = vld [vmem:[%s6359_s1 + $0x1e8] sm:$0xff] }
 0x15d   : > { %v1869_v11 = vld [vmem:[#allocation2 + $0x20] sm:$0xff] }
 0x15e   : > { %v1901_v12 = vadd.f32 %v1869_v11, %v1795_v58  ;;  %1578 = vst.msk [vmem:[#allocation2 + $0x28] sm:$0xff] %vm504_vm2, %v1546_v9  ;;  %4010 = vmatmul.msk.bf16.gmra.mxu1 %vm362_vm1, %v4829_v3  ;;  %4233 = vmatmul.msk.bf16.gmra.mxu3 %vm362_vm1, %v4860_v4  ;;  %v1160_v15 = vld [vmem:[#allocation2 + $0x38] sm:$0xff]  ;;  %v2842_v4 = vsel %vm411_vm0, %v2792_v0, 0 }
 0x15f   : > { %869 = vst.msk [vmem:[#allocation2 + $0x40] sm:$0xff] %vm504_vm2, %v837_v10  ;;  %2851 = vmatpush.bf16.msra.mxu3 %v2842_v4  ;;  %v809_v10 = vld [vmem:[#allocation2 + $0x60] sm:$0xff]  ;;  %v3425_v4 = vld [vmem:[%s6360_s2 + $0x40] sm:$0xff] }
 0x160   : > { %1933 = vst.msk [vmem:[#allocation2 + $0x20] sm:$0xff] %vm504_vm2, %v1901_v12  ;;  %3581 = vperm.xlu0 %5029, %v3443_v61   ;;  %3521 = vperm.xlu1 %5030, %v3431_v62  }
 0x161   : > { %v1090_v14 = vpop.f32.mrf.mxu2  ;;  %v1444_v16 = vpop.f32.mrf.mxu3 }
 0x162   : > { %v1192_v18 = vadd.f32 %v1160_v15, %v1090_v14  ;;  %v3430_v15 = vld [vmem:[%s6360_s2 + $0x68] sm:$0xff] }
 0x163   : > { %v1515_v21 = vld [vmem:[#allocation2 + $0x30] sm:$0xff]  ;;  %v739_v22 = vpop.f32.mrf.mxu1  ;;  %v1800_v24 = vpop.f32.mrf.mxu0 }
 0x164   : > { %1224 = vst.msk [vmem:[#allocation2 + $0x38] sm:$0xff] %vm504_vm2, %v1192_v18  ;;  %v1547_v25 = vadd.f32 %v1515_v21, %v1444_v16  ;;  %v838_v26 = vadd.f32 %v806_v23, %v739_v22  ;;  %v3444_v16 = vld [vmem:[%s6360_s2 + $0xd8] sm:$0xff]  ;;  %v4847_v22 = vld [vmem:[%s6359_s1 + $0x170] sm:$0xff]  ;;  %v4878_v23 = vld [vmem:[%s6359_s1 + $0x268] sm:$0xff] }
 0x165   : > { %v1870_v27 = vld [vmem:[#allocation2 + $0x28] sm:$0xff] }
 0x166   : > { %v1902_v28 = vadd.f32 %v1870_v27, %v1797_v8  ;;  %1579 = vst.msk [vmem:[#allocation2 + $0x30] sm:$0xff] %vm504_vm2, %v1547_v25  ;;  %4122 = vmatmul.msk.bf16.gmra.mxu2 %vm362_vm1, %v4845_v19  ;;  %4345 = vmatmul.msk.bf16.gmra.mxu0 %vm362_vm1, %v4876_v20  ;;  %v1161_v31 = vld [vmem:[#allocation2 + $0x40] sm:$0xff] }
 0x167   : > { %870 = vst.msk [vmem:[#allocation2 + $0x48] sm:$0xff] %vm504_vm2, %v838_v26  ;;  %v810_v26 = vld [vmem:[#allocation2 + $0x68] sm:$0xff] }
 0x168   : > { %1934 = vst.msk [vmem:[#allocation2 + $0x28] sm:$0xff] %vm504_vm2, %v1902_v28  ;;  %3516 = vperm.xlu0 %5029, %v3430_v15   ;;  %3586 = vperm.xlu1 %5030, %v3444_v16  }
 0x169   : > { %v1093_v30 = vpop.f32.mrf.mxu2  ;;  %v1446_v32 = vpop.f32.mrf.mxu3 }
 0x16a   : > { %v1193_v34 = vadd.f32 %v1161_v31, %v1093_v30  ;;  %v3427_v31 = vld [vmem:[%s6360_s2 + $0x50] sm:$0xff] }
 0x16b   : > { %v1516_v37 = vld [vmem:[#allocation2 + $0x38] sm:$0xff]  ;;  %v742_v38 = vpop.f32.mrf.mxu1  ;;  %v1802_v40 = vpop.f32.mrf.mxu0 }
 0x16c   : > { %1225 = vst.msk [vmem:[#allocation2 + $0x40] sm:$0xff] %vm504_vm2, %v1193_v34  ;;  %v1548_v41 = vadd.f32 %v1516_v37, %v1446_v32  ;;  %v839_v42 = vadd.f32 %v807_v39, %v742_v38  ;;  %v3441_v32 = vld [vmem:[%s6360_s2 + $0xc0] sm:$0xff]  ;;  %v3148_v34 = vpop.permute.xlu1 %3147 }
 0x16d   : > { %v1871_v43 = vld [vmem:[#allocation2 + $0x30] sm:$0xff]  ;;  %v3198_v38 = vsel %vm411_vm0, %v3148_v34, 0 }
 0x16e   : > { %v1903_v47 = vadd.f32 %v1871_v43, %v1800_v24  ;;  %1580 = vst.msk [vmem:[#allocation2 + $0x38] sm:$0xff] %vm504_vm2, %v1548_v41  ;;  %4011 = vmatmul.msk.bf16.gmra.mxu1 %vm362_vm1, %v4830_v35  ;;  %4234 = vmatmul.msk.bf16.gmra.mxu3 %vm362_vm1, %v4861_v36  ;;  %v1162_v49 = vld [vmem:[#allocation2 + $0x48] sm:$0xff] }
 0x16f   : > { %871 = vst.msk [vmem:[#allocation2 + $0x50] sm:$0xff] %vm504_vm2, %v839_v42  ;;  %v4863_v41 = vld [vmem:[%s6359_s1 + $0x1f0] sm:$0xff]  ;;  %3207 = vmatpush.bf16.msra.mxu0 %v3198_v38 }
 0x170   : > { %1935 = vst.msk [vmem:[#allocation2 + $0x30] sm:$0xff] %vm504_vm2, %v1903_v47  ;;  %3501 = vperm.xlu0 %5029, %v3427_v31   ;;  %3571 = vperm.xlu1 %5030, %v3441_v32   ;;  %v3435_v38 = vld [vmem:[%s6360_s2 + $0x90] sm:$0xff] }
 0x171   : > { %v1095_v48 = vpop.f32.mrf.mxu2  ;;  %v1449_v50 = vpop.f32.mrf.mxu3 }
 0x172   : > { %v1194_v51 = vadd.f32 %v1162_v49, %v1095_v48  ;;  %v3440_v49 = vld [vmem:[%s6360_s2 + $0xb8] sm:$0xff] }
 0x173   : > { %v1517_v54 = vld [vmem:[#allocation2 + $0x40] sm:$0xff]  ;;  %v744_v55 = vpop.f32.mrf.mxu1  ;;  %v1805_v57 = vpop.f32.mrf.mxu0 }
 0x174   : > { %1226 = vst.msk [vmem:[#allocation2 + $0x48] sm:$0xff] %vm504_vm2, %v1194_v51  ;;  %v1549_v58 = vadd.f32 %v1517_v54, %v1449_v50  ;;  %v840_v59 = vadd.f32 %v808_v56, %v744_v55  ;;  %v3428_v50 = vld [vmem:[%s6360_s2 + $0x58] sm:$0xff] }
 0x175   : > { %v1872_v60 = vld [vmem:[#allocation2 + $0x38] sm:$0xff]  ;;  %v4848_v56 = vld [vmem:[%s6359_s1 + $0x178] sm:$0xff] }
 0x176   : > { %v1904_v63 = vadd.f32 %v1872_v60, %v1802_v40  ;;  %1581 = vst.msk [vmem:[#allocation2 + $0x40] sm:$0xff] %vm504_vm2, %v1549_v58  ;;  %4123 = vmatmul.msk.bf16.gmra.mxu2 %vm362_vm1, %v4846_v52  ;;  %4346 = vmatmul.msk.bf16.gmra.mxu0 %vm362_vm1, %v4877_v53  ;;  %v1163_v2 = vld [vmem:[#allocation2 + $0x50] sm:$0xff]  ;;  %v812_v60 = vld [vmem:[#allocation2 + $0x78] sm:$0xff] }
 0x177   : > { %872 = vst.msk [vmem:[#allocation2 + $0x58] sm:$0xff] %vm504_vm2, %v840_v59  ;;  %v4832_v40 = vld [vmem:[%s6359_s1 + $0xf8] sm:$0xff] }
 0x178   : > { %1936 = vst.msk [vmem:[#allocation2 + $0x38] sm:$0xff] %vm504_vm2, %v1904_v63  ;;  %3566 = vperm.xlu0 %5029, %v3440_v49   ;;  %3506 = vperm.xlu1 %5030, %v3428_v50  }
 0x179   : > { %v1098_v1 = vpop.f32.mrf.mxu2  ;;  %v1451_v3 = vpop.f32.mrf.mxu3 }
 0x17a   : > { %v1195_v5 = vadd.f32 %v1163_v2, %v1098_v1  ;;  %v3447_v1 = vld [vmem:[%s6360_s2 + $0xf0] sm:$0xff]  ;;  %v3437_v2 = vld [vmem:[%s6360_s2 + $0xa0] sm:$0xff] }
 0x17b   : > { %v1518_v8 = vld [vmem:[#allocation2 + $0x48] sm:$0xff]  ;;  %v747_v9 = vpop.f32.mrf.mxu1  ;;  %v1807_v11 = vpop.f32.mrf.mxu0  ;;  %3601 = vperm.xlu2 %5028, %v3447_v1  }
 0x17c   : > { %1227 = vst.msk [vmem:[#allocation2 + $0x50] sm:$0xff] %vm504_vm2, %v1195_v5  ;;  %v1550_v12 = vadd.f32 %v1518_v8, %v1451_v3  ;;  %v841_v13 = vadd.f32 %v809_v10, %v747_v9  ;;  %v4864_v9 = vld [vmem:[%s6359_s1 + $0x1f8] sm:$0xff]  ;;  %v4881_v10 = vld [vmem:[%s6359_s1 + $0x280] sm:$0xff] }
 0x17d   : > { %v1873_v14 = vld [vmem:[#allocation2 + $0x40] sm:$0xff] }
 0x17e   : > { %v1905_v17 = vadd.f32 %v1873_v14, %v1805_v57  ;;  %1582 = vst.msk [vmem:[#allocation2 + $0x48] sm:$0xff] %vm504_vm2, %v1550_v12  ;;  %4012 = vmatmul.msk.bf16.gmra.mxu1 %vm362_vm1, %v4831_v6  ;;  %4235 = vmatmul.msk.bf16.gmra.mxu3 %vm362_vm1, %v4862_v7  ;;  %v1164_v19 = vld [vmem:[#allocation2 + $0x58] sm:$0xff]  ;;  %v4879_v57 = vld [vmem:[%s6359_s1 + $0x270] sm:$0xff] }
 0x17f   : > { %873 = vst.msk [vmem:[#allocation2 + $0x60] sm:$0xff] %vm504_vm2, %v841_v13  ;;  %v813_v13 = vld [vmem:[#allocation2 + $0x80] sm:$0xff] }
 0x180   : > { %1937 = vst.msk [vmem:[#allocation2 + $0x40] sm:$0xff] %vm504_vm2, %v1905_v17  ;;  %3551 = vperm.xlu0 %5029, %v3437_v2   ;;  %3491 = vperm.xlu1 %5030, %v3425_v4  }
 0x181   : > { %v1100_v18 = vpop.f32.mrf.mxu2  ;;  %v1454_v20 = vpop.f32.mrf.mxu3 }
 0x182   : > { %v1196_v21 = vadd.f32 %v1164_v19, %v1100_v18  ;;  %v3446_v18 = vld [vmem:[%s6360_s2 + $0xe8] sm:$0xff]  ;;  %v3424_v19 = vld [vmem:[%s6360_s2 + $0x38] sm:$0xff] }
 0x183   : > { %v1519_v24 = vld [vmem:[#allocation2 + $0x50] sm:$0xff]  ;;  %v749_v25 = vpop.f32.mrf.mxu1  ;;  %v1810_v27 = vpop.f32.mrf.mxu0  ;;  %3596 = vperm.xlu2 %5028, %v3446_v18  }
 0x184   : > { %1228 = vst.msk [vmem:[#allocation2 + $0x58] sm:$0xff] %vm504_vm2, %v1196_v21  ;;  %v1551_v28 = vadd.f32 %v1519_v24, %v1454_v20  ;;  %v842_v29 = vadd.f32 %v810_v26, %v749_v25  ;;  %v3438_v21 = vld [vmem:[%s6360_s2 + $0xa8] sm:$0xff]  ;;  %v4897_v26 = vld [vmem:[%s6359_s1 + $0x300] sm:$0xff] }
 0x185   : > { %v1874_v30 = vld [vmem:[#allocation2 + $0x48] sm:$0xff] }
 0x186   : > { %v1906_v33 = vadd.f32 %v1874_v30, %v1807_v11  ;;  %1583 = vst.msk [vmem:[#allocation2 + $0x50] sm:$0xff] %vm504_vm2, %v1551_v28  ;;  %4124 = vmatmul.msk.bf16.gmra.mxu2 %vm362_vm1, %v4847_v22  ;;  %4347 = vmatmul.msk.bf16.gmra.mxu0 %vm362_vm1, %v4878_v23  ;;  %v1165_v36 = vld [vmem:[#allocation2 + $0x60] sm:$0xff]  ;;  %v814_v30 = vld [vmem:[#allocation2 + $0x88] sm:$0xff] }
 0x187   : > { %874 = vst.msk [vmem:[#allocation2 + $0x68] sm:$0xff] %vm504_vm2, %v842_v29 }
 0x188   : > { %1938 = vst.msk [vmem:[#allocation2 + $0x48] sm:$0xff] %vm504_vm2, %v1906_v33  ;;  %3486 = vperm.xlu0 %5029, %v3424_v19   ;;  %3556 = vperm.xlu1 %5030, %v3438_v21  }
 0x189   : > { %v1103_v35 = vpop.f32.mrf.mxu2  ;;  %v1456_v37 = vpop.f32.mrf.mxu3 }
 0x18a   : > { %v1197_v39 = vadd.f32 %v1165_v36, %v1103_v35  ;;  %v3432_v35 = vld [vmem:[%s6360_s2 + $0x78] sm:$0xff]  ;;  %v3421_v36 = vld [vmem:[%s6360_s2 + $0x20] sm:$0xff] }
 0x18b   : > { %v1520_v42 = vld [vmem:[#allocation2 + $0x58] sm:$0xff]  ;;  %v752_v43 = vpop.f32.mrf.mxu1  ;;  %v1812_v45 = vpop.f32.mrf.mxu0  ;;  %3526 = vperm.xlu2 %5028, %v3432_v35  }
 0x18c   : > { %1229 = vst.msk [vmem:[#allocation2 + $0x60] sm:$0xff] %vm504_vm2, %v1197_v39  ;;  %v1552_v46 = vadd.f32 %v1520_v42, %v1456_v37  ;;  %v843_v47 = vadd.f32 %v811_v44, %v752_v43  ;;  %v4882_v43 = vld [vmem:[%s6359_s1 + $0x288] sm:$0xff]  ;;  %v4913_v44 = vld [vmem:[%s6359_s1 + $0x380] sm:$0xff] }
 0x18d   : > { %v1875_v48 = vld [vmem:[#allocation2 + $0x50] sm:$0xff] }
 0x18e   : > { %v1907_v51 = vadd.f32 %v1875_v48, %v1810_v27  ;;  %1584 = vst.msk [vmem:[#allocation2 + $0x58] sm:$0xff] %vm504_vm2, %v1552_v46  ;;  %4013 = vmatmul.msk.bf16.gmra.mxu1 %vm362_vm1, %v4832_v40  ;;  %4236 = vmatmul.msk.bf16.gmra.mxu3 %vm362_vm1, %v4863_v41  ;;  %v1166_v53 = vld [vmem:[#allocation2 + $0x68] sm:$0xff]  ;;  %v4880_v27 = vld [vmem:[%s6359_s1 + $0x278] sm:$0xff] }
 0x18f   : > { %875 = vst.msk [vmem:[#allocation2 + $0x70] sm:$0xff] %vm504_vm2, %v843_v47  ;;  %v815_v47 = vld [vmem:[#allocation2 + $0x90] sm:$0xff] }
 0x190   : > { %1939 = vst.msk [vmem:[#allocation2 + $0x50] sm:$0xff] %vm504_vm2, %v1907_v51  ;;  %3471 = vperm.xlu0 %5029, %v3421_v36   ;;  %3541 = vperm.xlu1 %5030, %v3435_v38   ;;  %v3426_v38 = vld [vmem:[%s6360_s2 + $0x48] sm:$0xff] }
 0x191   : > { %v1105_v52 = vpop.f32.mrf.mxu2  ;;  %v1459_v54 = vpop.f32.mrf.mxu3 }
 0x192   : > { %v1198_v55 = vadd.f32 %v1166_v53, %v1105_v52  ;;  %v3429_v52 = vld [vmem:[%s6360_s2 + $0x60] sm:$0xff]  ;;  %v3434_v53 = vld [vmem:[%s6360_s2 + $0x88] sm:$0xff] }
 0x193   : > { %v1521_v58 = vld [vmem:[#allocation2 + $0x60] sm:$0xff]  ;;  %v754_v59 = vpop.f32.mrf.mxu1  ;;  %v1815_v61 = vpop.f32.mrf.mxu0  ;;  %3511 = vperm.xlu2 %5028, %v3429_v52  }
 0x194   : > { %1230 = vst.msk [vmem:[#allocation2 + $0x68] sm:$0xff] %vm504_vm2, %v1198_v55  ;;  %v1553_v62 = vadd.f32 %v1521_v58, %v1459_v54  ;;  %v844_v63 = vadd.f32 %v812_v60, %v754_v59  ;;  %v3422_v55 = vld [vmem:[%s6360_s2 + $0x28] sm:$0xff] }
 0x195   : > { %v1876_v0 = vld [vmem:[#allocation2 + $0x58] sm:$0xff]  ;;  %v4898_v60 = vld [vmem:[%s6359_s1 + $0x308] sm:$0xff] }
 0x196   : > { %v1908_v3 = vadd.f32 %v1876_v0, %v1812_v45  ;;  %1585 = vst.msk [vmem:[#allocation2 + $0x60] sm:$0xff] %vm504_vm2, %v1553_v62  ;;  %4125 = vmatmul.msk.bf16.gmra.mxu2 %vm362_vm1, %v4848_v56  ;;  %4348 = vmatmul.msk.bf16.gmra.mxu0 %vm362_vm1, %v4879_v57  ;;  %v1167_v6 = vld [vmem:[#allocation2 + $0x70] sm:$0xff]  ;;  %v816_v0 = vld [vmem:[#allocation2 + $0x98] sm:$0xff] }
 0x197   : > { %876 = vst.msk [vmem:[#allocation2 + $0x78] sm:$0xff] %vm504_vm2, %v844_v63 }
 0x198   : > { %1940 = vst.msk [vmem:[#allocation2 + $0x58] sm:$0xff] %vm504_vm2, %v1908_v3  ;;  %3536 = vperm.xlu0 %5029, %v3434_v53   ;;  %3476 = vperm.xlu1 %5030, %v3422_v55   ;;  %v3423_v53 = vld [vmem:[%s6360_s2 + $0x30] sm:$0xff] }
 0x199   : > { %v1108_v5 = vpop.f32.mrf.mxu2  ;;  %v1461_v7 = vpop.f32.mrf.mxu3 }
 0x19a   : > { %v1199_v8 = vadd.f32 %v1167_v6, %v1108_v5  ;;  %v3442_v5 = vld [vmem:[%s6360_s2 + $0xc8] sm:$0xff]  ;;  %v3417_v6 = vld [vmem:[%s6360_s2] sm:$0xff] }
 0x19b   : > { %v1522_v11 = vld [vmem:[#allocation2 + $0x68] sm:$0xff]  ;;  %v757_v12 = vpop.f32.mrf.mxu1  ;;  %v1817_v14 = vpop.f32.mrf.mxu0  ;;  %3576 = vperm.xlu2 %5028, %v3442_v5  }
 0x19c   : > { %1231 = vst.msk [vmem:[#allocation2 + $0x70] sm:$0xff] %vm504_vm2, %v1199_v8  ;;  %v1554_v15 = vadd.f32 %v1522_v11, %v1461_v7  ;;  %v845_v16 = vadd.f32 %v813_v13, %v757_v12  ;;  %v3419_v8 = vld [vmem:[%s6360_s2 + $0x10] sm:$0xff] }
 0x19d   : > { %v1877_v17 = vld [vmem:[#allocation2 + $0x60] sm:$0xff]  ;;  %v4883_v13 = vld [vmem:[%s6359_s1 + $0x290] sm:$0xff] }
 0x19e   : > { %v1909_v20 = vadd.f32 %v1877_v17, %v1815_v61  ;;  %1586 = vst.msk [vmem:[#allocation2 + $0x68] sm:$0xff] %vm504_vm2, %v1554_v15  ;;  %4237 = vmatmul.msk.bf16.gmra.mxu3 %vm362_vm1, %v4864_v9  ;;  %4446 = vmatmul.msk.bf16.vlgmr.msra.gmra.mxu1 %vm362_vm1, %v4881_v10  ;;  %v1168_v23 = vld [vmem:[#allocation2 + $0x78] sm:$0xff]  ;;  %v817_v17 = vld [vmem:[#allocation2 + $0xa0] sm:$0xff] }
 0x19f   : > { %877 = vst.msk [vmem:[#allocation2 + $0x80] sm:$0xff] %vm504_vm2, %v845_v16  ;;  %v4929_v61 = vld [vmem:[%s6359_s1 + $0x400] sm:$0xff] }
 0x1a0   : > { %1941 = vst.msk [vmem:[#allocation2 + $0x60] sm:$0xff] %vm504_vm2, %v1909_v20  ;;  %3451 = vperm.xlu0 %5029, %v3417_v6   ;;  %3461 = vperm.xlu1 %5030, %v3419_v8  }
 0x1a1   : > { %v1110_v22 = vpop.f32.mrf.mxu2  ;;  %v1464_v24 = vpop.f32.mrf.mxu3 }
 0x1a2   : > { %v1200_v25 = vadd.f32 %v1168_v23, %v1110_v22  ;;  %v3439_v22 = vld [vmem:[%s6360_s2 + $0xb0] sm:$0xff]  ;;  %v3418_v23 = vld [vmem:[%s6360_s2 + $0x8] sm:$0xff] }
 0x1a3   : > { %v1523_v28 = vld [vmem:[#allocation2 + $0x70] sm:$0xff]  ;;  %v759_v29 = vpop.f32.mrf.mxu1  ;;  %v1820_v31 = vpop.f32.mrf.mxu0  ;;  %3561 = vperm.xlu2 %5028, %v3439_v22  }
 0x1a4   : > { %1232 = vst.msk [vmem:[#allocation2 + $0x78] sm:$0xff] %vm504_vm2, %v1200_v25  ;;  %v1555_v32 = vadd.f32 %v1523_v28, %v1464_v24  ;;  %v846_v33 = vadd.f32 %v814_v30, %v759_v29  ;;  %v4899_v29 = vld [vmem:[%s6359_s1 + $0x310] sm:$0xff]  ;;  %v4930_v30 = vld [vmem:[%s6359_s1 + $0x408] sm:$0xff] }
 0x1a5   : > { %v1878_v34 = vld [vmem:[#allocation2 + $0x68] sm:$0xff] }
 0x1a6   : > { %v1910_v37 = vadd.f32 %v1878_v34, %v1817_v14  ;;  %1587 = vst.msk [vmem:[#allocation2 + $0x70] sm:$0xff] %vm504_vm2, %v1555_v32  ;;  %4558 = vmatmul.msk.bf16.vlgmr.msra.gmra.mxu2 %vm362_vm1, %v4897_v26  ;;  %4349 = vmatmul.msk.bf16.gmra.mxu0 %vm362_vm1, %v4880_v27  ;;  %v1169_v40 = vld [vmem:[#allocation2 + $0x80] sm:$0xff] }
 0x1a7   : > { %878 = vst.msk [vmem:[#allocation2 + $0x88] sm:$0xff] %vm504_vm2, %v846_v33  ;;  %v4914_v14 = vld [vmem:[%s6359_s1 + $0x388] sm:$0xff]  ;;  %v818_v33 = vld [vmem:[#allocation2 + $0xa8] sm:$0xff] }
 0x1a8   : > { %1942 = vst.msk [vmem:[#allocation2 + $0x68] sm:$0xff] %vm504_vm2, %v1910_v37  ;;  %3456 = vperm.xlu1 %5030, %v3418_v23  }
 0x1a9   : > { %v1113_v39 = vpop.f32.mrf.mxu2  ;;  %v1466_v41 = vpop.f32.mrf.mxu3 }
 0x1aa   : > { %v1201_v42 = vadd.f32 %v1169_v40, %v1113_v39 }
 0x1ab   : > { %v1524_v45 = vld [vmem:[#allocation2 + $0x78] sm:$0xff]  ;;  %v762_v46 = vpop.f32.mrf.mxu1  ;;  %v1822_v48 = vpop.f32.mrf.mxu0  ;;  %3496 = vperm.xlu2 %5028, %v3426_v38  }
 0x1ac   : > { %1233 = vst.msk [vmem:[#allocation2 + $0x80] sm:$0xff] %vm504_vm2, %v1201_v42  ;;  %v1556_v49 = vadd.f32 %v1524_v45, %v1466_v41  ;;  %v847_v50 = vadd.f32 %v815_v47, %v762_v46  ;;  %v4915_v45 = vld [vmem:[%s6359_s1 + $0x390] sm:$0xff] }
 0x1ad   : > { %v1879_v51 = vld [vmem:[#allocation2 + $0x70] sm:$0xff] }
 0x1ae   : > { %v1911_v54 = vadd.f32 %v1879_v51, %v1820_v31  ;;  %1588 = vst.msk [vmem:[#allocation2 + $0x78] sm:$0xff] %vm504_vm2, %v1556_v49  ;;  %4447 = vmatmul.msk.bf16.gmra.mxu1 %vm362_vm1, %v4882_v43  ;;  %4670 = vmatmul.msk.bf16.vlgmr.msra.gmra.mxu3 %vm362_vm1, %v4913_v44  ;;  %v1170_v57 = vld [vmem:[#allocation2 + $0x88] sm:$0xff]  ;;  %v4884_v44 = vld [vmem:[%s6359_s1 + $0x298] sm:$0xff] }
 0x1af   : > { %879 = vst.msk [vmem:[#allocation2 + $0x90] sm:$0xff] %vm504_vm2, %v847_v50 }
 0x1b0   : > { %1943 = vst.msk [vmem:[#allocation2 + $0x70] sm:$0xff] %vm504_vm2, %v1911_v54 }
 0x1b1   : > { %v1115_v56 = vpop.f32.mrf.mxu2  ;;  %v1469_v58 = vpop.f32.mrf.mxu3 }
 0x1b2   : > { %v1202_v59 = vadd.f32 %v1170_v57, %v1115_v56 }
 0x1b3   : > { %v1525_v62 = vld [vmem:[#allocation2 + $0x80] sm:$0xff]  ;;  %v764_v63 = vpop.f32.mrf.mxu1  ;;  %v1825_v1 = vpop.f32.mrf.mxu0  ;;  %3481 = vperm.xlu2 %5028, %v3423_v53  }
 0x1b4   : > { %1234 = vst.msk [vmem:[#allocation2 + $0x88] sm:$0xff] %vm504_vm2, %v1202_v59  ;;  %v1557_v2 = vadd.f32 %v1525_v62, %v1469_v58  ;;  %v848_v3 = vadd.f32 %v816_v0, %v764_v63  ;;  %v4900_v59 = vld [vmem:[%s6359_s1 + $0x318] sm:$0xff]  ;;  %v820_v63 = vld [vmem:[#allocation2 + $0xb8] sm:$0xff] }
 0x1b5   : > { %v1880_v4 = vld [vmem:[#allocation2 + $0x78] sm:$0xff] }
 0x1b6   : > { %v1912_v7 = vadd.f32 %v1880_v4, %v1822_v48  ;;  %1589 = vst.msk [vmem:[#allocation2 + $0x80] sm:$0xff] %vm504_vm2, %v1557_v2  ;;  %4559 = vmatmul.msk.bf16.gmra.mxu2 %vm362_vm1, %v4898_v60  ;;  %4782 = vmatmul.msk.bf16.vlgmr.msra.gmra.mxu0 %vm362_vm1, %v4929_v61  ;;  %v1171_v10 = vld [vmem:[#allocation2 + $0x90] sm:$0xff]  ;;  %v4931_v60 = vld [vmem:[%s6359_s1 + $0x410] sm:$0xff] }
 0x1b7   : > { %880 = vst.msk [vmem:[#allocation2 + $0x98] sm:$0xff] %vm504_vm2, %v848_v3  ;;  %v819_v48 = vld [vmem:[#allocation2 + $0xb0] sm:$0xff] }
 0x1b8   : > { %1944 = vst.msk [vmem:[#allocation2 + $0x78] sm:$0xff] %vm504_vm2, %v1912_v7  ;;  %v3436_v4 = vld [vmem:[%s6360_s2 + $0x98] sm:$0xff] }
 0x1b9   : > { %v1118_v9 = vpop.f32.mrf.mxu2  ;;  %v1471_v11 = vpop.f32.mrf.mxu3 }
 0x1ba   : > { %v1203_v12 = vadd.f32 %v1171_v10, %v1118_v9  ;;  %v4885_v10 = vld [vmem:[%s6359_s1 + $0x2a0] sm:$0xff] }
 0x1bb   : > { %v1526_v15 = vld [vmem:[#allocation2 + $0x88] sm:$0xff]  ;;  %v767_v16 = vpop.f32.mrf.mxu1  ;;  %v1827_v18 = vpop.f32.mrf.mxu0  ;;  %3546 = vperm.xlu2 %5028, %v3436_v4  }
 0x1bc   : > { %1235 = vst.msk [vmem:[#allocation2 + $0x90] sm:$0xff] %vm504_vm2, %v1203_v12  ;;  %v1558_v19 = vadd.f32 %v1526_v15, %v1471_v11  ;;  %v849_v20 = vadd.f32 %v817_v17, %v767_v16  ;;  %v4916_v11 = vld [vmem:[%s6359_s1 + $0x398] sm:$0xff]  ;;  %v4887_v4 = vld [vmem:[%s6359_s1 + $0x2b0] sm:$0xff] }
 0x1bd   : > { %v1881_v21 = vld [vmem:[#allocation2 + $0x80] sm:$0xff] }
 0x1be   : > { %v1913_v24 = vadd.f32 %v1881_v21, %v1825_v1  ;;  %1590 = vst.msk [vmem:[#allocation2 + $0x88] sm:$0xff] %vm504_vm2, %v1558_v19  ;;  %4448 = vmatmul.msk.bf16.gmra.mxu1 %vm362_vm1, %v4883_v13  ;;  %4671 = vmatmul.msk.bf16.gmra.mxu3 %vm362_vm1, %v4914_v14  ;;  %v1172_v26 = vld [vmem:[#allocation2 + $0x98] sm:$0xff]  ;;  %v821_v14 = vld [vmem:[#allocation2 + $0xc0] sm:$0xff] }
 0x1bf   : > { %881 = vst.msk [vmem:[#allocation2 + $0xa0] sm:$0xff] %vm504_vm2, %v849_v20  ;;  %v3433_v19 = vld [vmem:[%s6360_s2 + $0x80] sm:$0xff] }
 0x1c0   : > { %1945 = vst.msk [vmem:[#allocation2 + $0x80] sm:$0xff] %vm504_vm2, %v1913_v24 }
 0x1c1   : > { %v1120_v25 = vpop.f32.mrf.mxu2  ;;  %v1474_v27 = vpop.f32.mrf.mxu3 }
 0x1c2   : > { %v1204_v28 = vadd.f32 %v1172_v26, %v1120_v25  ;;  %v4901_v25 = vld [vmem:[%s6359_s1 + $0x320] sm:$0xff]  ;;  %v4932_v26 = vld [vmem:[%s6359_s1 + $0x418] sm:$0xff] }
 0x1c3   : > { %v1527_v31 = vld [vmem:[#allocation2 + $0x90] sm:$0xff]  ;;  %v769_v32 = vpop.f32.mrf.mxu1  ;;  %v1830_v34 = vpop.f32.mrf.mxu0  ;;  %3531 = vperm.xlu2 %5028, %v3433_v19   ;;  %v4934_v19 = vld [vmem:[%s6359_s1 + $0x428] sm:$0xff] }
 0x1c4   : > { %1236 = vst.msk [vmem:[#allocation2 + $0x98] sm:$0xff] %vm504_vm2, %v1204_v28  ;;  %v1559_v35 = vadd.f32 %v1527_v31, %v1474_v27  ;;  %v850_v36 = vadd.f32 %v818_v33, %v769_v32 }
 0x1c5   : > { %v1882_v37 = vld [vmem:[#allocation2 + $0x88] sm:$0xff] }
 0x1c6   : > { %v1914_v39 = vadd.f32 %v1882_v37, %v1827_v18  ;;  %1591 = vst.msk [vmem:[#allocation2 + $0x90] sm:$0xff] %vm504_vm2, %v1559_v35  ;;  %4560 = vmatmul.msk.bf16.gmra.mxu2 %vm362_vm1, %v4899_v29  ;;  %4783 = vmatmul.msk.bf16.gmra.mxu0 %vm362_vm1, %v4930_v30  ;;  %v1173_v41 = vld [vmem:[#allocation2 + $0xa0] sm:$0xff]  ;;  %v822_v29 = vld [vmem:[#allocation2 + $0xc8] sm:$0xff] }
 0x1c7   : > { %882 = vst.msk [vmem:[#allocation2 + $0xa8] sm:$0xff] %vm504_vm2, %v850_v36 }
 0x1c8   : > { %1946 = vst.msk [vmem:[#allocation2 + $0x88] sm:$0xff] %vm504_vm2, %v1914_v39 }
 0x1c9   : > { %v1123_v40 = vpop.f32.mrf.mxu2  ;;  %v1476_v42 = vpop.f32.mrf.mxu3 }
 0x1ca   : > { %v1205_v43 = vadd.f32 %v1173_v41, %v1123_v40  ;;  %v4886_v40 = vld [vmem:[%s6359_s1 + $0x2a8] sm:$0xff]  ;;  %v4917_v41 = vld [vmem:[%s6359_s1 + $0x3a0] sm:$0xff] }
 0x1cb   : > { %v1528_v46 = vld [vmem:[#allocation2 + $0x98] sm:$0xff]  ;;  %v772_v47 = vpop.f32.mrf.mxu1  ;;  %v1832_v49 = vpop.f32.mrf.mxu0 }
 0x1cc   : > { %1237 = vst.msk [vmem:[#allocation2 + $0xa0] sm:$0xff] %vm504_vm2, %v1205_v43  ;;  %v1560_v50 = vadd.f32 %v1528_v46, %v1476_v42  ;;  %v851_v51 = vadd.f32 %v819_v48, %v772_v47 }
 0x1cd   : > { %v1883_v52 = vld [vmem:[#allocation2 + $0x90] sm:$0xff] }
 0x1ce   : > { %v1915_v54 = vadd.f32 %v1883_v52, %v1830_v34  ;;  %1592 = vst.msk [vmem:[#allocation2 + $0x98] sm:$0xff] %vm504_vm2, %v1560_v50  ;;  %4449 = vmatmul.msk.bf16.gmra.mxu1 %vm362_vm1, %v4884_v44  ;;  %4672 = vmatmul.msk.bf16.gmra.mxu3 %vm362_vm1, %v4915_v45  ;;  %v1174_v56 = vld [vmem:[#allocation2 + $0xa8] sm:$0xff]  ;;  %v3420_v34 = vld [vmem:[%s6360_s2 + $0x18] sm:$0xff] }
 0x1cf   : > { %883 = vst.msk [vmem:[#allocation2 + $0xb0] sm:$0xff] %vm504_vm2, %v851_v51  ;;  %3466 = vperm.xlu2 %5028, %v3420_v34   ;;  %v823_v44 = vld [vmem:[#allocation2 + $0xd0] sm:$0xff] }
 0x1d0   : > { %1947 = vst.msk [vmem:[#allocation2 + $0x90] sm:$0xff] %vm504_vm2, %v1915_v54  ;;  %v4902_v54 = vld [vmem:[%s6359_s1 + $0x328] sm:$0xff] }
 0x1d1   : > { %v1125_v55 = vpop.f32.mrf.mxu2  ;;  %v1479_v57 = vpop.f32.mrf.mxu3 }
 0x1d2   : > { %v1206_v58 = vadd.f32 %v1174_v56, %v1125_v55  ;;  %v4933_v55 = vld [vmem:[%s6359_s1 + $0x420] sm:$0xff] }
 0x1d3   : > { %v1529_v61 = vld [vmem:[#allocation2 + $0xa0] sm:$0xff]  ;;  %v774_v62 = vpop.f32.mrf.mxu1  ;;  %v1835_v0 = vpop.f32.mrf.mxu0 }
 0x1d4   : > { %1238 = vst.msk [vmem:[#allocation2 + $0xa8] sm:$0xff] %vm504_vm2, %v1206_v58  ;;  %v1561_v1 = vadd.f32 %v1529_v61, %v1479_v57  ;;  %v852_v2 = vadd.f32 %v820_v63, %v774_v62  ;;  %v824_v58 = vld [vmem:[#allocation2 + $0xd8] sm:$0xff] }
 0x1d5   : > { %v1884_v3 = vld [vmem:[#allocation2 + $0x98] sm:$0xff] }
 0x1d6   : > { %v1916_v5 = vadd.f32 %v1884_v3, %v1832_v49  ;;  %1593 = vst.msk [vmem:[#allocation2 + $0xa0] sm:$0xff] %vm504_vm2, %v1561_v1  ;;  %4561 = vmatmul.msk.bf16.gmra.mxu2 %vm362_vm1, %v4900_v59  ;;  %4784 = vmatmul.msk.bf16.gmra.mxu0 %vm362_vm1, %v4931_v60  ;;  %v1175_v7 = vld [vmem:[#allocation2 + $0xb0] sm:$0xff] }
 0x1d7   : > { %884 = vst.msk [vmem:[#allocation2 + $0xb8] sm:$0xff] %vm504_vm2, %v852_v2 }
 0x1d8   : > { %1948 = vst.msk [vmem:[#allocation2 + $0x98] sm:$0xff] %vm504_vm2, %v1916_v5  ;;  %v4918_v5 = vld [vmem:[%s6359_s1 + $0x3a8] sm:$0xff] }
 0x1d9   : > { %v1128_v6 = vpop.f32.mrf.mxu2  ;;  %v1481_v8 = vpop.f32.mrf.mxu3 }
 0x1da   : > { %v1207_v9 = vadd.f32 %v1175_v7, %v1128_v6 }
 0x1db   : > { %v1530_v12 = vld [vmem:[#allocation2 + $0xa8] sm:$0xff]  ;;  %v777_v13 = vpop.f32.mrf.mxu1  ;;  %v1837_v15 = vpop.f32.mrf.mxu0 }
 0x1dc   : > { %1239 = vst.msk [vmem:[#allocation2 + $0xb0] sm:$0xff] %vm504_vm2, %v1207_v9  ;;  %v1562_v16 = vadd.f32 %v1530_v12, %v1481_v8  ;;  %v853_v17 = vadd.f32 %v821_v14, %v777_v13  ;;  %v825_v8 = vld [vmem:[#allocation2 + $0xe0] sm:$0xff] }
 0x1dd   : > { %v1885_v18 = vld [vmem:[#allocation2 + $0xa0] sm:$0xff] }
 0x1de   : > { %v1917_v20 = vadd.f32 %v1885_v18, %v1835_v0  ;;  %1594 = vst.msk [vmem:[#allocation2 + $0xa8] sm:$0xff] %vm504_vm2, %v1562_v16  ;;  %4450 = vmatmul.msk.bf16.gmra.mxu1 %vm362_vm1, %v4885_v10  ;;  %4673 = vmatmul.msk.bf16.gmra.mxu3 %vm362_vm1, %v4916_v11  ;;  %v1176_v22 = vld [vmem:[#allocation2 + $0xb8] sm:$0xff]  ;;  %v4903_v18 = vld [vmem:[%s6359_s1 + $0x330] sm:$0xff] }
 0x1df   : > { %885 = vst.msk [vmem:[#allocation2 + $0xc0] sm:$0xff] %vm504_vm2, %v853_v17 }
 0x1e0   : > { %1949 = vst.msk [vmem:[#allocation2 + $0xa0] sm:$0xff] %vm504_vm2, %v1917_v20 }
 0x1e1   : > { %v1130_v21 = vpop.f32.mrf.mxu2  ;;  %v1484_v23 = vpop.f32.mrf.mxu3 }
 0x1e2   : > { %v1208_v24 = vadd.f32 %v1176_v22, %v1130_v21  ;;  %v826_v22 = vld [vmem:[#allocation2 + $0xe8] sm:$0xff] }
 0x1e3   : > { %v1531_v27 = vld [vmem:[#allocation2 + $0xb0] sm:$0xff]  ;;  %v779_v28 = vpop.f32.mrf.mxu1  ;;  %v1840_v30 = vpop.f32.mrf.mxu0 }
 0x1e4   : > { %1240 = vst.msk [vmem:[#allocation2 + $0xb8] sm:$0xff] %vm504_vm2, %v1208_v24  ;;  %v1563_v31 = vadd.f32 %v1531_v27, %v1484_v23  ;;  %v854_v32 = vadd.f32 %v822_v29, %v779_v28 }
 0x1e5   : > { %v1886_v33 = vld [vmem:[#allocation2 + $0xa8] sm:$0xff] }
 0x1e6   : > { %v1918_v35 = vadd.f32 %v1886_v33, %v1837_v15  ;;  %1595 = vst.msk [vmem:[#allocation2 + $0xb0] sm:$0xff] %vm504_vm2, %v1563_v31  ;;  %4562 = vmatmul.msk.bf16.gmra.mxu2 %vm362_vm1, %v4901_v25  ;;  %4785 = vmatmul.msk.bf16.gmra.mxu0 %vm362_vm1, %v4932_v26  ;;  %v1177_v37 = vld [vmem:[#allocation2 + $0xc0] sm:$0xff]  ;;  %v4919_v33 = vld [vmem:[%s6359_s1 + $0x3b0] sm:$0xff] }
 0x1e7   : > { %886 = vst.msk [vmem:[#allocation2 + $0xc8] sm:$0xff] %vm504_vm2, %v854_v32  ;;  %v4888_v32 = vld [vmem:[%s6359_s1 + $0x2b8] sm:$0xff] }
 0x1e8   : > { %1950 = vst.msk [vmem:[#allocation2 + $0xa8] sm:$0xff] %vm504_vm2, %v1918_v35 }
 0x1e9   : > { %v1133_v36 = vpop.f32.mrf.mxu2  ;;  %v1486_v38 = vpop.f32.mrf.mxu3 }
 0x1ea   : > { %v1209_v39 = vadd.f32 %v1177_v37, %v1133_v36  ;;  %v827_v36 = vld [vmem:[#allocation2 + $0xf0] sm:$0xff] }
 0x1eb   : > { %v1532_v42 = vld [vmem:[#allocation2 + $0xb8] sm:$0xff]  ;;  %v782_v43 = vpop.f32.mrf.mxu1  ;;  %v1842_v45 = vpop.f32.mrf.mxu0 }
 0x1ec   : > { %1241 = vst.msk [vmem:[#allocation2 + $0xc0] sm:$0xff] %vm504_vm2, %v1209_v39  ;;  %v1564_v46 = vadd.f32 %v1532_v42, %v1486_v38  ;;  %v855_v47 = vadd.f32 %v823_v44, %v782_v43 }
 0x1ed   : > { %v1887_v48 = vld [vmem:[#allocation2 + $0xb0] sm:$0xff] }
 0x1ee   : > { %v1919_v49 = vadd.f32 %v1887_v48, %v1840_v30  ;;  %1596 = vst.msk [vmem:[#allocation2 + $0xb8] sm:$0xff] %vm504_vm2, %v1564_v46  ;;  %4451 = vmatmul.msk.bf16.gmra.mxu1 %vm362_vm1, %v4886_v40  ;;  %4674 = vmatmul.msk.bf16.gmra.mxu3 %vm362_vm1, %v4917_v41  ;;  %v1178_v51 = vld [vmem:[#allocation2 + $0xc8] sm:$0xff]  ;;  %v4904_v46 = vld [vmem:[%s6359_s1 + $0x338] sm:$0xff] }
 0x1ef   : > { %887 = vst.msk [vmem:[#allocation2 + $0xd0] sm:$0xff] %vm504_vm2, %v855_v47  ;;  %v4935_v47 = vld [vmem:[%s6359_s1 + $0x430] sm:$0xff] }
 0x1f0   : > { %1951 = vst.msk [vmem:[#allocation2 + $0xb0] sm:$0xff] %vm504_vm2, %v1919_v49 }
 0x1f1   : > { %v1135_v50 = vpop.f32.mrf.mxu2  ;;  %v1489_v52 = vpop.f32.mrf.mxu3 }
 0x1f2   : > { %v1210_v53 = vadd.f32 %v1178_v51, %v1135_v50  ;;  %v828_v50 = vld [vmem:[#allocation2 + $0xf8] sm:$0xff] }
 0x1f3   : > { %v1533_v56 = vld [vmem:[#allocation2 + $0xc0] sm:$0xff]  ;;  %v784_v57 = vpop.f32.mrf.mxu1  ;;  %v1845_v59 = vpop.f32.mrf.mxu0 }
 0x1f4   : > { %1242 = vst.msk [vmem:[#allocation2 + $0xc8] sm:$0xff] %vm504_vm2, %v1210_v53  ;;  %v1565_v60 = vadd.f32 %v1533_v56, %v1489_v52  ;;  %v856_v61 = vadd.f32 %v824_v58, %v784_v57 }
 0x1f5   : > { %v1888_v62 = vld [vmem:[#allocation2 + $0xb8] sm:$0xff] }
 0x1f6   : > { %v1920_v63 = vadd.f32 %v1888_v62, %v1842_v45  ;;  %1597 = vst.msk [vmem:[#allocation2 + $0xc0] sm:$0xff] %vm504_vm2, %v1565_v60  ;;  %4563 = vmatmul.msk.bf16.gmra.mxu2 %vm362_vm1, %v4902_v54  ;;  %4786 = vmatmul.msk.bf16.gmra.mxu0 %vm362_vm1, %v4933_v55  ;;  %v1179_v1 = vld [vmem:[#allocation2 + $0xd0] sm:$0xff]  ;;  %v4889_v60 = vld [vmem:[%s6359_s1 + $0x2c0] sm:$0xff] }
 0x1f7   : > { %888 = vst.msk [vmem:[#allocation2 + $0xd8] sm:$0xff] %vm504_vm2, %v856_v61  ;;  %v4920_v61 = vld [vmem:[%s6359_s1 + $0x3b8] sm:$0xff] }
 0x1f8   : > { %1952 = vst.msk [vmem:[#allocation2 + $0xb8] sm:$0xff] %vm504_vm2, %v1920_v63 }
 0x1f9   : > { %v1138_v0 = vpop.f32.mrf.mxu2  ;;  %v1491_v2 = vpop.f32.mrf.mxu3 }
 0x1fa   : > { %v1211_v3 = vadd.f32 %v1179_v1, %v1138_v0  ;;  %v2221_v0 = vld [vmem:[#allocation2] sm:$0xff] }
 0x1fb   : > { %v1534_v6 = vld [vmem:[#allocation2 + $0xc8] sm:$0xff]  ;;  %v787_v7 = vpop.f32.mrf.mxu1  ;;  %v1847_v9 = vpop.f32.mrf.mxu0 }
 0x1fc   : > { %1243 = vst.msk [vmem:[#allocation2 + $0xd0] sm:$0xff] %vm504_vm2, %v1211_v3  ;;  %v1566_v10 = vadd.f32 %v1534_v6, %v1491_v2  ;;  %v857_v11 = vadd.f32 %v825_v8, %v787_v7 }
 0x1fd   : > { %v1889_v12 = vld [vmem:[#allocation2 + $0xc0] sm:$0xff] }
 0x1fe   : > { %v1921_v13 = vadd.f32 %v1889_v12, %v1845_v59  ;;  %1598 = vst.msk [vmem:[#allocation2 + $0xc8] sm:$0xff] %vm504_vm2, %v1566_v10  ;;  %4452 = vmatmul.msk.bf16.gmra.mxu1 %vm362_vm1, %v4887_v4  ;;  %4675 = vmatmul.msk.bf16.gmra.mxu3 %vm362_vm1, %v4918_v5  ;;  %v1180_v15 = vld [vmem:[#allocation2 + $0xd8] sm:$0xff] }
 0x1ff   : > { %889 = vst.msk [vmem:[#allocation2 + $0xe0] sm:$0xff] %vm504_vm2, %v857_v11  ;;  %v4905_v10 = vld [vmem:[%s6359_s1 + $0x340] sm:$0xff]  ;;  %v4936_v11 = vld [vmem:[%s6359_s1 + $0x438] sm:$0xff] }
 0x200   : > { %1953 = vst.msk [vmem:[#allocation2 + $0xc0] sm:$0xff] %vm504_vm2, %v1921_v13 }
 0x201   : > { %v1140_v14 = vpop.f32.mrf.mxu2  ;;  %v1494_v16 = vpop.f32.mrf.mxu3 }
 0x202   : > { %v1212_v17 = vadd.f32 %v1180_v15, %v1140_v14  ;;  %v2222_v14 = vld [vmem:[#allocation2 + $0x8] sm:$0xff] }
 0x203   : > { %v1535_v20 = vld [vmem:[#allocation2 + $0xd0] sm:$0xff]  ;;  %v789_v21 = vpop.f32.mrf.mxu1  ;;  %v1850_v23 = vpop.f32.mrf.mxu0 }
 0x204   : > { %1244 = vst.msk [vmem:[#allocation2 + $0xd8] sm:$0xff] %vm504_vm2, %v1212_v17  ;;  %v1567_v24 = vadd.f32 %v1535_v20, %v1494_v16  ;;  %v858_v25 = vadd.f32 %v826_v22, %v789_v21 }
 0x205   : > { %v1890_v26 = vld [vmem:[#allocation2 + $0xc8] sm:$0xff] }
 0x206   : > { %v1922_v27 = vadd.f32 %v1890_v26, %v1847_v9  ;;  %1599 = vst.msk [vmem:[#allocation2 + $0xd0] sm:$0xff] %vm504_vm2, %v1567_v24  ;;  %4564 = vmatmul.msk.bf16.gmra.mxu2 %vm362_vm1, %v4903_v18  ;;  %4787 = vmatmul.msk.bf16.gmra.mxu0 %vm362_vm1, %v4934_v19  ;;  %v1181_v29 = vld [vmem:[#allocation2 + $0xe0] sm:$0xff] }
 0x207   : > { %890 = vst.msk [vmem:[#allocation2 + $0xe8] sm:$0xff] %vm504_vm2, %v858_v25  ;;  %v4890_v24 = vld [vmem:[%s6359_s1 + $0x2c8] sm:$0xff]  ;;  %v4921_v25 = vld [vmem:[%s6359_s1 + $0x3c0] sm:$0xff] }
 0x208   : > { %1954 = vst.msk [vmem:[#allocation2 + $0xc8] sm:$0xff] %vm504_vm2, %v1922_v27 }
 0x209   : > { %v1143_v28 = vpop.f32.mrf.mxu2  ;;  %v1496_v30 = vpop.f32.mrf.mxu3 }
 0x20a   : > { %v1213_v31 = vadd.f32 %v1181_v29, %v1143_v28  ;;  %v2223_v28 = vld [vmem:[#allocation2 + $0x10] sm:$0xff] }
 0x20b   : > { %v1536_v34 = vld [vmem:[#allocation2 + $0xd8] sm:$0xff]  ;;  %v792_v35 = vpop.f32.mrf.mxu1  ;;  %v1852_v37 = vpop.f32.mrf.mxu0 }
 0x20c   : > { %1245 = vst.msk [vmem:[#allocation2 + $0xe0] sm:$0xff] %vm504_vm2, %v1213_v31  ;;  %v1568_v38 = vadd.f32 %v1536_v34, %v1496_v30  ;;  %v859_v39 = vadd.f32 %v827_v36, %v792_v35 }
 0x20d   : > { %v1891_v40 = vld [vmem:[#allocation2 + $0xd0] sm:$0xff] }
 0x20e   : > { %v1923_v41 = vadd.f32 %v1891_v40, %v1850_v23  ;;  %1600 = vst.msk [vmem:[#allocation2 + $0xd8] sm:$0xff] %vm504_vm2, %v1568_v38  ;;  %4453 = vmatmul.msk.bf16.gmra.mxu1 %vm362_vm1, %v4888_v32  ;;  %4676 = vmatmul.msk.bf16.gmra.mxu3 %vm362_vm1, %v4919_v33  ;;  %v1182_v43 = vld [vmem:[#allocation2 + $0xe8] sm:$0xff]  ;;  %v4906_v38 = vld [vmem:[%s6359_s1 + $0x348] sm:$0xff] }
 0x20f   : > { %891 = vst.msk [vmem:[#allocation2 + $0xf0] sm:$0xff] %vm504_vm2, %v859_v39  ;;  %v4937_v39 = vld [vmem:[%s6359_s1 + $0x440] sm:$0xff] }
 0x210   : > { %1955 = vst.msk [vmem:[#allocation2 + $0xd0] sm:$0xff] %vm504_vm2, %v1923_v41 }
 0x211   : > { %v1145_v42 = vpop.f32.mrf.mxu2  ;;  %v1499_v44 = vpop.f32.mrf.mxu3 }
 0x212   : > { %v1214_v45 = vadd.f32 %v1182_v43, %v1145_v42  ;;  %v2224_v42 = vld [vmem:[#allocation2 + $0x18] sm:$0xff] }
 0x213   : > { %v1537_v48 = vld [vmem:[#allocation2 + $0xe0] sm:$0xff]  ;;  %v794_v49 = vpop.f32.mrf.mxu1  ;;  %v1855_v51 = vpop.f32.mrf.mxu0 }
 0x214   : > { %1246 = vst.msk [vmem:[#allocation2 + $0xe8] sm:$0xff] %vm504_vm2, %v1214_v45  ;;  %v1569_v52 = vadd.f32 %v1537_v48, %v1499_v44  ;;  %v860_v53 = vadd.f32 %v828_v50, %v794_v49 }
 0x215   : > { %v1892_v54 = vld [vmem:[#allocation2 + $0xd8] sm:$0xff] }
 0x216   : > { %v1924_v55 = vadd.f32 %v1892_v54, %v1852_v37  ;;  %1601 = vst.msk [vmem:[#allocation2 + $0xe0] sm:$0xff] %vm504_vm2, %v1569_v52  ;;  %4565 = vmatmul.msk.bf16.gmra.mxu2 %vm362_vm1, %v4904_v46  ;;  %4788 = vmatmul.msk.bf16.gmra.mxu0 %vm362_vm1, %v4935_v47  ;;  %v1183_v57 = vld [vmem:[#allocation2 + $0xf0] sm:$0xff]  ;;  %v4891_v52 = vld [vmem:[%s6359_s1 + $0x2d0] sm:$0xff] }
 0x217   : > { %892 = vst.msk [vmem:[#allocation2 + $0xf8] sm:$0xff] %vm504_vm2, %v860_v53  ;;  %v4922_v53 = vld [vmem:[%s6359_s1 + $0x3c8] sm:$0xff] }
 0x218   : > { %1956 = vst.msk [vmem:[#allocation2 + $0xd8] sm:$0xff] %vm504_vm2, %v1924_v55 }
 0x219   : > { %v1148_v56 = vpop.f32.mrf.mxu2  ;;  %v1501_v58 = vpop.f32.mrf.mxu3 }
 0x21a   : > { %v1215_v59 = vadd.f32 %v1183_v57, %v1148_v56  ;;  %v2225_v56 = vld [vmem:[#allocation2 + $0x20] sm:$0xff] }
 0x21b   : > { %v1538_v62 = vld [vmem:[#allocation2 + $0xe8] sm:$0xff]  ;;  %v2141_v63 = vpop.f32.mrf.mxu1  ;;  %v1857_v1 = vpop.f32.mrf.mxu0 }
 0x21c   : > { %1247 = vst.msk [vmem:[#allocation2 + $0xf0] sm:$0xff] %vm504_vm2, %v1215_v59  ;;  %v1570_v2 = vadd.f32 %v1538_v62, %v1501_v58  ;;  %v2253_v3 = vadd.f32 %v2221_v0, %v2141_v63 }
 0x21d   : > { %v1893_v4 = vld [vmem:[#allocation2 + $0xe0] sm:$0xff] }
 0x21e   : > { %v1925_v5 = vadd.f32 %v1893_v4, %v1855_v51  ;;  %1602 = vst.msk [vmem:[#allocation2 + $0xe8] sm:$0xff] %vm504_vm2, %v1570_v2  ;;  %4454 = vmatmul.msk.bf16.gmra.mxu1 %vm362_vm1, %v4889_v60  ;;  %4677 = vmatmul.msk.bf16.gmra.mxu3 %vm362_vm1, %v4920_v61  ;;  %v1184_v7 = vld [vmem:[#allocation2 + $0xf8] sm:$0xff]  ;;  %v4907_v2 = vld [vmem:[%s6359_s1 + $0x350] sm:$0xff] }
 0x21f   : > { %2285 = vst.msk [vmem:[#allocation2] sm:$0xff] %vm504_vm2, %v2253_v3  ;;  %v4938_v3 = vld [vmem:[%s6359_s1 + $0x448] sm:$0xff] }
 0x220   : > { %1957 = vst.msk [vmem:[#allocation2 + $0xe0] sm:$0xff] %vm504_vm2, %v1925_v5 }
 0x221   : > { %v1150_v6 = vpop.f32.mrf.mxu2  ;;  %v1504_v8 = vpop.f32.mrf.mxu3 }
 0x222   : > { %v1216_v9 = vadd.f32 %v1184_v7, %v1150_v6  ;;  %v2226_v6 = vld [vmem:[#allocation2 + $0x28] sm:$0xff] }
 0x223   : > { %v1539_v12 = vld [vmem:[#allocation2 + $0xf0] sm:$0xff]  ;;  %v2143_v13 = vpop.f32.mrf.mxu1  ;;  %v1860_v15 = vpop.f32.mrf.mxu0 }
 0x224   : > { %1248 = vst.msk [vmem:[#allocation2 + $0xf8] sm:$0xff] %vm504_vm2, %v1216_v9  ;;  %v1571_v16 = vadd.f32 %v1539_v12, %v1504_v8  ;;  %v2254_v17 = vadd.f32 %v2222_v14, %v2143_v13 }
 0x225   : > { %v1894_v18 = vld [vmem:[#allocation2 + $0xe8] sm:$0xff] }
 0x226   : > { %v1926_v19 = vadd.f32 %v1894_v18, %v1857_v1  ;;  %1603 = vst.msk [vmem:[#allocation2 + $0xf0] sm:$0xff] %vm504_vm2, %v1571_v16  ;;  %4566 = vmatmul.msk.bf16.gmra.mxu2 %vm362_vm1, %v4905_v10  ;;  %4789 = vmatmul.msk.bf16.gmra.mxu0 %vm362_vm1, %v4936_v11  ;;  %v2577_v22 = vld [vmem:[#allocation2] sm:$0xff]  ;;  %v4892_v16 = vld [vmem:[%s6359_s1 + $0x2d8] sm:$0xff] }
 0x227   : > { %2286 = vst.msk [vmem:[#allocation2 + $0x8] sm:$0xff] %vm504_vm2, %v2254_v17  ;;  %v4923_v17 = vld [vmem:[%s6359_s1 + $0x3d0] sm:$0xff] }
 0x228   : > { %1958 = vst.msk [vmem:[#allocation2 + $0xe8] sm:$0xff] %vm504_vm2, %v1926_v19 }
 0x229   : > { %v1506_v20 = vpop.f32.mrf.mxu3  ;;  %v2497_v21 = vpop.f32.mrf.mxu2 }
 0x22a   : > { %v2609_v23 = vadd.f32 %v2577_v22, %v2497_v21 }
 0x22b   : > { %v1540_v26 = vld [vmem:[#allocation2 + $0xf8] sm:$0xff]  ;;  %v2146_v27 = vpop.f32.mrf.mxu1  ;;  %v1862_v29 = vpop.f32.mrf.mxu0 }
 0x22c   : > { %v1572_v30 = vadd.f32 %v1540_v26, %v1506_v20  ;;  %2641 = vst.msk [vmem:[#allocation2] sm:$0xff] %vm504_vm2, %v2609_v23  ;;  %v2255_v31 = vadd.f32 %v2223_v28, %v2146_v27  ;;  %v2227_v20 = vld [vmem:[#allocation2 + $0x30] sm:$0xff] }
 0x22d   : > { %v1895_v32 = vld [vmem:[#allocation2 + $0xf0] sm:$0xff] }
 0x22e   : > { %v1927_v33 = vadd.f32 %v1895_v32, %v1860_v15  ;;  %1604 = vst.msk [vmem:[#allocation2 + $0xf8] sm:$0xff] %vm504_vm2, %v1572_v30  ;;  %4455 = vmatmul.msk.bf16.gmra.mxu1 %vm362_vm1, %v4890_v24  ;;  %4678 = vmatmul.msk.bf16.gmra.mxu3 %vm362_vm1, %v4921_v25  ;;  %v2578_v35 = vld [vmem:[#allocation2 + $0x8] sm:$0xff]  ;;  %v4908_v30 = vld [vmem:[%s6359_s1 + $0x358] sm:$0xff] }
 0x22f   : > { %2287 = vst.msk [vmem:[#allocation2 + $0x10] sm:$0xff] %vm504_vm2, %v2255_v31  ;;  %v4939_v31 = vld [vmem:[%s6359_s1 + $0x450] sm:$0xff] }
 0x230   : > { %1959 = vst.msk [vmem:[#allocation2 + $0xf0] sm:$0xff] %vm504_vm2, %v1927_v33 }
 0x231   : > { %v2499_v34 = vpop.f32.mrf.mxu2  ;;  %v2853_v36 = vpop.f32.mrf.mxu3 }
 0x232   : > { %v2610_v37 = vadd.f32 %v2578_v35, %v2499_v34  ;;  %v2228_v34 = vld [vmem:[#allocation2 + $0x38] sm:$0xff] }
 0x233   : > { %v2933_v40 = vld [vmem:[#allocation2] sm:$0xff]  ;;  %v2148_v41 = vpop.f32.mrf.mxu1  ;;  %v3209_v43 = vpop.f32.mrf.mxu0 }
 0x234   : > { %2642 = vst.msk [vmem:[#allocation2 + $0x8] sm:$0xff] %vm504_vm2, %v2610_v37  ;;  %v2965_v44 = vadd.f32 %v2933_v40, %v2853_v36  ;;  %v2256_v45 = vadd.f32 %v2224_v42, %v2148_v41 }
 0x235   : > { %v1896_v46 = vld [vmem:[#allocation2 + $0xf8] sm:$0xff] }
 0x236   : > { %v1928_v47 = vadd.f32 %v1896_v46, %v1862_v29  ;;  %2997 = vst.msk [vmem:[#allocation2] sm:$0xff] %vm504_vm2, %v2965_v44  ;;  %4567 = vmatmul.msk.bf16.gmra.mxu2 %vm362_vm1, %v4906_v38  ;;  %4790 = vmatmul.msk.bf16.gmra.mxu0 %vm362_vm1, %v4937_v39  ;;  %v2579_v49 = vld [vmem:[#allocation2 + $0x10] sm:$0xff]  ;;  %v4893_v44 = vld [vmem:[%s6359_s1 + $0x2e0] sm:$0xff] }
 0x237   : > { %2288 = vst.msk [vmem:[#allocation2 + $0x18] sm:$0xff] %vm504_vm2, %v2256_v45  ;;  %v4924_v45 = vld [vmem:[%s6359_s1 + $0x3d8] sm:$0xff] }
 0x238   : > { %1960 = vst.msk [vmem:[#allocation2 + $0xf8] sm:$0xff] %vm504_vm2, %v1928_v47 }
 0x239   : > { %v2502_v48 = vpop.f32.mrf.mxu2  ;;  %v2855_v50 = vpop.f32.mrf.mxu3 }
 0x23a   : > { %v2611_v51 = vadd.f32 %v2579_v49, %v2502_v48  ;;  %v2229_v48 = vld [vmem:[#allocation2 + $0x40] sm:$0xff] }
 0x23b   : > { %v2934_v54 = vld [vmem:[#allocation2 + $0x8] sm:$0xff]  ;;  %v2151_v55 = vpop.f32.mrf.mxu1  ;;  %v3211_v57 = vpop.f32.mrf.mxu0 }
 0x23c   : > { %2643 = vst.msk [vmem:[#allocation2 + $0x10] sm:$0xff] %vm504_vm2, %v2611_v51  ;;  %v2966_v58 = vadd.f32 %v2934_v54, %v2855_v50  ;;  %v2257_v59 = vadd.f32 %v2225_v56, %v2151_v55 }
 0x23d   : > { %v3289_v60 = vld [vmem:[#allocation2] sm:$0xff] }
 0x23e   : > { %v3321_v61 = vadd.f32 %v3289_v60, %v3209_v43  ;;  %2998 = vst.msk [vmem:[#allocation2 + $0x8] sm:$0xff] %vm504_vm2, %v2966_v58  ;;  %4456 = vmatmul.msk.bf16.gmra.mxu1 %vm362_vm1, %v4891_v52  ;;  %4679 = vmatmul.msk.bf16.gmra.mxu3 %vm362_vm1, %v4922_v53  ;;  %v2580_v63 = vld [vmem:[#allocation2 + $0x18] sm:$0xff] }
 0x23f   : > { %2289 = vst.msk [vmem:[#allocation2 + $0x20] sm:$0xff] %vm504_vm2, %v2257_v59  ;;  %v4909_v58 = vld [vmem:[%s6359_s1 + $0x360] sm:$0xff]  ;;  %v4940_v59 = vld [vmem:[%s6359_s1 + $0x458] sm:$0xff] }
 0x240   : > { %3353 = vst.msk [vmem:[#allocation2] sm:$0xff] %vm504_vm2, %v3321_v61 }
 0x241   : > { %v2504_v62 = vpop.f32.mrf.mxu2  ;;  %v2858_v0 = vpop.f32.mrf.mxu3 }
 0x242   : > { %v2612_v1 = vadd.f32 %v2580_v63, %v2504_v62  ;;  %v2230_v62 = vld [vmem:[#allocation2 + $0x48] sm:$0xff] }
 0x243   : > { %v2935_v4 = vld [vmem:[#allocation2 + $0x10] sm:$0xff]  ;;  %v2153_v5 = vpop.f32.mrf.mxu1  ;;  %v3214_v7 = vpop.f32.mrf.mxu0 }
 0x244   : > { %2644 = vst.msk [vmem:[#allocation2 + $0x18] sm:$0xff] %vm504_vm2, %v2612_v1  ;;  %v2967_v8 = vadd.f32 %v2935_v4, %v2858_v0  ;;  %v2258_v9 = vadd.f32 %v2226_v6, %v2153_v5 }
 0x245   : > { %v3290_v10 = vld [vmem:[#allocation2 + $0x8] sm:$0xff] }
 0x246   : > { %v3322_v11 = vadd.f32 %v3290_v10, %v3211_v57  ;;  %2999 = vst.msk [vmem:[#allocation2 + $0x10] sm:$0xff] %vm504_vm2, %v2967_v8  ;;  %4568 = vmatmul.msk.bf16.gmra.mxu2 %vm362_vm1, %v4907_v2  ;;  %4791 = vmatmul.msk.bf16.gmra.mxu0 %vm362_vm1, %v4938_v3  ;;  %v2581_v13 = vld [vmem:[#allocation2 + $0x20] sm:$0xff] }
 0x247   : > { %2290 = vst.msk [vmem:[#allocation2 + $0x28] sm:$0xff] %vm504_vm2, %v2258_v9  ;;  %v4894_v8 = vld [vmem:[%s6359_s1 + $0x2e8] sm:$0xff]  ;;  %v4925_v9 = vld [vmem:[%s6359_s1 + $0x3e0] sm:$0xff] }
 0x248   : > { %3354 = vst.msk [vmem:[#allocation2 + $0x8] sm:$0xff] %vm504_vm2, %v3322_v11 }
 0x249   : > { %v2507_v12 = vpop.f32.mrf.mxu2  ;;  %v2860_v14 = vpop.f32.mrf.mxu3 }
 0x24a   : > { %v2613_v15 = vadd.f32 %v2581_v13, %v2507_v12  ;;  %v2231_v12 = vld [vmem:[#allocation2 + $0x50] sm:$0xff] }
 0x24b   : > { %v2936_v18 = vld [vmem:[#allocation2 + $0x18] sm:$0xff]  ;;  %v2156_v19 = vpop.f32.mrf.mxu1  ;;  %v3216_v21 = vpop.f32.mrf.mxu0 }
 0x24c   : > { %2645 = vst.msk [vmem:[#allocation2 + $0x20] sm:$0xff] %vm504_vm2, %v2613_v15  ;;  %v2968_v22 = vadd.f32 %v2936_v18, %v2860_v14  ;;  %v2259_v23 = vadd.f32 %v2227_v20, %v2156_v19  ;;  %v6083_v14 = vpop.permute.xlu2 %3601  ;;  %v6090_v19 = vpop.permute.xlu1 %3591 }
 0x24d   : > { %v3291_v24 = vld [vmem:[#allocation2 + $0x10] sm:$0xff] }
 0x24e   : > { %v3323_v25 = vadd.f32 %v3291_v24, %v3214_v7  ;;  %3000 = vst.msk [vmem:[#allocation2 + $0x18] sm:$0xff] %vm504_vm2, %v2968_v22  ;;  %4457 = vmatmul.msk.bf16.gmra.mxu1 %vm362_vm1, %v4892_v16  ;;  %4680 = vmatmul.msk.bf16.gmra.mxu3 %vm362_vm1, %v4923_v17  ;;  %v2582_v27 = vld [vmem:[#allocation2 + $0x28] sm:$0xff]  ;;  %v4910_v24 = vld [vmem:[%s6359_s1 + $0x368] sm:$0xff] }
 0x24f   : > { %2291 = vst.msk [vmem:[#allocation2 + $0x30] sm:$0xff] %vm504_vm2, %v2259_v23 }
 0x250   : > { %3355 = vst.msk [vmem:[#allocation2 + $0x10] sm:$0xff] %vm504_vm2, %v3323_v25  ;;  %v4941_v25 = vld [vmem:[%s6359_s1 + $0x460] sm:$0xff] }
 0x251   : > { %v2509_v26 = vpop.f32.mrf.mxu2  ;;  %v2863_v28 = vpop.f32.mrf.mxu3 }
 0x252   : > { %v2614_v29 = vadd.f32 %v2582_v27, %v2509_v26 }
 0x253   : > { %v2937_v32 = vld [vmem:[#allocation2 + $0x20] sm:$0xff]  ;;  %v2158_v33 = vpop.f32.mrf.mxu1  ;;  %v3219_v35 = vpop.f32.mrf.mxu0 }
 0x254   : > { %2646 = vst.msk [vmem:[#allocation2 + $0x28] sm:$0xff] %vm504_vm2, %v2614_v29  ;;  %v2969_v36 = vadd.f32 %v2937_v32, %v2863_v28  ;;  %v2260_v37 = vadd.f32 %v2228_v34, %v2158_v33  ;;  %v2232_v28 = vld [vmem:[#allocation2 + $0x58] sm:$0xff]  ;;  %v6100_v33 = vpop.permute.xlu2 %3596 }
 0x255   : > { %v3292_v38 = vld [vmem:[#allocation2 + $0x18] sm:$0xff] }
 0x256   : > { %v3324_v39 = vadd.f32 %v3292_v38, %v3216_v21  ;;  %3001 = vst.msk [vmem:[#allocation2 + $0x20] sm:$0xff] %vm504_vm2, %v2969_v36  ;;  %4569 = vmatmul.msk.bf16.gmra.mxu2 %vm362_vm1, %v4908_v30  ;;  %4792 = vmatmul.msk.bf16.gmra.mxu0 %vm362_vm1, %v4939_v31  ;;  %v2583_v41 = vld [vmem:[#allocation2 + $0x30] sm:$0xff]  ;;  %v6107_v38 = vpop.permute.xlu1 %3521 }
 0x257   : > { %2292 = vst.msk [vmem:[#allocation2 + $0x38] sm:$0xff] %vm504_vm2, %v2260_v37 }
 0x258   : > { %3356 = vst.msk [vmem:[#allocation2 + $0x18] sm:$0xff] %vm504_vm2, %v3324_v39 }
 0x259   : > { %v2512_v40 = vpop.f32.mrf.mxu2  ;;  %v2865_v42 = vpop.f32.mrf.mxu3 }
 0x25a   : > { %v2615_v43 = vadd.f32 %v2583_v41, %v2512_v40  ;;  %v4895_v40 = vld [vmem:[%s6359_s1 + $0x2f0] sm:$0xff]  ;;  %v4926_v41 = vld [vmem:[%s6359_s1 + $0x3e8] sm:$0xff] }
 0x25b   : > { %v2938_v46 = vld [vmem:[#allocation2 + $0x28] sm:$0xff]  ;;  %v2161_v47 = vpop.f32.mrf.mxu1  ;;  %v3221_v49 = vpop.f32.mrf.mxu0 }
 0x25c   : > { %2647 = vst.msk [vmem:[#allocation2 + $0x30] sm:$0xff] %vm504_vm2, %v2615_v43  ;;  %v2970_v50 = vadd.f32 %v2938_v46, %v2865_v42  ;;  %v2261_v51 = vadd.f32 %v2229_v48, %v2161_v47  ;;  %v6115_v46 = vpop.permute.xlu0 %3606 }
 0x25d   : > { %v3293_v52 = vld [vmem:[#allocation2 + $0x20] sm:$0xff] }
 0x25e   : > { %v3325_v53 = vadd.f32 %v3293_v52, %v3219_v35  ;;  %3002 = vst.msk [vmem:[#allocation2 + $0x28] sm:$0xff] %vm504_vm2, %v2970_v50  ;;  %4458 = vmatmul.msk.bf16.gmra.mxu1 %vm362_vm1, %v4893_v44  ;;  %4681 = vmatmul.msk.bf16.gmra.mxu3 %vm362_vm1, %v4924_v45  ;;  %v2584_v55 = vld [vmem:[#allocation2 + $0x38] sm:$0xff]  ;;  %v2233_v44 = vld [vmem:[#allocation2 + $0x60] sm:$0xff] }
 0x25f   : > { %2293 = vst.msk [vmem:[#allocation2 + $0x40] sm:$0xff] %vm504_vm2, %v2261_v51  ;;  %v6122_v51 = vpop.permute.xlu2 %3526 }
 0x260   : > { %3357 = vst.msk [vmem:[#allocation2 + $0x20] sm:$0xff] %vm504_vm2, %v3325_v53 }
 0x261   : > { %v2514_v54 = vpop.f32.mrf.mxu2  ;;  %v2868_v56 = vpop.f32.mrf.mxu3 }
 0x262   : > { %v2616_v57 = vadd.f32 %v2584_v55, %v2514_v54 }
 0x263   : > { %v2939_v60 = vld [vmem:[#allocation2 + $0x30] sm:$0xff]  ;;  %v2163_v61 = vpop.f32.mrf.mxu1  ;;  %v3224_v63 = vpop.f32.mrf.mxu0 }
 0x264   : > { %2648 = vst.msk [vmem:[#allocation2 + $0x38] sm:$0xff] %vm504_vm2, %v2616_v57  ;;  %v2971_v0 = vadd.f32 %v2939_v60, %v2868_v56  ;;  %v2262_v1 = vadd.f32 %v2230_v62, %v2163_v61  ;;  %v4911_v56 = vld [vmem:[%s6359_s1 + $0x370] sm:$0xff]  ;;  %v4942_v57 = vld [vmem:[%s6359_s1 + $0x468] sm:$0xff]  ;;  %v6131_v62 = vpop.permute.xlu1 %3586 }
 0x265   : > { %v3294_v2 = vld [vmem:[#allocation2 + $0x28] sm:$0xff] }
 0x266   : > { %v3326_v3 = vadd.f32 %v3294_v2, %v3221_v49  ;;  %3003 = vst.msk [vmem:[#allocation2 + $0x30] sm:$0xff] %vm504_vm2, %v2971_v0  ;;  %4570 = vmatmul.msk.bf16.gmra.mxu2 %vm362_vm1, %v4909_v58  ;;  %4793 = vmatmul.msk.bf16.gmra.mxu0 %vm362_vm1, %v4940_v59  ;;  %v2585_v5 = vld [vmem:[#allocation2 + $0x40] sm:$0xff]  ;;  %v2234_v60 = vld [vmem:[#allocation2 + $0x68] sm:$0xff]  ;;  %v6134_v2 = vpop.permute.xlu0 %3581 }
 0x267   : > { %2294 = vst.msk [vmem:[#allocation2 + $0x48] sm:$0xff] %vm504_vm2, %v2262_v1 }
 0x268   : > { %3358 = vst.msk [vmem:[#allocation2 + $0x28] sm:$0xff] %vm504_vm2, %v3326_v3 }
 0x269   : > { %v2517_v4 = vpop.f32.mrf.mxu2  ;;  %v2870_v6 = vpop.f32.mrf.mxu3 }
 0x26a   : > { %v2617_v7 = vadd.f32 %v2585_v5, %v2517_v4 }
 0x26b   : > { %v2940_v10 = vld [vmem:[#allocation2 + $0x38] sm:$0xff]  ;;  %v2166_v11 = vpop.f32.mrf.mxu1  ;;  %v3226_v13 = vpop.f32.mrf.mxu0 }
 0x26c   : > { %2649 = vst.msk [vmem:[#allocation2 + $0x40] sm:$0xff] %vm504_vm2, %v2617_v7  ;;  %v2972_v15 = vadd.f32 %v2940_v10, %v2870_v6  ;;  %v2263_v16 = vadd.f32 %v2231_v12, %v2166_v11  ;;  %v6141_v7 = vpop.permute.xlu2 %3511  ;;  %v4927_v10 = vld [vmem:[%s6359_s1 + $0x3f0] sm:$0xff] }
 0x26d   : > { %v3295_v17 = vld [vmem:[#allocation2 + $0x30] sm:$0xff] }
 0x26e   : > { %v3327_v18 = vadd.f32 %v3295_v17, %v3224_v63  ;;  %3004 = vst.msk [vmem:[#allocation2 + $0x38] sm:$0xff] %vm504_vm2, %v2972_v15  ;;  %4459 = vmatmul.msk.bf16.gmra.mxu1 %vm362_vm1, %v4894_v8  ;;  %4682 = vmatmul.msk.bf16.gmra.mxu3 %vm362_vm1, %v4925_v9  ;;  %v2586_v21 = vld [vmem:[#allocation2 + $0x48] sm:$0xff]  ;;  %v4896_v9 = vld [vmem:[%s6359_s1 + $0x2f8] sm:$0xff] }
 0x26f   : > { %2295 = vst.msk [vmem:[#allocation2 + $0x50] sm:$0xff] %vm504_vm2, %v2263_v16 }
 0x270   : > { %3359 = vst.msk [vmem:[#allocation2 + $0x30] sm:$0xff] %vm504_vm2, %v3327_v18 }
 0x271   : > { %v2519_v20 = vpop.f32.mrf.mxu2  ;;  %v2873_v22 = vpop.f32.mrf.mxu3 }
 0x272   : > { %v2618_v23 = vadd.f32 %v2586_v21, %v2519_v20  ;;  %v6150_v20 = vpop.permute.xlu1 %3571 }
 0x273   : > { %v2941_v26 = vld [vmem:[#allocation2 + $0x40] sm:$0xff]  ;;  %v2168_v27 = vpop.f32.mrf.mxu1  ;;  %v3229_v29 = vpop.f32.mrf.mxu0 }
 0x274   : > { %2650 = vst.msk [vmem:[#allocation2 + $0x48] sm:$0xff] %vm504_vm2, %v2618_v23  ;;  %v2973_v30 = vadd.f32 %v2941_v26, %v2873_v22  ;;  %v2264_v31 = vadd.f32 %v2232_v28, %v2168_v27  ;;  %v6156_v22 = vpop.permute.xlu0 %3516  ;;  %v4912_v27 = vld [vmem:[%s6359_s1 + $0x378] sm:$0xff]  ;;  %v4943_v28 = vld [vmem:[%s6359_s1 + $0x470] sm:$0xff] }
 0x275   : > { %v3296_v32 = vld [vmem:[#allocation2 + $0x38] sm:$0xff] }
 0x276   : > { %v3328_v34 = vadd.f32 %v3296_v32, %v3226_v13  ;;  %3005 = vst.msk [vmem:[#allocation2 + $0x40] sm:$0xff] %vm504_vm2, %v2973_v30  ;;  %4571 = vmatmul.msk.bf16.gmra.mxu2 %vm362_vm1, %v4910_v24  ;;  %4794 = vmatmul.msk.bf16.gmra.mxu0 %vm362_vm1, %v4941_v25  ;;  %v2587_v36 = vld [vmem:[#allocation2 + $0x50] sm:$0xff] }
 0x277   : > { %2296 = vst.msk [vmem:[#allocation2 + $0x58] sm:$0xff] %vm504_vm2, %v2264_v31  ;;  %v2235_v13 = vld [vmem:[#allocation2 + $0x70] sm:$0xff]  ;;  %v2236_v31 = vld [vmem:[#allocation2 + $0x78] sm:$0xff] }
 0x278   : > { %3360 = vst.msk [vmem:[#allocation2 + $0x38] sm:$0xff] %vm504_vm2, %v3328_v34  ;;  %v6165_v34 = vpop.permute.xlu2 %3576 }
 0x279   : > { %v2522_v35 = vpop.f32.mrf.mxu2  ;;  %v2875_v37 = vpop.f32.mrf.mxu3 }
 0x27a   : > { %v2619_v39 = vadd.f32 %v2587_v36, %v2522_v35 }
 0x27b   : > { %v2942_v42 = vld [vmem:[#allocation2 + $0x48] sm:$0xff]  ;;  %v2171_v43 = vpop.f32.mrf.mxu1  ;;  %v3231_v45 = vpop.f32.mrf.mxu0 }
 0x27c   : > { %2651 = vst.msk [vmem:[#allocation2 + $0x50] sm:$0xff] %vm504_vm2, %v2619_v39  ;;  %v2974_v47 = vadd.f32 %v2942_v42, %v2875_v37  ;;  %v2265_v48 = vadd.f32 %v2233_v44, %v2171_v43  ;;  %v6175_v44 = vpop.permute.xlu0 %3501 }
 0x27d   : > { %v3297_v49 = vld [vmem:[#allocation2 + $0x40] sm:$0xff] }
 0x27e   : > { %v3329_v50 = vadd.f32 %v3297_v49, %v3229_v29  ;;  %3006 = vst.msk [vmem:[#allocation2 + $0x48] sm:$0xff] %vm504_vm2, %v2974_v47  ;;  %4460 = vmatmul.msk.bf16.gmra.mxu1 %vm362_vm1, %v4895_v40  ;;  %4683 = vmatmul.msk.bf16.gmra.mxu3 %vm362_vm1, %v4926_v41  ;;  %v2588_v53 = vld [vmem:[#allocation2 + $0x58] sm:$0xff]  ;;  %v6172_v40 = vpop.permute.xlu1 %3506  ;;  %v4928_v47 = vld [vmem:[%s6359_s1 + $0x3f8] sm:$0xff] }
 0x27f   : > { %2297 = vst.msk [vmem:[#allocation2 + $0x60] sm:$0xff] %vm504_vm2, %v2265_v48 }
 0x280   : > { %3361 = vst.msk [vmem:[#allocation2 + $0x40] sm:$0xff] %vm504_vm2, %v3329_v50  ;;  %v2237_v50 = vld [vmem:[#allocation2 + $0x80] sm:$0xff] }
 0x281   : > { %v2524_v52 = vpop.f32.mrf.mxu2  ;;  %v2878_v54 = vpop.f32.mrf.mxu3 }
 0x282   : > { %v2620_v55 = vadd.f32 %v2588_v53, %v2524_v52 }
 0x283   : > { %v2943_v58 = vld [vmem:[#allocation2 + $0x50] sm:$0xff]  ;;  %v2173_v59 = vpop.f32.mrf.mxu1  ;;  %v3234_v61 = vpop.f32.mrf.mxu0 }
 0x284   : > { %2652 = vst.msk [vmem:[#allocation2 + $0x58] sm:$0xff] %vm504_vm2, %v2620_v55  ;;  %v2975_v63 = vadd.f32 %v2943_v58, %v2878_v54  ;;  %v2266_v0 = vadd.f32 %v2234_v60, %v2173_v59 }
 0x285   : > { %v3298_v1 = vld [vmem:[#allocation2 + $0x48] sm:$0xff] }
 0x286   : > { %v3330_v3 = vadd.f32 %v3298_v1, %v3231_v45  ;;  %3007 = vst.msk [vmem:[#allocation2 + $0x50] sm:$0xff] %vm504_vm2, %v2975_v63  ;;  %4572 = vmatmul.msk.bf16.gmra.mxu2 %vm362_vm1, %v4911_v56  ;;  %4795 = vmatmul.msk.bf16.gmra.mxu0 %vm362_vm1, %v4942_v57  ;;  %v2589_v5 = vld [vmem:[#allocation2 + $0x60] sm:$0xff]  ;;  %v6181_v56 = vpop.permute.xlu2 %3561 }
 0x287   : > { %2298 = vst.msk [vmem:[#allocation2 + $0x68] sm:$0xff] %vm504_vm2, %v2266_v0  ;;  %v4944_v0 = vld [vmem:[%s6359_s1 + $0x478] sm:$0xff] }
 0x288   : > { %3362 = vst.msk [vmem:[#allocation2 + $0x48] sm:$0xff] %vm504_vm2, %v3330_v3 }
 0x289   : > { %v2527_v4 = vpop.f32.mrf.mxu2  ;;  %v2880_v6 = vpop.f32.mrf.mxu3 }
 0x28a   : > { %v2621_v8 = vadd.f32 %v2589_v5, %v2527_v4  ;;  %v2238_v4 = vld [vmem:[#allocation2 + $0x88] sm:$0xff] }
 0x28b   : > { %v2944_v11 = vld [vmem:[#allocation2 + $0x58] sm:$0xff]  ;;  %v2176_v12 = vpop.f32.mrf.mxu1  ;;  %v3236_v15 = vpop.f32.mrf.mxu0 }
 0x28c   : > { %2653 = vst.msk [vmem:[#allocation2 + $0x60] sm:$0xff] %vm504_vm2, %v2621_v8  ;;  %v2976_v16 = vadd.f32 %v2944_v11, %v2880_v6  ;;  %v2267_v17 = vadd.f32 %v2235_v13, %v2176_v12  ;;  %v6192_v6 = vpop.permute.xlu0 %3566 }
 0x28d   : > { %v3299_v18 = vld [vmem:[#allocation2 + $0x50] sm:$0xff] }
 0x28e   : > { %v3331_v21 = vadd.f32 %v3299_v18, %v3234_v61  ;;  %3008 = vst.msk [vmem:[#allocation2 + $0x58] sm:$0xff] %vm504_vm2, %v2976_v16  ;;  %4461 = vmatmul.msk.bf16.gmra.mxu1 %vm362_vm1, %v4896_v9  ;;  %4684 = vmatmul.msk.bf16.gmra.mxu3 %vm362_vm1, %v4927_v10  ;;  %v2590_v24 = vld [vmem:[#allocation2 + $0x68] sm:$0xff]  ;;  %v6187_v61 = vpop.permute.xlu1 %3491  ;;  %v6198_v12 = vpop.permute.xlu2 %3496 }
 0x28f   : > { %2299 = vst.msk [vmem:[#allocation2 + $0x70] sm:$0xff] %vm504_vm2, %v2267_v17 }
 0x290   : > { %3363 = vst.msk [vmem:[#allocation2 + $0x50] sm:$0xff] %vm504_vm2, %v3331_v21 }
 0x291   : > { %v2529_v23 = vpop.f32.mrf.mxu2  ;;  %v2883_v25 = vpop.f32.mrf.mxu3 }
 0x292   : > { %v2622_v26 = vadd.f32 %v2590_v24, %v2529_v23  ;;  %v2239_v23 = vld [vmem:[#allocation2 + $0x90] sm:$0xff] }
 0x293   : > { %v2945_v29 = vld [vmem:[#allocation2 + $0x60] sm:$0xff]  ;;  %v2178_v30 = vpop.f32.mrf.mxu1  ;;  %v3239_v32 = vpop.f32.mrf.mxu0 }
 0x294   : > { %2654 = vst.msk [vmem:[#allocation2 + $0x68] sm:$0xff] %vm504_vm2, %v2622_v26  ;;  %v2977_v35 = vadd.f32 %v2945_v29, %v2883_v25  ;;  %v2268_v36 = vadd.f32 %v2236_v31, %v2178_v30  ;;  %v6204_v29 = vpop.permute.xlu0 %3551 }
 0x295   : > { %v3300_v37 = vld [vmem:[#allocation2 + $0x58] sm:$0xff] }
 0x296   : > { %v3332_v39 = vadd.f32 %v3300_v37, %v3236_v15  ;;  %3009 = vst.msk [vmem:[#allocation2 + $0x60] sm:$0xff] %vm504_vm2, %v2977_v35  ;;  %4573 = vmatmul.msk.bf16.gmra.mxu2 %vm362_vm1, %v4912_v27  ;;  %4796 = vmatmul.msk.bf16.gmra.mxu0 %vm362_vm1, %v4943_v28  ;;  %v2591_v42 = vld [vmem:[#allocation2 + $0x70] sm:$0xff]  ;;  %v6201_v25 = vpop.permute.xlu1 %3556 }
 0x297   : > { %2300 = vst.msk [vmem:[#allocation2 + $0x78] sm:$0xff] %vm504_vm2, %v2268_v36  ;;  %v6209_v36 = vpop.permute.xlu2 %3481 }
 0x298   : > { %3364 = vst.msk [vmem:[#allocation2 + $0x58] sm:$0xff] %vm504_vm2, %v3332_v39 }
 0x299   : > { %v2532_v41 = vpop.f32.mrf.mxu2  ;;  %v2885_v43 = vpop.f32.mrf.mxu3 }
 0x29a   : > { %v2623_v45 = vadd.f32 %v2591_v42, %v2532_v41  ;;  %v2240_v42 = vld [vmem:[#allocation2 + $0x98] sm:$0xff] }
 0x29b   : > { %v2946_v48 = vld [vmem:[#allocation2 + $0x68] sm:$0xff]  ;;  %v2181_v49 = vpop.f32.mrf.mxu1  ;;  %v3241_v52 = vpop.f32.mrf.mxu0 }
 0x29c   : > { %2655 = vst.msk [vmem:[#allocation2 + $0x70] sm:$0xff] %vm504_vm2, %v2623_v45  ;;  %v2978_v53 = vadd.f32 %v2946_v48, %v2885_v43  ;;  %v2269_v54 = vadd.f32 %v2237_v50, %v2181_v49 }
 0x29d   : > { %v3301_v55 = vld [vmem:[#allocation2 + $0x60] sm:$0xff] }
 0x29e   : > { %v3333_v57 = vadd.f32 %v3301_v55, %v3239_v32  ;;  %3010 = vst.msk [vmem:[#allocation2 + $0x68] sm:$0xff] %vm504_vm2, %v2978_v53  ;;  %4685 = vmatmul.msk.bf16.gmra.mxu3 %vm362_vm1, %v4928_v47  ;;  %v2592_v59 = vld [vmem:[#allocation2 + $0x78] sm:$0xff]  ;;  %v6212_v49 = vpop.permute.xlu1 %3541 }
 0x29f   : > { %2301 = vst.msk [vmem:[#allocation2 + $0x80] sm:$0xff] %vm504_vm2, %v2269_v54 }
 0x2a0   : > { %3365 = vst.msk [vmem:[#allocation2 + $0x60] sm:$0xff] %vm504_vm2, %v3333_v57 }
 0x2a1   : > { %v2534_v58 = vpop.f32.mrf.mxu2  ;;  %v2888_v60 = vpop.f32.mrf.mxu3 }
 0x2a2   : > { %v2624_v63 = vadd.f32 %v2592_v59, %v2534_v58 }
 0x2a3   : > { %v2947_v1 = vld [vmem:[#allocation2 + $0x70] sm:$0xff]  ;;  %v2183_v3 = vpop.f32.mrf.mxu1  ;;  %v3244_v5 = vpop.f32.mrf.mxu0 }
 0x2a4   : > { %2656 = vst.msk [vmem:[#allocation2 + $0x78] sm:$0xff] %vm504_vm2, %v2624_v63  ;;  %v2979_v8 = vadd.f32 %v2947_v1, %v2888_v60  ;;  %v2270_v9 = vadd.f32 %v2238_v4, %v2183_v3  ;;  %v2241_v60 = vld [vmem:[#allocation2 + $0xa0] sm:$0xff]  ;;  %v6219_v1 = vpop.permute.xlu2 %3546 }
 0x2a5   : > { %v3302_v10 = vld [vmem:[#allocation2 + $0x68] sm:$0xff] }
 0x2a6   : > { %v3334_v11 = vadd.f32 %v3302_v10, %v3241_v52  ;;  %3011 = vst.msk [vmem:[#allocation2 + $0x70] sm:$0xff] %vm504_vm2, %v2979_v8  ;;  %4797 = vmatmul.msk.bf16.gmra.mxu0 %vm362_vm1, %v4944_v0  ;;  %v2593_v15 = vld [vmem:[#allocation2 + $0x80] sm:$0xff]  ;;  %v6216_v52 = vpop.permute.xlu0 %3486 }
 0x2a7   : > { %2302 = vst.msk [vmem:[#allocation2 + $0x88] sm:$0xff] %vm504_vm2, %v2270_v9 }
 0x2a8   : > { %3366 = vst.msk [vmem:[#allocation2 + $0x68] sm:$0xff] %vm504_vm2, %v3334_v11 }
 0x2a9   : > { %v2537_v13 = vpop.f32.mrf.mxu2  ;;  %v2890_v16 = vpop.f32.mrf.mxu3 }
 0x2aa   : > { %v2625_v17 = vadd.f32 %v2593_v15, %v2537_v13  ;;  %v3397_v13 = vld [vmem:[#allocation2 + $0x60] sm:$0xff]  ;;  %v6225_v15 = vpop.permute.xlu1 %3476 }
 0x2ab   : > { %v2948_v18 = vld [vmem:[#allocation2 + $0x78] sm:$0xff]  ;;  %v2186_v21 = vpop.f32.mrf.mxu1  ;;  %v3246_v24 = vpop.f32.mrf.mxu0 }
 0x2ac   : > { %2657 = vst.msk [vmem:[#allocation2 + $0x80] sm:$0xff] %vm504_vm2, %v2625_v17  ;;  %v2980_v26 = vadd.f32 %v2948_v18, %v2890_v16  ;;  %v2271_v27 = vadd.f32 %v2239_v23, %v2186_v21  ;;  %v3396_v18 = vld [vmem:[#allocation2 + $0x58] sm:$0xff] }
 0x2ad   : > { %v3303_v28 = vld [vmem:[#allocation2 + $0x70] sm:$0xff] }
 0x2ae   : > { %v3335_v30 = vadd.f32 %v3303_v28, %v3244_v5  ;;  %3012 = vst.msk [vmem:[#allocation2 + $0x78] sm:$0xff] %vm504_vm2, %v2980_v26  ;;  %v2594_v32 = vld [vmem:[#allocation2 + $0x88] sm:$0xff]  ;;  %v6230_v26 = vpop.permute.xlu0 %3471 }
 0x2af   : > { %2303 = vst.msk [vmem:[#allocation2 + $0x90] sm:$0xff] %vm504_vm2, %v2271_v27  ;;  %v3398_v8 = vld [vmem:[#allocation2 + $0x68] sm:$0xff] }
 0x2b0   : > { %3367 = vst.msk [vmem:[#allocation2 + $0x70] sm:$0xff] %vm504_vm2, %v3335_v30  ;;  %v3622_v17 = vadd.f32 %v6156_v22, %v3398_v8  ;;  %v3621_v30 = vadd.f32 %v6141_v7, %v3397_v13 }
 0x2b1   : > { %v2539_v31 = vpop.f32.mrf.mxu2  ;;  %v2893_v35 = vpop.f32.mrf.mxu3 }
 0x2b2   : > { %v2626_v37 = vadd.f32 %v2594_v32, %v2539_v31  ;;  %v3653_v7 = vmax.f32 %v3621_v30, 0.0  ;;  %v3388_v30 = vld [vmem:[#allocation2 + $0x18] sm:$0xff] }
 0x2b3   : > { %v2949_v39 = vld [vmem:[#allocation2 + $0x80] sm:$0xff]  ;;  %v2188_v41 = vpop.f32.mrf.mxu1  ;;  %v3249_v43 = vpop.f32.mrf.mxu0 }
 0x2b4   : > { %2658 = vst.msk [vmem:[#allocation2 + $0x88] sm:$0xff] %vm504_vm2, %v2626_v37  ;;  %v2981_v45 = vadd.f32 %v2949_v39, %v2893_v35  ;;  %v2272_v47 = vadd.f32 %v2240_v42, %v2188_v41  ;;  %v2242_v35 = vld [vmem:[#allocation2 + $0xa8] sm:$0xff]  ;;  %v3395_v39 = vld [vmem:[#allocation2 + $0x50] sm:$0xff] }
 0x2b5   : > { %v3304_v48 = vld [vmem:[#allocation2 + $0x78] sm:$0xff] }
 0x2b6   : > { %v3336_v50 = vadd.f32 %v3304_v48, %v3246_v24  ;;  %3013 = vst.msk [vmem:[#allocation2 + $0x80] sm:$0xff] %vm504_vm2, %v2981_v45  ;;  %v2595_v54 = vld [vmem:[#allocation2 + $0x90] sm:$0xff]  ;;  %v6235_v48 = vpop.permute.xlu2 %3531 }
 0x2b7   : > { %2304 = vst.msk [vmem:[#allocation2 + $0x98] sm:$0xff] %vm504_vm2, %v2272_v47  ;;  %v3399_v0 = vld [vmem:[#allocation2 + $0x70] sm:$0xff]  ;;  %v3394_v47 = vld [vmem:[#allocation2 + $0x48] sm:$0xff] }
 0x2b8   : > { %3368 = vst.msk [vmem:[#allocation2 + $0x78] sm:$0xff] %vm504_vm2, %v3336_v50  ;;  %v3623_v10 = vadd.f32 %v6107_v38, %v3399_v0 }
 0x2b9   : > { %v2542_v53 = vpop.f32.mrf.mxu2  ;;  %v2895_v55 = vpop.f32.mrf.mxu3 }
 0x2ba   : > { %v2627_v57 = vadd.f32 %v2595_v54, %v2542_v53  ;;  %v3655_v38 = vmax.f32 %v3623_v10, 0.0  ;;  %v3619_v53 = vadd.f32 %v6175_v44, %v3395_v39 }
 0x2bb   : > { %v2950_v58 = vld [vmem:[#allocation2 + $0x88] sm:$0xff]  ;;  %v2191_v59 = vpop.f32.mrf.mxu1  ;;  %v3251_v63 = vpop.f32.mrf.mxu0 }
 0x2bc   : > { %2659 = vst.msk [vmem:[#allocation2 + $0x90] sm:$0xff] %vm504_vm2, %v2627_v57  ;;  %v2982_v3 = vadd.f32 %v2950_v58, %v2895_v55  ;;  %v2273_v4 = vadd.f32 %v2241_v60, %v2191_v59  ;;  %v3618_v57 = vadd.f32 %v6198_v12, %v3394_v47  ;;  %v3392_v58 = vld [vmem:[#allocation2 + $0x38] sm:$0xff] }
 0x2bd   : > { %v3305_v5 = vld [vmem:[#allocation2 + $0x80] sm:$0xff]  ;;  %v3616_v13 = vadd.f32 %v6216_v52, %v3392_v58 }
 0x2be   : > { %v3337_v9 = vadd.f32 %v3305_v5, %v3249_v43  ;;  %3014 = vst.msk [vmem:[#allocation2 + $0x88] sm:$0xff] %vm504_vm2, %v2982_v3  ;;  %v2596_v23 = vld [vmem:[#allocation2 + $0x98] sm:$0xff]  ;;  %v3654_v43 = vmax.f32 %v3622_v17, 0.0  ;;  %v3389_v52 = vld [vmem:[#allocation2 + $0x20] sm:$0xff] }
 0x2bf   : > { %2305 = vst.msk [vmem:[#allocation2 + $0xa0] sm:$0xff] %vm504_vm2, %v2273_v4  ;;  %v3400_v11 = vld [vmem:[#allocation2 + $0x78] sm:$0xff]  ;;  %v3651_v4 = vmax.f32 %v3619_v53, 0.0 }
 0x2c0   : > { %3369 = vst.msk [vmem:[#allocation2 + $0x80] sm:$0xff] %vm504_vm2, %v3337_v9  ;;  %v3624_v16 = vadd.f32 %v6122_v51, %v3400_v11  ;;  %v3620_v51 = vadd.f32 %v6172_v40, %v3396_v18  ;;  %v3393_v40 = vld [vmem:[#allocation2 + $0x40] sm:$0xff]  ;;  %v3680_v54 = vpack.c.bf16 %v3654_v43, %v3653_v7  ;;  %v2243_v9 = vld [vmem:[#allocation2 + $0xb0] sm:$0xff]  ;;  %v3650_v18 = vmax.f32 %v3618_v57, 0.0  ;;  %v3386_v57 = vld [vmem:[#allocation2 + $0x8] sm:$0xff] }
 0x2c1   : > { %v2544_v21 = vpop.f32.mrf.mxu2  ;;  %v2898_v24 = vpop.f32.mrf.mxu3  ;;  %v3617_v5 = vadd.f32 %v6187_v61, %v3393_v40  ;;  %v3391_v11 = vld [vmem:[#allocation2 + $0x30] sm:$0xff] }
 0x2c2   : > { %v2628_v27 = vadd.f32 %v2596_v23, %v2544_v21  ;;  %v3656_v28 = vmax.f32 %v3624_v16, 0.0  ;;  %v3652_v55 = vmax.f32 %v3620_v51, 0.0  ;;  %v6245_v21 = vpop.permute.xlu0 %3536 }
 0x2c3   : > { %v2951_v31 = vld [vmem:[#allocation2 + $0x90] sm:$0xff]  ;;  %v2193_v32 = vpop.f32.mrf.mxu1  ;;  %v3254_v37 = vpop.f32.mrf.mxu0  ;;  %v3649_v61 = vmax.f32 %v3617_v5, 0.0 }
 0x2c4   : > { %2660 = vst.msk [vmem:[#allocation2 + $0x98] sm:$0xff] %vm504_vm2, %v2628_v27  ;;  %v2983_v22 = vadd.f32 %v2951_v31, %v2898_v24  ;;  %v2274_v41 = vadd.f32 %v2242_v35, %v2193_v32  ;;  %v3681_v42 = vpack.c.bf16 %v3656_v28, %v3655_v38  ;;  %v3679_v17 = vpack.c.bf16 %v3652_v55, %v3651_v4  ;;  %v3390_v24 = vld [vmem:[#allocation2 + $0x28] sm:$0xff]  ;;  %v3467_v28 = vpop.permute.xlu2 %3466 }
 0x2c5   : > { %v3306_v45 = vld [vmem:[#allocation2 + $0x88] sm:$0xff]  ;;  %v3615_v38 = vadd.f32 %v6209_v36, %v3391_v11  ;;  %v3678_v31 = vpack.c.bf16 %v3650_v18, %v3649_v61  ;;  %v3648_v32 = vmax.f32 %v3616_v13, 0.0  ;;  %v3614_v35 = vadd.f32 %v6225_v15, %v3390_v24  ;;  %v3387_v36 = vld [vmem:[#allocation2 + $0x10] sm:$0xff] }
 0x2c6   : > { %v3338_v50 = vadd.f32 %v3306_v45, %v3251_v63  ;;  %3015 = vst.msk [vmem:[#allocation2 + $0x90] sm:$0xff] %vm504_vm2, %v2983_v22  ;;  %3698 = vmatpush.bf16.msrb.mxu1 %v3681_v42  ;;  %v2597_v60 = vld [vmem:[#allocation2 + $0xa0] sm:$0xff]  ;;  %v3462_v63 = vpop.permute.xlu1 %3461  ;;  %v3613_v42 = vadd.f32 %v6230_v26, %v3389_v52  ;;  %v3612_v43 = vadd.f32 %v3467_v28, %v3388_v30 }
 0x2c7   : > { %2306 = vst.msk [vmem:[#allocation2 + $0xa8] sm:$0xff] %vm504_vm2, %v2274_v41  ;;  %v3647_v41 = vmax.f32 %v3615_v38, 0.0  ;;  %v3646_v15 = vmax.f32 %v3614_v35, 0.0 }
 0x2c8   : > { %3370 = vst.msk [vmem:[#allocation2 + $0x88] sm:$0xff] %vm504_vm2, %v3338_v50  ;;  %v2244_v50 = vld [vmem:[#allocation2 + $0xb8] sm:$0xff]  ;;  %v3645_v26 = vmax.f32 %v3613_v42, 0.0  ;;  %v3644_v5 = vmax.f32 %v3612_v43, 0.0 }
 0x2c9   : > { %v2547_v59 = vpop.f32.mrf.mxu2  ;;  %v2900_v0 = vpop.f32.mrf.mxu3 }
 0x2ca   : > { %v2629_v3 = vadd.f32 %v2597_v60, %v2547_v59  ;;  %3699 = vmatpush.bf16.msrb.mxu1 %v3680_v54  ;;  %v3677_v54 = vpack.c.bf16 %v3648_v32, %v3647_v41  ;;  %v3611_v59 = vadd.f32 %v3462_v63, %v3387_v36 }
 0x2cb   : > { %v2952_v44 = vld [vmem:[#allocation2 + $0x98] sm:$0xff]  ;;  %v2196_v8 = vpop.f32.mrf.mxu1  ;;  %v3256_v10 = vpop.f32.mrf.mxu0 }
 0x2cc   : > { %2661 = vst.msk [vmem:[#allocation2 + $0xa0] sm:$0xff] %vm504_vm2, %v2629_v3  ;;  %v2984_v12 = vadd.f32 %v2952_v44, %v2900_v0  ;;  %v2275_v16 = vadd.f32 %v2243_v9, %v2196_v8  ;;  %v3452_v0 = vpop.permute.xlu0 %3451  ;;  %v3385_v3 = vld [vmem:[#allocation2] sm:$0xff]  ;;  %v3676_v44 = vpack.c.bf16 %v3646_v15, %v3645_v26  ;;  %v2247_v15 = vld [vmem:[#allocation2 + $0xd0] sm:$0xff] }
 0x2cd   : > { %v3307_v23 = vld [vmem:[#allocation2 + $0x90] sm:$0xff]  ;;  %v3609_v13 = vadd.f32 %v3452_v0, %v3385_v3 }
 0x2ce   : > { %v3339_v27 = vadd.f32 %v3307_v23, %v3254_v37  ;;  %3016 = vst.msk [vmem:[#allocation2 + $0x98] sm:$0xff] %vm504_vm2, %v2984_v12  ;;  %3700 = vmatpush.bf16.msrb.mxu1 %v3679_v17  ;;  %v2598_v51 = vld [vmem:[#allocation2 + $0xa8] sm:$0xff]  ;;  %v3457_v55 = vpop.permute.xlu1 %3456  ;;  %v3643_v12 = vmax.f32 %v3611_v59, 0.0  ;;  %v2245_v17 = vld [vmem:[#allocation2 + $0xc0] sm:$0xff] }
 0x2cf   : > { %2307 = vst.msk [vmem:[#allocation2 + $0xb0] sm:$0xff] %vm504_vm2, %v2275_v16  ;;  %v3610_v4 = vadd.f32 %v3457_v55, %v3386_v57  ;;  %v3641_v52 = vmax.f32 %v3609_v13, 0.0 }
 0x2d0   : > { %3371 = vst.msk [vmem:[#allocation2 + $0x90] sm:$0xff] %vm504_vm2, %v3339_v27  ;;  %v3675_v24 = vpack.c.bf16 %v3644_v5, %v3643_v12 }
 0x2d1   : > { %v2549_v39 = vpop.f32.mrf.mxu2  ;;  %v2903_v37 = vpop.f32.mrf.mxu3  ;;  %v3642_v23 = vmax.f32 %v3610_v4, 0.0 }
 0x2d2   : > { %v2630_v22 = vadd.f32 %v2598_v51, %v2549_v39  ;;  %3701 = vmatpush.bf16.msrb.mxu1 %v3678_v31 }
 0x2d3   : > { %v2953_v45 = vld [vmem:[#allocation2 + $0xa0] sm:$0xff]  ;;  %v2198_v47 = vpop.f32.mrf.mxu1  ;;  %v3259_v7 = vpop.f32.mrf.mxu0  ;;  %v3674_v30 = vpack.c.bf16 %v3642_v23, %v3641_v52 }
 0x2d4   : > { %2662 = vst.msk [vmem:[#allocation2 + $0xa8] sm:$0xff] %vm504_vm2, %v2630_v22  ;;  %v2985_v53 = vadd.f32 %v2953_v45, %v2903_v37  ;;  %v2276_v40 = vadd.f32 %v2244_v50, %v2198_v47  ;;  %v2246_v22 = vld [vmem:[#allocation2 + $0xc8] sm:$0xff] }
 0x2d5   : > { %v3308_v58 = vld [vmem:[#allocation2 + $0x98] sm:$0xff] }
 0x2d6   : > { %v3340_v60 = vadd.f32 %v3308_v58, %v3256_v10  ;;  %3017 = vst.msk [vmem:[#allocation2 + $0xa0] sm:$0xff] %vm504_vm2, %v2985_v53  ;;  %3702 = vmatpush.bf16.msrb.mxu1 %v3677_v54  ;;  %v2599_v9 = vld [vmem:[#allocation2 + $0xb0] sm:$0xff] }
 0x2d7   : > { %2308 = vst.msk [vmem:[#allocation2 + $0xb8] sm:$0xff] %vm504_vm2, %v2276_v40 }
 0x2d8   : > { %3372 = vst.msk [vmem:[#allocation2 + $0x98] sm:$0xff] %vm504_vm2, %v3340_v60 }
 0x2d9   : > { %v2552_v8 = vpop.f32.mrf.mxu2  ;;  %v2905_v11 = vpop.f32.mrf.mxu3 }
 0x2da   : > { %v2631_v63 = vadd.f32 %v2599_v9, %v2552_v8  ;;  %3703 = vmatpush.bf16.msrb.mxu1 %v3676_v44  ;;  %v2248_v8 = vld [vmem:[#allocation2 + $0xd8] sm:$0xff] }
 0x2db   : > { %v2954_v10 = vld [vmem:[#allocation2 + $0xa8] sm:$0xff]  ;;  %v2201_v16 = vpop.f32.mrf.mxu1  ;;  %v3261_v18 = vpop.f32.mrf.mxu0 }
 0x2dc   : > { %2663 = vst.msk [vmem:[#allocation2 + $0xb0] sm:$0xff] %vm504_vm2, %v2631_v63  ;;  %v2986_v27 = vadd.f32 %v2954_v10, %v2905_v11  ;;  %v2277_v61 = vadd.f32 %v2245_v17, %v2201_v16 }
 0x2dd   : > { %v3309_v38 = vld [vmem:[#allocation2 + $0xa0] sm:$0xff] }
 0x2de   : > { %v3341_v28 = vadd.f32 %v3309_v38, %v3259_v7  ;;  %3018 = vst.msk [vmem:[#allocation2 + $0xa8] sm:$0xff] %vm504_vm2, %v2986_v27  ;;  %3704 = vmatpush.bf16.msrb.mxu1 %v3675_v24  ;;  %v2600_v32 = vld [vmem:[#allocation2 + $0xb8] sm:$0xff]  ;;  %v2249_v27 = vld [vmem:[#allocation2 + $0xe0] sm:$0xff] }
 0x2df   : > { %2309 = vst.msk [vmem:[#allocation2 + $0xc0] sm:$0xff] %vm504_vm2, %v2277_v61 }
 0x2e0   : > { %3373 = vst.msk [vmem:[#allocation2 + $0xa0] sm:$0xff] %vm504_vm2, %v3341_v28 }
 0x2e1   : > { %v2554_v31 = vpop.f32.mrf.mxu2  ;;  %v2908_v35 = vpop.f32.mrf.mxu3 }
 0x2e2   : > { %v2632_v39 = vadd.f32 %v2600_v32, %v2554_v31  ;;  %3705 = vmatpush.bf16.msrb.mxu1 %v3674_v30 }
 0x2e3   : > { %v2955_v51 = vld [vmem:[#allocation2 + $0xb0] sm:$0xff]  ;;  %v2203_v37 = vpop.f32.mrf.mxu1  ;;  %v3264_v41 = vpop.f32.mrf.mxu0 }
 0x2e4   : > { %2664 = vst.msk [vmem:[#allocation2 + $0xb8] sm:$0xff] %vm504_vm2, %v2632_v39  ;;  %v2987_v42 = vadd.f32 %v2955_v51, %v2908_v35  ;;  %v2278_v36 = vadd.f32 %v2246_v22, %v2203_v37  ;;  %v2250_v22 = vld [vmem:[#allocation2 + $0xe8] sm:$0xff] }
 0x2e5   : > { %v3310_v43 = vld [vmem:[#allocation2 + $0xa8] sm:$0xff] }
 0x2e6   : > { %v3342_v45 = vadd.f32 %v3310_v43, %v3261_v18  ;;  %3019 = vst.msk [vmem:[#allocation2 + $0xb0] sm:$0xff] %vm504_vm2, %v2987_v42  ;;  %v2601_v50 = vld [vmem:[#allocation2 + $0xc0] sm:$0xff] }
 0x2e7   : > { %2310 = vst.msk [vmem:[#allocation2 + $0xc8] sm:$0xff] %vm504_vm2, %v2278_v36 }
 0x2e8   : > { %3374 = vst.msk [vmem:[#allocation2 + $0xa8] sm:$0xff] %vm504_vm2, %v3342_v45 }
 0x2e9   : > { %v2557_v47 = vpop.f32.mrf.mxu2  ;;  %v2910_v7 = vpop.f32.mrf.mxu3 }
 0x2ea   : > { %v2633_v53 = vadd.f32 %v2601_v50, %v2557_v47 }
 0x2eb   : > { %v2956_v40 = vld [vmem:[#allocation2 + $0xb8] sm:$0xff]  ;;  %v2206_v54 = vpop.f32.mrf.mxu1  ;;  %v3266_v55 = vpop.f32.mrf.mxu0 }
 0x2ec   : > { %2665 = vst.msk [vmem:[#allocation2 + $0xc0] sm:$0xff] %vm504_vm2, %v2633_v53  ;;  %v2988_v57 = vadd.f32 %v2956_v40, %v2910_v7  ;;  %v2279_v58 = vadd.f32 %v2247_v15, %v2206_v54  ;;  %v2251_v15 = vld [vmem:[#allocation2 + $0xf0] sm:$0xff] }
 0x2ed   : > { %v3311_v59 = vld [vmem:[#allocation2 + $0xb0] sm:$0xff] }
 0x2ee   : > { %v3343_v60 = vadd.f32 %v3311_v59, %v3264_v41  ;;  %3020 = vst.msk [vmem:[#allocation2 + $0xb8] sm:$0xff] %vm504_vm2, %v2988_v57  ;;  %v2602_v0 = vld [vmem:[#allocation2 + $0xc8] sm:$0xff] }
 0x2ef   : > { %2311 = vst.msk [vmem:[#allocation2 + $0xd0] sm:$0xff] %vm504_vm2, %v2279_v58 }
 0x2f0   : > { %3375 = vst.msk [vmem:[#allocation2 + $0xb0] sm:$0xff] %vm504_vm2, %v3343_v60 }
 0x2f1   : > { %v2559_v26 = vpop.f32.mrf.mxu2  ;;  %v2913_v3 = vpop.f32.mrf.mxu3 }
 0x2f2   : > { %v2634_v4 = vadd.f32 %v2602_v0, %v2559_v26 }
 0x2f3   : > { %v2957_v5 = vld [vmem:[#allocation2 + $0xc0] sm:$0xff]  ;;  %v2208_v44 = vpop.f32.mrf.mxu1  ;;  %v3269_v9 = vpop.f32.mrf.mxu0 }
 0x2f4   : > { %2666 = vst.msk [vmem:[#allocation2 + $0xc8] sm:$0xff] %vm504_vm2, %v2634_v4  ;;  %v2989_v11 = vadd.f32 %v2957_v5, %v2913_v3  ;;  %v2280_v13 = vadd.f32 %v2248_v8, %v2208_v44  ;;  %v2252_v8 = vld [vmem:[#allocation2 + $0xf8] sm:$0xff] }
 0x2f5   : > { %v3312_v12 = vld [vmem:[#allocation2 + $0xb8] sm:$0xff] }
 0x2f6   : > { %v3344_v63 = vadd.f32 %v3312_v12, %v3266_v55  ;;  %3021 = vst.msk [vmem:[#allocation2 + $0xc0] sm:$0xff] %vm504_vm2, %v2989_v11  ;;  %v2603_v16 = vld [vmem:[#allocation2 + $0xd0] sm:$0xff] }
 0x2f7   : > { %2312 = vst.msk [vmem:[#allocation2 + $0xd8] sm:$0xff] %vm504_vm2, %v2280_v13 }
 0x2f8   : > { %3376 = vst.msk [vmem:[#allocation2 + $0xb8] sm:$0xff] %vm504_vm2, %v3344_v63 }
 0x2f9   : > { %v2562_v10 = vpop.f32.mrf.mxu2  ;;  %v2915_v17 = vpop.f32.mrf.mxu3 }
 0x2fa   : > { %v2635_v18 = vadd.f32 %v2603_v16, %v2562_v10 }
 0x2fb   : > { %v2958_v23 = vld [vmem:[#allocation2 + $0xc8] sm:$0xff]  ;;  %v2211_v24 = vpop.f32.mrf.mxu1  ;;  %v3271_v61 = vpop.f32.mrf.mxu0 }
 0x2fc   : > { %2667 = vst.msk [vmem:[#allocation2 + $0xd0] sm:$0xff] %vm504_vm2, %v2635_v18  ;;  %v2990_v38 = vadd.f32 %v2958_v23, %v2915_v17  ;;  %v2281_v52 = vadd.f32 %v2249_v27, %v2211_v24 }
 0x2fd   : > { %v3313_v28 = vld [vmem:[#allocation2 + $0xc0] sm:$0xff] }
 0x2fe   : > { %v3345_v30 = vadd.f32 %v3313_v28, %v3269_v9  ;;  %3022 = vst.msk [vmem:[#allocation2 + $0xc8] sm:$0xff] %vm504_vm2, %v2990_v38  ;;  %v2604_v32 = vld [vmem:[#allocation2 + $0xd8] sm:$0xff] }
 0x2ff   : > { %2313 = vst.msk [vmem:[#allocation2 + $0xe0] sm:$0xff] %vm504_vm2, %v2281_v52 }
 0x300   : > { %3377 = vst.msk [vmem:[#allocation2 + $0xc0] sm:$0xff] %vm504_vm2, %v3345_v30 }
 0x301   : > { %v2564_v31 = vpop.f32.mrf.mxu2  ;;  %v2918_v35 = vpop.f32.mrf.mxu3 }
 0x302   : > { %v2636_v39 = vadd.f32 %v2604_v32, %v2564_v31 }
 0x303   : > { %v2959_v51 = vld [vmem:[#allocation2 + $0xd0] sm:$0xff]  ;;  %v2213_v37 = vpop.f32.mrf.mxu1  ;;  %v3274_v41 = vpop.f32.mrf.mxu0 }
 0x304   : > { %2668 = vst.msk [vmem:[#allocation2 + $0xd8] sm:$0xff] %vm504_vm2, %v2636_v39  ;;  %v2991_v42 = vadd.f32 %v2959_v51, %v2918_v35  ;;  %v2282_v36 = vadd.f32 %v2250_v22, %v2213_v37 }
 0x305   : > { %v3314_v43 = vld [vmem:[#allocation2 + $0xc8] sm:$0xff] }
 0x306   : > { %v3346_v45 = vadd.f32 %v3314_v43, %v3271_v61  ;;  %3023 = vst.msk [vmem:[#allocation2 + $0xd0] sm:$0xff] %vm504_vm2, %v2991_v42  ;;  %v2605_v50 = vld [vmem:[#allocation2 + $0xe0] sm:$0xff] }
 0x307   : > { %2314 = vst.msk [vmem:[#allocation2 + $0xe8] sm:$0xff] %vm504_vm2, %v2282_v36 }
 0x308   : > { %3378 = vst.msk [vmem:[#allocation2 + $0xc8] sm:$0xff] %vm504_vm2, %v3346_v45 }
 0x309   : > { %v2567_v47 = vpop.f32.mrf.mxu2  ;;  %v2920_v7 = vpop.f32.mrf.mxu3 }
 0x30a   : > { %v2637_v53 = vadd.f32 %v2605_v50, %v2567_v47 }
 0x30b   : > { %v2960_v40 = vld [vmem:[#allocation2 + $0xd8] sm:$0xff]  ;;  %v2216_v54 = vpop.f32.mrf.mxu1  ;;  %v3276_v58 = vpop.f32.mrf.mxu0 }
 0x30c   : > { %2669 = vst.msk [vmem:[#allocation2 + $0xe0] sm:$0xff] %vm504_vm2, %v2637_v53  ;;  %v2992_v55 = vadd.f32 %v2960_v40, %v2920_v7  ;;  %v2283_v57 = vadd.f32 %v2251_v15, %v2216_v54 }
 0x30d   : > { %v3315_v59 = vld [vmem:[#allocation2 + $0xd0] sm:$0xff] }
 0x30e   : > { %v3347_v60 = vadd.f32 %v3315_v59, %v3274_v41  ;;  %3024 = vst.msk [vmem:[#allocation2 + $0xd8] sm:$0xff] %vm504_vm2, %v2992_v55  ;;  %v2606_v0 = vld [vmem:[#allocation2 + $0xe8] sm:$0xff] }
 0x30f   : > { %2315 = vst.msk [vmem:[#allocation2 + $0xf0] sm:$0xff] %vm504_vm2, %v2283_v57 }
 0x310   : > { %3379 = vst.msk [vmem:[#allocation2 + $0xd0] sm:$0xff] %vm504_vm2, %v3347_v60 }
 0x311   : > { %v2569_v26 = vpop.f32.mrf.mxu2  ;;  %v2923_v3 = vpop.f32.mrf.mxu3 }
 0x312   : > { %v2638_v4 = vadd.f32 %v2606_v0, %v2569_v26 }
 0x313   : > { %v2961_v5 = vld [vmem:[#allocation2 + $0xe0] sm:$0xff]  ;;  %v2218_v44 = vpop.f32.mrf.mxu1  ;;  %v3279_v63 = vpop.f32.mrf.mxu0 }
 0x314   : > { %2670 = vst.msk [vmem:[#allocation2 + $0xe8] sm:$0xff] %vm504_vm2, %v2638_v4  ;;  %v2993_v9 = vadd.f32 %v2961_v5, %v2923_v3  ;;  %v2284_v11 = vadd.f32 %v2252_v8, %v2218_v44  ;;  %v3694_v3 = vld [vmem:[#allocation1] sm:$0xff]  ;;  %v3410_v8 = vld [vmem:[#allocation2 + $0xc8] sm:$0xff] }
 0x315   : > { %v3316_v13 = vld [vmem:[#allocation2 + $0xd8] sm:$0xff]  ;;  %3706 = vmatmul.bf16.vlgmr.msrb.gmra.mxu1 %v3694_v3 }
 0x316   : > { %v3348_v12 = vadd.f32 %v3316_v13, %v3276_v58  ;;  %3025 = vst.msk [vmem:[#allocation2 + $0xe0] sm:$0xff] %vm504_vm2, %v2993_v9  ;;  %v2607_v16 = vld [vmem:[#allocation2 + $0xf0] sm:$0xff]  ;;  %v3634_v13 = vadd.f32 %v6165_v34, %v3410_v8 }
 0x317   : > { %2316 = vst.msk [vmem:[#allocation2 + $0xf8] sm:$0xff] %vm504_vm2, %v2284_v11  ;;  %v3411_v0 = vld [vmem:[#allocation2 + $0xd0] sm:$0xff] }
 0x318   : > { %3380 = vst.msk [vmem:[#allocation2 + $0xd8] sm:$0xff] %vm504_vm2, %v3348_v12  ;;  %v3635_v9 = vadd.f32 %v6134_v2, %v3411_v0  ;;  %v3408_v12 = vld [vmem:[#allocation2 + $0xb8] sm:$0xff] }
 0x319   : > { %v2572_v10 = vpop.f32.mrf.mxu2  ;;  %v2925_v17 = vpop.f32.mrf.mxu3 }
 0x31a   : > { %v2639_v18 = vadd.f32 %v2607_v16, %v2572_v10  ;;  %v3407_v10 = vld [vmem:[#allocation2 + $0xb0] sm:$0xff] }
 0x31b   : > { %v2962_v23 = vld [vmem:[#allocation2 + $0xe8] sm:$0xff]  ;;  %v3281_v38 = vpop.f32.mrf.mxu0  ;;  %v3631_v2 = vadd.f32 %v6181_v56, %v3407_v10 }
 0x31c   : > { %2671 = vst.msk [vmem:[#allocation2 + $0xf0] sm:$0xff] %vm504_vm2, %v2639_v18  ;;  %v2994_v24 = vadd.f32 %v2962_v23, %v2925_v17  ;;  %v3666_v17 = vmax.f32 %v3634_v13, 0.0  ;;  %v3406_v18 = vld [vmem:[#allocation2 + $0xa8] sm:$0xff] }
 0x31d   : > { %v3317_v27 = vld [vmem:[#allocation2 + $0xe0] sm:$0xff]  ;;  %v3630_v34 = vadd.f32 %v6201_v25, %v3406_v18 }
 0x31e   : > { %v3349_v61 = vadd.f32 %v3317_v27, %v3279_v63  ;;  %3026 = vst.msk [vmem:[#allocation2 + $0xe8] sm:$0xff] %vm504_vm2, %v2994_v24  ;;  %v2608_v28 = vld [vmem:[#allocation2 + $0xf8] sm:$0xff]  ;;  %v3405_v24 = vld [vmem:[#allocation2 + $0xa0] sm:$0xff] }
 0x31f   : > { %v3412_v58 = vld [vmem:[#allocation2 + $0xd8] sm:$0xff] }
 0x320   : > { %3381 = vst.msk [vmem:[#allocation2 + $0xe0] sm:$0xff] %vm504_vm2, %v3349_v61  ;;  %v3636_v44 = vadd.f32 %v6131_v62, %v3412_v58  ;;  %v3632_v62 = vadd.f32 %v6192_v6, %v3408_v12 }
 0x321   : > { %v2574_v52 = vpop.f32.mrf.mxu2  ;;  %v2928_v30 = vpop.f32.mrf.mxu3 }
 0x322   : > { %v2640_v31 = vadd.f32 %v2608_v28, %v2574_v52  ;;  %v3664_v61 = vmax.f32 %v3632_v62, 0.0  ;;  %v3663_v52 = vmax.f32 %v3631_v2, 0.0  ;;  %v3403_v28 = vld [vmem:[#allocation2 + $0x90] sm:$0xff] }
 0x323   : > { %v2963_v32 = vld [vmem:[#allocation2 + $0xf0] sm:$0xff]  ;;  %v3284_v37 = vpop.f32.mrf.mxu0  ;;  %v3627_v56 = vadd.f32 %v6212_v49, %v3403_v28 }
 0x324   : > { %2672 = vst.msk [vmem:[#allocation2 + $0xf8] sm:$0xff] %vm504_vm2, %v2640_v31  ;;  %v2995_v35 = vadd.f32 %v2963_v32, %v2928_v30  ;;  %v3685_v30 = vpack.c.bf16 %v3664_v61, %v3663_v52  ;;  %v3662_v31 = vmax.f32 %v3630_v34, 0.0  ;;  %v3402_v32 = vld [vmem:[#allocation2 + $0x88] sm:$0xff] }
 0x325   : > { %v3318_v39 = vld [vmem:[#allocation2 + $0xe8] sm:$0xff]  ;;  %v3626_v25 = vadd.f32 %v6245_v21, %v3402_v32  ;;  %v3691_v21 = vstv %s3690_s13  ;;  %s5051_s13 = scalar_lea.hbm %s6363_s5, 8 }
 0x326   : > { %v3350_v51 = vadd.f32 %v3318_v39, %v3281_v38  ;;  %3027 = vst.msk [vmem:[#allocation2 + $0xf0] sm:$0xff] %vm504_vm2, %v2995_v35  ;;  %v3404_v38 = vld [vmem:[#allocation2 + $0x98] sm:$0xff]  ;;  %v3401_v39 = vld [vmem:[#allocation2 + $0x80] sm:$0xff]  ;;  %p5053_p5 = scmp.lt.s32.totalorder %s5051_s13, %s5047_s23 }
 0x327   : > { %v3413_v15 = vld [vmem:[#allocation2 + $0xe0] sm:$0xff]  ;;  %v3628_v6 = vadd.f32 %v6219_v1, %v3404_v38 }
 0x328   : > { %3382 = vst.msk [vmem:[#allocation2 + $0xe8] sm:$0xff] %vm504_vm2, %v3350_v51  ;;  %v3637_v26 = vadd.f32 %v6090_v19, %v3413_v15  ;;  %v3667_v19 = vmax.f32 %v3635_v9, 0.0  ;;  %p5054_p6 = por %p5053_p5, %p5052_p4 }
 0x329   : > { %v2930_v22 = vpop.f32.mrf.mxu3 }
 0x32a   : > { %p5055_p7 = pnand %p5054_p6, %p5050_p2 }
 0x32b   : > { %v2964_v41 = vld [vmem:[#allocation2 + $0xf8] sm:$0xff]  ;;  %v3286_v45 = vpop.f32.mrf.mxu0 }
 0x32c   : > { %v2996_v42 = vadd.f32 %v2964_v41, %v2930_v22  ;;  %v3659_v22 = vmax.f32 %v3627_v56, 0.0 }
 0x32d   : > { %v3319_v36 = vld [vmem:[#allocation2 + $0xf0] sm:$0xff] }
 0x32e   : > { %v3351_v43 = vadd.f32 %v3319_v36, %v3284_v37  ;;  %3028 = vst.msk [vmem:[#allocation2 + $0xf8] sm:$0xff] %vm504_vm2, %v2996_v42  ;;  %v3660_v37 = vmax.f32 %v3628_v6, 0.0  ;;  %v3658_v42 = vmax.f32 %v3626_v25, 0.0 }
 0x32f   : > { %v3414_v53 = vld [vmem:[#allocation2 + $0xe8] sm:$0xff] }
 0x330   : > { %3383 = vst.msk [vmem:[#allocation2 + $0xf0] sm:$0xff] %vm504_vm2, %v3351_v43  ;;  %v3638_v57 = vadd.f32 %v6100_v33, %v3414_v53  ;;  %v3668_v33 = vmax.f32 %v3636_v44, 0.0  ;;  %v3683_v41 = vpack.c.bf16 %v3660_v37, %v3659_v22  ;;  %v3695_v43 = vld [vmem:[#allocation1 + $0x9] sm:$0xff] }
 0x332   : > { %v3670_v5 = vmax.f32 %v3638_v57, 0.0  ;;  %v3687_v16 = vpack.c.bf16 %v3668_v33, %v3667_v19 }
 0x335   : > { %v3320_v47 = vld [vmem:[#allocation2 + $0xf8] sm:$0xff] }
 0x336   : > { %v3352_v50 = vadd.f32 %v3320_v47, %v3286_v45 }
 0x337   : > { %v3415_v7 = vld [vmem:[#allocation2 + $0xf0] sm:$0xff] }
 0x338   : > { %3384 = vst.msk [vmem:[#allocation2 + $0xf8] sm:$0xff] %vm504_vm2, %v3352_v50  ;;  %v3639_v40 = vadd.f32 %v6083_v14, %v3415_v7  ;;  %v3669_v14 = vmax.f32 %v3637_v26, 0.0 }
 0x33a   : > { %v3671_v59 = vmax.f32 %v3639_v40, 0.0  ;;  %v3688_v11 = vpack.c.bf16 %v3670_v5, %v3669_v14 }
 0x33f   : > { %v3416_v54 = vld [vmem:[#allocation2 + $0xf8] sm:$0xff] }
 0x340   : > { %v3640_v55 = vadd.f32 %v6115_v46, %v3416_v54  ;;  %v3409_v46 = vld [vmem:[#allocation2 + $0xc0] sm:$0xff] }
 0x341   : > { %v3633_v63 = vadd.f32 %v6150_v20, %v3409_v46  ;;  %v3629_v20 = vadd.f32 %v6204_v29, %v3405_v24  ;;  %v3625_v29 = vadd.f32 %v6235_v48, %v3401_v39 }
 0x342   : > { %v3672_v60 = vmax.f32 %v3640_v55, 0.0 }
 0x343   : > { %v3665_v23 = vmax.f32 %v3633_v63, 0.0  ;;  %v3661_v35 = vmax.f32 %v3629_v20, 0.0  ;;  %v3657_v1 = vmax.f32 %v3625_v29, 0.0 }
 0x344   : > { %v3689_v4 = vpack.c.bf16 %v3672_v60, %v3671_v59 }
 0x345   : > { %v3686_v27 = vpack.c.bf16 %v3666_v17, %v3665_v23  ;;  %v3684_v51 = vpack.c.bf16 %v3662_v31, %v3661_v35  ;;  %v3682_v36 = vpack.c.bf16 %v3658_v42, %v3657_v1 }
 0x346   : > { %3711 = vmatpush.bf16.msrb.mxu2 %v3689_v4 }
 0x34a   : > { %3712 = vmatpush.bf16.msrb.mxu2 %v3688_v11 }
 0x34e   : > { %3713 = vmatpush.bf16.msrb.mxu2 %v3687_v16 }
 0x352   : > { %3714 = vmatpush.bf16.msrb.mxu2 %v3686_v27 }
 0x356   : > { %3715 = vmatpush.bf16.msrb.mxu2 %v3685_v30 }
 0x35a   : > { %3716 = vmatpush.bf16.msrb.mxu2 %v3684_v51 }
 0x35e   : > { %3717 = vmatpush.bf16.msrb.mxu2 %v3683_v41 }
 0x362   : > { %3718 = vmatpush.bf16.msrb.mxu2 %v3682_v36 }
 0x365   : > { %3719 = vmatmul.bf16.vlgmr.msrb.gmra.mxu2 %v3695_v43 }
 0x392   : > { %v3707_v49 = vpop.f32.mrf.mxu1 }
 0x393   : > { %v3708_v48 = vadd.f32 %v3707_v49, %v3691_v21 }
 0x39a   : > { %v3709_v45 = vpop.f32.mrf.mxu1 }
 0x3e8   : > { %v3720_v47 = vpop.f32.mrf.mxu2 }
 0x3e9   : > { %v3721_v50 = vadd.f32 %v3720_v47, %v3708_v48 }
 0x3eb   : > { %3725 = vst.msk [vmem:[%s239_s19] sm:$0x1] %vm3724_vm3, %v3721_v50 }
 0x3ec   : > { %5058 = shalt.err (!%p5055_p7)
}
 0x3ed   : > { %4948 = dma.vmem_to_hbm [thread:$0]  (%p5220_p3), %s3740_s28, 16, %s3742_s6, %s3727_s9  }
 0x3f0   : > { %v3722_v7 = vpop.f32.mrf.mxu2 }
 0x3f1 PF: > { %p4954_p9 = scmp.ge.s32.totalorder %s5125_s27, 2  ;;  %s3753_s15 = sand.u32 1, %s5097_s20  }
 0x3f2   : > { %s3754_s16 = scalar_lea.sflag [#allocation5], %s3753_s15 }
 0x3f3   : > { %p4951_p10 = pnand %p4954_p9, %p5229_p8 }
 0x3f5   : > { %p4952_p11 = pneg %p4951_p10 }
 0x3f7   : > { %5092 = dma.done.wait (%p4952_p11), %s3754_s16, 16  }
 0x3f8   : > { %5094 = vsyncadd (%p4952_p11), %s3754_s16, 4294967280  ;;  %s19_s27 = sadd.s32 1, %s5125_s27   ;;  %s6366_s20 = smov %s5101_s21 }
 0x3f9   : > { %p16_p12 = scmp.ge.s32.totalorder %s19_s27, 10   ;;  %s6367_s21 = smov %s5105_s22 }
 0x3fa   : > { %s6368_s22 = smov %s5238_s12  ;;  %s6369_s23 = smov %s5117_s25 }
 0x3fb   : > { %s6370_s24 = smov %s5121_s26  ;;  %s6371_s25 = smov %s6374_s29 }
 0x3fc   : > { %s6372_s26 = smov %s6378_s30  ;;  %18 = sbr.rel (!%p16_p12) target bundleno = 7 (0x7), region = 83 }
 0x401   :  { %3759 = vsyncpa [#allocation5], 1 }
 0x402   :  { %3761 = vsyncpa [#allocation5 + $0x1], 1 }

</bundles_post_ra>
